<compile_context>
chip_gen: v5e
topology: v5e:2x2
jax: 0.10.0
libtpu: 0.0.40
codegen_flags: <defaults>
</compile_context>

<pallas_src>
import math

import jax
import jax.numpy as jnp
from jax.experimental import pallas as pl
from jax.experimental.pallas import tpu as pltpu


LATENT_SIZE = 32
IN_FEATURES = 28 * 28          # 784 (full-array block dim -> allowed layout;
                               #      per review, do NOT pad K on v5e)
HIDDEN = 200
HIDDEN_PAD = 256               # lane-aligned hidden width (multiple of 128)
MAX_TB = 1024                  # batch-tile cap (review: sweep 1024-2048)


def _round_up(v, m):
    return ((v + m - 1) // m) * m


def _mlp_kernel(x_ref,
                w1_ref, b1_ref,
                w2_ref, b2_ref,
                w3_ref, b3_ref,
                w4_ref, b4_ref,
                o_ref):
    """Whole encoder MLP for one batch tile; weights resident in VMEM.

    x arrives f32 (HBM stream) and is cast to bf16 in-kernel for the MXU.
    Accumulation: f32.  Bias + ReLU: f32 (v5e VPU has no bf16 path).
    Output store: bf16 (halves writeback bytes of the lane-padded tile).
    """
    x = x_ref[...].astype(jnp.bfloat16)

    h = jnp.dot(x, w1_ref[...], preferred_element_type=jnp.float32)
    h = jnp.maximum(h + b1_ref[...], 0.0)

    h = jnp.dot(h.astype(jnp.bfloat16), w2_ref[...],
                preferred_element_type=jnp.float32)
    h = jnp.maximum(h + b2_ref[...], 0.0)

    h = jnp.dot(h.astype(jnp.bfloat16), w3_ref[...],
                preferred_element_type=jnp.float32)
    h = jnp.maximum(h + b3_ref[...], 0.0)

    h = jnp.dot(h.astype(jnp.bfloat16), w4_ref[...],
                preferred_element_type=jnp.float32)
    o_ref[...] = (h + b4_ref[...]).astype(o_ref.dtype)


def init_params(key, latent_size=LATENT_SIZE, dtype=jnp.float32):
    """Deterministic init mimicking PyTorch Linear default (U[-1/sqrt(fan_in), +])."""
    dims = [(IN_FEATURES, HIDDEN), (HIDDEN, HIDDEN),
            (HIDDEN, HIDDEN), (HIDDEN, latent_size)]
    params = []
    keys = jax.random.split(key, 2 * len(dims))
    for i, (fan_in, fan_out) in enumerate(dims):
        bound = 1.0 / math.sqrt(fan_in)
        w = jax.random.uniform(keys[2 * i], (fan_in, fan_out), dtype, -bound, bound)
        b = jax.random.uniform(keys[2 * i + 1], (1, fan_out), dtype, -bound, bound)
        params.append((w, b))
    return params


def prepare_params(params):
    """One-time prep (hoisted out of the forward): zero-pad hidden 200->256 and
    latent -> multiple of 128; weights -> bf16, biases stay f32."""
    (w1, b1), (w2, b2), (w3, b3), (w4, b4) = params
    latent = w4.shape[1]
    latent_pad = max(128, _round_up(latent, 128))

    def padw(w, rows, cols):
        return jnp.pad(
            w, ((0, rows - w.shape[0]), (0, cols - w.shape[1]))
        ).astype(jnp.bfloat16)

    def padb(b, cols):
        return jnp.pad(b, ((0, 0), (0, cols - b.shape[1]))).astype(jnp.float32)

    flat = (
        padw(w1, IN_FEATURES, HIDDEN_PAD), padb(b1, HIDDEN_PAD),
        padw(w2, HIDDEN_PAD, HIDDEN_PAD),  padb(b2, HIDDEN_PAD),
        padw(w3, HIDDEN_PAD, HIDDEN_PAD),  padb(b3, HIDDEN_PAD),
        padw(w4, HIDDEN_PAD, latent_pad),  padb(b4, latent_pad),
    )
    flat = tuple(jax.block_until_ready(t) for t in flat)
    return flat, latent, latent_pad


def _choose_tile(B):
    """Batch-tile size: multiple of 16, >=2 tiles for mid-size B (v7x 2-TC)."""
    if B > MAX_TB:
        TB = MAX_TB
    elif B > 64:
        TB = min(MAX_TB, _round_up((B + 1) // 2, 16))   # >= 2 grid steps
    else:
        TB = _round_up(max(B, 16), 16)
    return TB, _round_up(B, TB)


def encoder_forward(x_nchw, prepared):
    """x_nchw: (B, 1, 28, 28) float32  ->  (B, latent_size) float32."""
    assert x_nchw.shape[1] == 1 and x_nchw.shape[2] == 28 and x_nchw.shape[3] == 28
    B = x_nchw.shape[0]
    flat_params, latent, latent_pad = prepared

    # Glue: flatten (start_dim=1).  x stays f32; bf16 cast happens in-kernel.
    x = x_nchw.reshape(B, IN_FEATURES)

    TB, B_pad = _choose_tile(B)
    if B_pad != B:
        x = jnp.pad(x, ((0, B_pad - B), (0, 0)))
    grid = (B_pad // TB,)

    weight_bytes = sum(t.size * t.dtype.itemsize for t in flat_params)
    flops = 2 * B_pad * (IN_FEATURES * HIDDEN_PAD
                         + 2 * HIDDEN_PAD * HIDDEN_PAD
                         + HIDDEN_PAD * latent_pad)
    bytes_accessed = (x.size * x.dtype.itemsize          # f32 x stream
                      + weight_bytes                      # bf16 weights (once)
                      + B_pad * latent_pad * 2)           # bf16 output

    # Right-sized VMEM budget: 2x f32 x tile + 2x bf16 out tile +
    # single-buffered weights + in-kernel bf16 x copy + f32 intermediates,
    # with ~1.5x + 8 MiB margin, clamped well under v7x's 64 MiB physical.
    vmem_est = (2 * TB * IN_FEATURES * x.dtype.itemsize
                + 2 * TB * latent_pad * 2
                + weight_bytes
                + TB * IN_FEATURES * 2
                + 4 * TB * HIDDEN_PAD * 4)
    vmem_limit = max(16 << 20, min(56 << 20, int(vmem_est * 1.5) + (8 << 20)))

    def run(single_buffer_weights):
        def const_spec(shape):
            # Constant block index across the grid -> weights fetched once.
            nd = len(shape)
            if single_buffer_weights:
                return pl.BlockSpec(shape, lambda i, _nd=nd: (0,) * _nd,
                                    pipeline_mode=pl.Buffered(buffer_count=1))
            return pl.BlockSpec(shape, lambda i, _nd=nd: (0,) * _nd)

        in_specs = [pl.BlockSpec((TB, IN_FEATURES), lambda i: (i, 0))]
        in_specs += [const_spec(t.shape) for t in flat_params]
        out_spec = pl.BlockSpec((TB, latent_pad), lambda i: (i, 0))

        return pl.pallas_call(
            _mlp_kernel,
            out_shape=jax.ShapeDtypeStruct((B_pad, latent_pad), jnp.bfloat16),
            grid=grid,
            in_specs=in_specs,
            out_specs=out_spec,
            compiler_params=pltpu.CompilerParams(
                dimension_semantics=("parallel",),      # independent batch tiles
                vmem_limit_bytes=vmem_limit),
            cost_estimate=pl.CostEstimate(
                flops=flops, transcendentals=0, bytes_accessed=bytes_accessed),
        )(x, *flat_params)

    try:
        out = run(single_buffer_weights=True)
    except Exception:
        # Fallback if this jax version rejects Buffered(1) on input specs;
        # default double-buffering is functionally identical.
        out = run(single_buffer_weights=False)

    return out[:B, :latent].astype(jnp.float32)


def _reference_forward(x_nchw, params):
    """Pure-JAX f32 reference for correctness checking."""
    x = x_nchw.reshape(x_nchw.shape[0], IN_FEATURES).astype(jnp.float32)
    (w1, b1), (w2, b2), (w3, b3), (w4, b4) = params
    h = jnp.maximum(x @ w1 + b1, 0.0)
    h = jnp.maximum(h @ w2 + b2, 0.0)
    h = jnp.maximum(h @ w3 + b3, 0.0)
    return h @ w4 + b4


if __name__ == "__main__":
    key = jax.random.PRNGKey(0)
    k_params, k_x = jax.random.split(key)

    params = init_params(k_params, latent_size=LATENT_SIZE)
    prepared = prepare_params(params)          # hoisted: pad/cast weights once

    batch = 2
    x = jax.random.normal(k_x, (batch, 1, 28, 28), dtype=jnp.float32)

    out = encoder_forward(x, prepared)
    out = jax.block_until_ready(out)

    ref = _reference_forward(x, params)
    assert out.shape == (batch, LATENT_SIZE), out.shape
    # bf16 MXU inputs + bf16 writeback vs f32 reference -> loosened tolerance.
    assert jnp.allclose(out, ref, atol=6e-2, rtol=6e-2), "mismatch vs reference"

    print("KERNEL_OK")
</pallas_src>

<mosaic_0001>
module attributes {stable_mosaic.version = 11 : i64} {
  func.func @_mlp_kernel(%arg0: i32, %arg1: memref<16x784xf32, #tpu.memory_space<vmem>>, %arg2: memref<784x256xbf16, #tpu.memory_space<vmem>>, %arg3: memref<1x256xf32, #tpu.memory_space<vmem>>, %arg4: memref<256x256xbf16, #tpu.memory_space<vmem>>, %arg5: memref<1x256xf32, #tpu.memory_space<vmem>>, %arg6: memref<256x256xbf16, #tpu.memory_space<vmem>>, %arg7: memref<1x256xf32, #tpu.memory_space<vmem>>, %arg8: memref<256x128xbf16, #tpu.memory_space<vmem>>, %arg9: memref<1x128xf32, #tpu.memory_space<vmem>>, %arg10: memref<16x128xbf16, #tpu.memory_space<vmem>>) attributes {dimension_semantics = [#tpu.dimension_semantics<parallel>], iteration_bounds = array<i64: 1>, scalar_prefetch = 0 : i64, scratch_operands = 0 : i64, tpu.core_type = #tpu.core_type<tc>, window_params = [{transform_indices = @transform_0, window_bounds = array<i64: 16, 784>}, {pipeline_mode = #tpu.pipeline_mode<synchronous>, transform_indices = @transform_1, window_bounds = array<i64: 784, 256>}, {pipeline_mode = #tpu.pipeline_mode<synchronous>, transform_indices = @transform_2, window_bounds = array<i64: 1, 256>}, {pipeline_mode = #tpu.pipeline_mode<synchronous>, transform_indices = @transform_3, window_bounds = array<i64: 256, 256>}, {pipeline_mode = #tpu.pipeline_mode<synchronous>, transform_indices = @transform_4, window_bounds = array<i64: 1, 256>}, {pipeline_mode = #tpu.pipeline_mode<synchronous>, transform_indices = @transform_5, window_bounds = array<i64: 256, 256>}, {pipeline_mode = #tpu.pipeline_mode<synchronous>, transform_indices = @transform_6, window_bounds = array<i64: 1, 256>}, {pipeline_mode = #tpu.pipeline_mode<synchronous>, transform_indices = @transform_7, window_bounds = array<i64: 256, 128>}, {pipeline_mode = #tpu.pipeline_mode<synchronous>, transform_indices = @transform_8, window_bounds = array<i64: 1, 128>}, {transform_indices = @transform_9, window_bounds = array<i64: 16, 128>}]} {
    %c0 = arith.constant 0 : index
    %c0_0 = arith.constant 0 : index
    %0 = vector.load %arg1[%c0, %c0_0] : memref<16x784xf32, #tpu.memory_space<vmem>>, vector<16x784xf32>
    %1 = arith.truncf %0 : vector<16x784xf32> to vector<16x784xbf16>
    %c0_1 = arith.constant 0 : index
    %c0_2 = arith.constant 0 : index
    %2 = vector.load %arg2[%c0_1, %c0_2] : memref<784x256xbf16, #tpu.memory_space<vmem>>, vector<784x256xbf16>
    %cst = arith.constant dense<0.000000e+00> : vector<16x256xf32>
    %3 = tpu.matmul %1, %2, %cst {dimension_numbers = #tpu.dot_dimension_numbers<[1], [0], [0], [1], [0, 0, 1, 1], [], []>} : vector<16x784xbf16>, vector<784x256xbf16>, vector<16x256xf32> -> vector<16x256xf32>
    %c0_3 = arith.constant 0 : index
    %c0_4 = arith.constant 0 : index
    %4 = vector.load %arg3[%c0_3, %c0_4] : memref<1x256xf32, #tpu.memory_space<vmem>>, vector<1x256xf32>
    %5 = vector.broadcast %4 : vector<1x256xf32> to vector<16x256xf32>
    %6 = arith.addf %3, %5 : vector<16x256xf32>
    %cst_5 = arith.constant 0.000000e+00 : f32
    %7 = vector.broadcast %cst_5 : f32 to vector<16x256xf32>
    %8 = arith.maximumf %6, %7 : vector<16x256xf32>
    %9 = arith.truncf %8 : vector<16x256xf32> to vector<16x256xbf16>
    %c0_6 = arith.constant 0 : index
    %c0_7 = arith.constant 0 : index
    %10 = vector.load %arg4[%c0_6, %c0_7] : memref<256x256xbf16, #tpu.memory_space<vmem>>, vector<256x256xbf16>
    %cst_8 = arith.constant dense<0.000000e+00> : vector<16x256xf32>
    %11 = tpu.matmul %9, %10, %cst_8 {dimension_numbers = #tpu.dot_dimension_numbers<[1], [0], [0], [1], [0, 0, 1, 1], [], []>} : vector<16x256xbf16>, vector<256x256xbf16>, vector<16x256xf32> -> vector<16x256xf32>
    %c0_9 = arith.constant 0 : index
    %c0_10 = arith.constant 0 : index
    %12 = vector.load %arg5[%c0_9, %c0_10] : memref<1x256xf32, #tpu.memory_space<vmem>>, vector<1x256xf32>
    %13 = vector.broadcast %12 : vector<1x256xf32> to vector<16x256xf32>
    %14 = arith.addf %11, %13 : vector<16x256xf32>
    %cst_11 = arith.constant 0.000000e+00 : f32
    %15 = vector.broadcast %cst_11 : f32 to vector<16x256xf32>
    %16 = arith.maximumf %14, %15 : vector<16x256xf32>
    %17 = arith.truncf %16 : vector<16x256xf32> to vector<16x256xbf16>
    %c0_12 = arith.constant 0 : index
    %c0_13 = arith.constant 0 : index
    %18 = vector.load %arg6[%c0_12, %c0_13] : memref<256x256xbf16, #tpu.memory_space<vmem>>, vector<256x256xbf16>
    %cst_14 = arith.constant dense<0.000000e+00> : vector<16x256xf32>
    %19 = tpu.matmul %17, %18, %cst_14 {dimension_numbers = #tpu.dot_dimension_numbers<[1], [0], [0], [1], [0, 0, 1, 1], [], []>} : vector<16x256xbf16>, vector<256x256xbf16>, vector<16x256xf32> -> vector<16x256xf32>
    %c0_15 = arith.constant 0 : index
    %c0_16 = arith.constant 0 : index
    %20 = vector.load %arg7[%c0_15, %c0_16] : memref<1x256xf32, #tpu.memory_space<vmem>>, vector<1x256xf32>
    %21 = vector.broadcast %20 : vector<1x256xf32> to vector<16x256xf32>
    %22 = arith.addf %19, %21 : vector<16x256xf32>
    %cst_17 = arith.constant 0.000000e+00 : f32
    %23 = vector.broadcast %cst_17 : f32 to vector<16x256xf32>
    %24 = arith.maximumf %22, %23 : vector<16x256xf32>
    %25 = arith.truncf %24 : vector<16x256xf32> to vector<16x256xbf16>
    %c0_18 = arith.constant 0 : index
    %c0_19 = arith.constant 0 : index
    %26 = vector.load %arg8[%c0_18, %c0_19] : memref<256x128xbf16, #tpu.memory_space<vmem>>, vector<256x128xbf16>
    %cst_20 = arith.constant dense<0.000000e+00> : vector<16x128xf32>
    %27 = tpu.matmul %25, %26, %cst_20 {dimension_numbers = #tpu.dot_dimension_numbers<[1], [0], [0], [1], [0, 0, 1, 1], [], []>} : vector<16x256xbf16>, vector<256x128xbf16>, vector<16x128xf32> -> vector<16x128xf32>
    %c0_21 = arith.constant 0 : index
    %c0_22 = arith.constant 0 : index
    %28 = vector.load %arg9[%c0_21, %c0_22] : memref<1x128xf32, #tpu.memory_space<vmem>>, vector<1x128xf32>
    %29 = vector.broadcast %28 : vector<1x128xf32> to vector<16x128xf32>
    %30 = arith.addf %27, %29 : vector<16x128xf32>
    %31 = arith.truncf %30 : vector<16x128xf32> to vector<16x128xbf16>
    %c0_23 = arith.constant 0 : index
    %c0_24 = arith.constant 0 : index
    %32 = vector.load %arg10[%c0_23, %c0_24] : memref<16x128xbf16, #tpu.memory_space<vmem>>, vector<16x128xbf16>
    tpu.vector_store %arg10[%c0_23, %c0_24], %31 {strides = array<i32>} : memref<16x128xbf16, #tpu.memory_space<vmem>>, vector<16x128xbf16>,
    return
  }
  func.func @transform_0(%arg0: i32) -> (i32, i32) {
    %c0_i32 = arith.constant 0 : i32
    %c0_i32_0 = arith.constant 0 : i32
    return %arg0, %c0_i32 : i32, i32
  }
  func.func @transform_1(%arg0: i32) -> (i32, i32) {
    %c0_i32 = arith.constant 0 : i32
    %c0_i32_0 = arith.constant 0 : i32
    %c0_i32_1 = arith.constant 0 : i32
    return %c0_i32, %c0_i32_0 : i32, i32
  }
  func.func @transform_2(%arg0: i32) -> (i32, i32) {
    %c0_i32 = arith.constant 0 : i32
    %c0_i32_0 = arith.constant 0 : i32
    %c0_i32_1 = arith.constant 0 : i32
    return %c0_i32, %c0_i32_0 : i32, i32
  }
  func.func @transform_3(%arg0: i32) -> (i32, i32) {
    %c0_i32 = arith.constant 0 : i32
    %c0_i32_0 = arith.constant 0 : i32
    %c0_i32_1 = arith.constant 0 : i32
    return %c0_i32, %c0_i32_0 : i32, i32
  }
  func.func @transform_4(%arg0: i32) -> (i32, i32) {
    %c0_i32 = arith.constant 0 : i32
    %c0_i32_0 = arith.constant 0 : i32
    %c0_i32_1 = arith.constant 0 : i32
    return %c0_i32, %c0_i32_0 : i32, i32
  }
  func.func @transform_5(%arg0: i32) -> (i32, i32) {
    %c0_i32 = arith.constant 0 : i32
    %c0_i32_0 = arith.constant 0 : i32
    %c0_i32_1 = arith.constant 0 : i32
    return %c0_i32, %c0_i32_0 : i32, i32
  }
  func.func @transform_6(%arg0: i32) -> (i32, i32) {
    %c0_i32 = arith.constant 0 : i32
    %c0_i32_0 = arith.constant 0 : i32
    %c0_i32_1 = arith.constant 0 : i32
    return %c0_i32, %c0_i32_0 : i32, i32
  }
  func.func @transform_7(%arg0: i32) -> (i32, i32) {
    %c0_i32 = arith.constant 0 : i32
    %c0_i32_0 = arith.constant 0 : i32
    %c0_i32_1 = arith.constant 0 : i32
    return %c0_i32, %c0_i32_0 : i32, i32
  }
  func.func @transform_8(%arg0: i32) -> (i32, i32) {
    %c0_i32 = arith.constant 0 : i32
    %c0_i32_0 = arith.constant 0 : i32
    %c0_i32_1 = arith.constant 0 : i32
    return %c0_i32, %c0_i32_0 : i32, i32
  }
  func.func @transform_9(%arg0: i32) -> (i32, i32) {
    %c0_i32 = arith.constant 0 : i32
    %c0_i32_0 = arith.constant 0 : i32
    return %arg0, %c0_i32 : i32, i32
  }
}

module attributes {stable_mosaic.version = 11 : i64} {
  func.func @_mlp_kernel(%arg0: i32, %arg1: memref<16x784xf32, #tpu.memory_space<vmem>>, %arg2: memref<784x256xbf16, #tpu.memory_space<vmem>>, %arg3: memref<1x256xf32, #tpu.memory_space<vmem>>, %arg4: memref<256x256xbf16, #tpu.memory_space<vmem>>, %arg5: memref<1x256xf32, #tpu.memory_space<vmem>>, %arg6: memref<256x256xbf16, #tpu.memory_space<vmem>>, %arg7: memref<1x256xf32, #tpu.memory_space<vmem>>, %arg8: memref<256x128xbf16, #tpu.memory_space<vmem>>, %arg9: memref<1x128xf32, #tpu.memory_space<vmem>>, %arg10: memref<16x128xbf16, #tpu.memory_space<vmem>>) attributes {dimension_semantics = [#tpu.dimension_semantics<parallel>], iteration_bounds = array<i64: 1>, scalar_prefetch = 0 : i64, scratch_operands = 0 : i64, tpu.core_type = #tpu.core_type<tc>, window_params = [{transform_indices = @transform_0, window_bounds = array<i64: 16, 784>}, {pipeline_mode = #tpu.pipeline_mode<synchronous>, transform_indices = @transform_1, window_bounds = array<i64: 784, 256>}, {pipeline_mode = #tpu.pipeline_mode<synchronous>, transform_indices = @transform_2, window_bounds = array<i64: 1, 256>}, {pipeline_mode = #tpu.pipeline_mode<synchronous>, transform_indices = @transform_3, window_bounds = array<i64: 256, 256>}, {pipeline_mode = #tpu.pipeline_mode<synchronous>, transform_indices = @transform_4, window_bounds = array<i64: 1, 256>}, {pipeline_mode = #tpu.pipeline_mode<synchronous>, transform_indices = @transform_5, window_bounds = array<i64: 256, 256>}, {pipeline_mode = #tpu.pipeline_mode<synchronous>, transform_indices = @transform_6, window_bounds = array<i64: 1, 256>}, {pipeline_mode = #tpu.pipeline_mode<synchronous>, transform_indices = @transform_7, window_bounds = array<i64: 256, 128>}, {pipeline_mode = #tpu.pipeline_mode<synchronous>, transform_indices = @transform_8, window_bounds = array<i64: 1, 128>}, {transform_indices = @transform_9, window_bounds = array<i64: 16, 128>}]} {
    %c0 = arith.constant 0 : index
    %c0_0 = arith.constant 0 : index
    %0 = vector.load %arg1[%c0, %c0_0] : memref<16x784xf32, #tpu.memory_space<vmem>>, vector<16x784xf32>
    %1 = arith.truncf %0 : vector<16x784xf32> to vector<16x784xbf16>
    %c0_1 = arith.constant 0 : index
    %c0_2 = arith.constant 0 : index
    %2 = vector.load %arg2[%c0_1, %c0_2] : memref<784x256xbf16, #tpu.memory_space<vmem>>, vector<784x256xbf16>
    %cst = arith.constant dense<0.000000e+00> : vector<16x256xf32>
    %3 = tpu.matmul %1, %2, %cst {dimension_numbers = #tpu.dot_dimension_numbers<[1], [0], [0], [1], [0, 0, 1, 1], [], []>} : vector<16x784xbf16>, vector<784x256xbf16>, vector<16x256xf32> -> vector<16x256xf32>
    %c0_3 = arith.constant 0 : index
    %c0_4 = arith.constant 0 : index
    %4 = vector.load %arg3[%c0_3, %c0_4] : memref<1x256xf32, #tpu.memory_space<vmem>>, vector<1x256xf32>
    %5 = vector.broadcast %4 : vector<1x256xf32> to vector<16x256xf32>
    %6 = arith.addf %3, %5 : vector<16x256xf32>
    %cst_5 = arith.constant 0.000000e+00 : f32
    %7 = vector.broadcast %cst_5 : f32 to vector<16x256xf32>
    %8 = arith.maximumf %6, %7 : vector<16x256xf32>
    %9 = arith.truncf %8 : vector<16x256xf32> to vector<16x256xbf16>
    %c0_6 = arith.constant 0 : index
    %c0_7 = arith.constant 0 : index
    %10 = vector.load %arg4[%c0_6, %c0_7] : memref<256x256xbf16, #tpu.memory_space<vmem>>, vector<256x256xbf16>
    %cst_8 = arith.constant dense<0.000000e+00> : vector<16x256xf32>
    %11 = tpu.matmul %9, %10, %cst_8 {dimension_numbers = #tpu.dot_dimension_numbers<[1], [0], [0], [1], [0, 0, 1, 1], [], []>} : vector<16x256xbf16>, vector<256x256xbf16>, vector<16x256xf32> -> vector<16x256xf32>
    %c0_9 = arith.constant 0 : index
    %c0_10 = arith.constant 0 : index
    %12 = vector.load %arg5[%c0_9, %c0_10] : memref<1x256xf32, #tpu.memory_space<vmem>>, vector<1x256xf32>
    %13 = vector.broadcast %12 : vector<1x256xf32> to vector<16x256xf32>
    %14 = arith.addf %11, %13 : vector<16x256xf32>
    %cst_11 = arith.constant 0.000000e+00 : f32
    %15 = vector.broadcast %cst_11 : f32 to vector<16x256xf32>
    %16 = arith.maximumf %14, %15 : vector<16x256xf32>
    %17 = arith.truncf %16 : vector<16x256xf32> to vector<16x256xbf16>
    %c0_12 = arith.constant 0 : index
    %c0_13 = arith.constant 0 : index
    %18 = vector.load %arg6[%c0_12, %c0_13] : memref<256x256xbf16, #tpu.memory_space<vmem>>, vector<256x256xbf16>
    %cst_14 = arith.constant dense<0.000000e+00> : vector<16x256xf32>
    %19 = tpu.matmul %17, %18, %cst_14 {dimension_numbers = #tpu.dot_dimension_numbers<[1], [0], [0], [1], [0, 0, 1, 1], [], []>} : vector<16x256xbf16>, vector<256x256xbf16>, vector<16x256xf32> -> vector<16x256xf32>
    %c0_15 = arith.constant 0 : index
    %c0_16 = arith.constant 0 : index
    %20 = vector.load %arg7[%c0_15, %c0_16] : memref<1x256xf32, #tpu.memory_space<vmem>>, vector<1x256xf32>
    %21 = vector.broadcast %20 : vector<1x256xf32> to vector<16x256xf32>
    %22 = arith.addf %19, %21 : vector<16x256xf32>
    %cst_17 = arith.constant 0.000000e+00 : f32
    %23 = vector.broadcast %cst_17 : f32 to vector<16x256xf32>
    %24 = arith.maximumf %22, %23 : vector<16x256xf32>
    %25 = arith.truncf %24 : vector<16x256xf32> to vector<16x256xbf16>
    %c0_18 = arith.constant 0 : index
    %c0_19 = arith.constant 0 : index
    %26 = vector.load %arg8[%c0_18, %c0_19] : memref<256x128xbf16, #tpu.memory_space<vmem>>, vector<256x128xbf16>
    %cst_20 = arith.constant dense<0.000000e+00> : vector<16x128xf32>
    %27 = tpu.matmul %25, %26, %cst_20 {dimension_numbers = #tpu.dot_dimension_numbers<[1], [0], [0], [1], [0, 0, 1, 1], [], []>} : vector<16x256xbf16>, vector<256x128xbf16>, vector<16x128xf32> -> vector<16x128xf32>
    %c0_21 = arith.constant 0 : index
    %c0_22 = arith.constant 0 : index
    %28 = vector.load %arg9[%c0_21, %c0_22] : memref<1x128xf32, #tpu.memory_space<vmem>>, vector<1x128xf32>
    %29 = vector.broadcast %28 : vector<1x128xf32> to vector<16x128xf32>
    %30 = arith.addf %27, %29 : vector<16x128xf32>
    %31 = arith.truncf %30 : vector<16x128xf32> to vector<16x128xbf16>
    %c0_23 = arith.constant 0 : index
    %c0_24 = arith.constant 0 : index
    %32 = vector.load %arg10[%c0_23, %c0_24] : memref<16x128xbf16, #tpu.memory_space<vmem>>, vector<16x128xbf16>
    tpu.vector_store %arg10[%c0_23, %c0_24], %31 {strides = array<i32>} : memref<16x128xbf16, #tpu.memory_space<vmem>>, vector<16x128xbf16>,
    return
  }
  func.func @transform_0(%arg0: i32) -> (i32, i32) {
    %c0_i32 = arith.constant 0 : i32
    %c0_i32_0 = arith.constant 0 : i32
    return %arg0, %c0_i32 : i32, i32
  }
  func.func @transform_1(%arg0: i32) -> (i32, i32) {
    %c0_i32 = arith.constant 0 : i32
    %c0_i32_0 = arith.constant 0 : i32
    %c0_i32_1 = arith.constant 0 : i32
    return %c0_i32, %c0_i32_0 : i32, i32
  }
  func.func @transform_2(%arg0: i32) -> (i32, i32) {
    %c0_i32 = arith.constant 0 : i32
    %c0_i32_0 = arith.constant 0 : i32
    %c0_i32_1 = arith.constant 0 : i32
    return %c0_i32, %c0_i32_0 : i32, i32
  }
  func.func @transform_3(%arg0: i32) -> (i32, i32) {
    %c0_i32 = arith.constant 0 : i32
    %c0_i32_0 = arith.constant 0 : i32
    %c0_i32_1 = arith.constant 0 : i32
    return %c0_i32, %c0_i32_0 : i32, i32
  }
  func.func @transform_4(%arg0: i32) -> (i32, i32) {
    %c0_i32 = arith.constant 0 : i32
    %c0_i32_0 = arith.constant 0 : i32
    %c0_i32_1 = arith.constant 0 : i32
    return %c0_i32, %c0_i32_0 : i32, i32
  }
  func.func @transform_5(%arg0: i32) -> (i32, i32) {
    %c0_i32 = arith.constant 0 : i32
    %c0_i32_0 = arith.constant 0 : i32
    %c0_i32_1 = arith.constant 0 : i32
    return %c0_i32, %c0_i32_0 : i32, i32
  }
  func.func @transform_6(%arg0: i32) -> (i32, i32) {
    %c0_i32 = arith.constant 0 : i32
    %c0_i32_0 = arith.constant 0 : i32
    %c0_i32_1 = arith.constant 0 : i32
    return %c0_i32, %c0_i32_0 : i32, i32
  }
  func.func @transform_7(%arg0: i32) -> (i32, i32) {
    %c0_i32 = arith.constant 0 : i32
    %c0_i32_0 = arith.constant 0 : i32
    %c0_i32_1 = arith.constant 0 : i32
    return %c0_i32, %c0_i32_0 : i32, i32
  }
  func.func @transform_8(%arg0: i32) -> (i32, i32) {
    %c0_i32 = arith.constant 0 : i32
    %c0_i32_0 = arith.constant 0 : i32
    %c0_i32_1 = arith.constant 0 : i32
    return %c0_i32, %c0_i32_0 : i32, i32
  }
  func.func @transform_9(%arg0: i32) -> (i32, i32) {
    %c0_i32 = arith.constant 0 : i32
    %c0_i32_0 = arith.constant 0 : i32
    return %arg0, %c0_i32 : i32, i32
  }
}

</mosaic_0001>

<bundles_post_ra>
// kernel: tpu_custom_call.1
= control target key start
LH: loop header
LB: loop body
LE: loop exit
PB: predicated region body
PF: predicated region fallthrough
CT: control target
= control target key end

     0   :  { %14 = vsyncpa [#allocation3], 0  ;;  %s2884_s0 = inlined_call_operand.hbm [shape: f32[16,784], index: 0, kind: input, shape index: {}]   ;;  %s2885_s1 = inlined_call_operand.hbm [shape: bf16[784,256], index: 1, kind: input, shape index: {}]   ;;  %s2886_s2 = inlined_call_operand.hbm [shape: f32[1,256], index: 2, kind: input, shape index: {}]   ;;  %s2887_s3 = inlined_call_operand.hbm [shape: bf16[256,256], index: 3, kind: input, shape index: {}]   ;;  %s2888_s4 = inlined_call_operand.vmem [shape: f32[1,256], index: 4, kind: input, shape index: {}]   ;;  %s2889_s5 = inlined_call_operand.hbm [shape: bf16[256,256], index: 5, kind: input, shape index: {}]   ;;  %s2890_s6 = inlined_call_operand.vmem [shape: f32[1,256], index: 6, kind: input, shape index: {}]   ;;  %s2891_s7 = inlined_call_operand.hbm [shape: bf16[256,128], index: 7, kind: input, shape index: {}]   ;;  %s2892_s8 = inlined_call_operand.vmem [shape: f32[1,128], index: 8, kind: input, shape index: {}]   ;;  %s2893_s9 = inlined_call_operand.hbm [shape: bf16[16,128], index: 9, kind: output, shape index: {}]  }
   0x1   :  { %15 = vsyncpa [#allocation6], 0 }
   0x2   :  { %16 = vsyncpa [#allocation9], 0 }
   0x3   :  { %17 = vsyncpa [#allocation12], 0  ;;  %s36_s11 = sshll.u32 %s2885_s1, 4  ;;  %s37_s11 = int_to_ptr.hbm [resolvable:$true] %s36_s11 }
   0x4   :  { %18 = vsyncpa [#allocation4], 0  ;;  %s2742_s12 = smov [#allocation5]   ;;  %s60_s16 = sshll.u32 %s2887_s3, 4  ;;  %s61_s16 = int_to_ptr.hbm [resolvable:$true] %s60_s16 }
   0x5   :  { %s38_s13 = sshll.u32 %s2742_s12, 4  ;;  %s2743_s17 = smov 128   ;;  %s39_s13 = int_to_ptr.vmem [resolvable:$true] %s38_s13 }
   0x6   :  { %s2744_s18 = smov 8   ;;  %s2745_s19 = smov [#allocation8]  }
   0x7   :  { %44 = dma.hbm_to_vmem [thread:$0]  %s37_s11, 12544, %s39_s13, [#allocation6], %s2743_s17, %s2743_s17, %s2744_s18  }
   0x8   :  { %s62_s20 = sshll.u32 %s2745_s19, 4  ;;  %s23_s22 = sshll.u32 %s2884_s0, 4  ;;  %s63_s20 = int_to_ptr.vmem [resolvable:$true] %s62_s20  ;;  %s24_s22 = int_to_ptr.hbm [resolvable:$true] %s23_s22 }
   0x9   :  { %68 = dma.hbm_to_vmem [thread:$0]  %s61_s16, 4096, %s63_s20, [#allocation9], %s2743_s17, %s2743_s17, %s2744_s18  }
   0xa   :  { %s2746_s3 = smov [#allocation2]   ;;  %s50_s26 = sshll.u32 %s2886_s2, 4  ;;  %s51_s26 = int_to_ptr.hbm [resolvable:$true] %s50_s26 }
   0xb   :  { %s25_s23 = sshll.u32 %s2746_s3, 4  ;;  %s2747_s27 = smov 896   ;;  %s26_s23 = int_to_ptr.vmem [resolvable:$true] %s25_s23 }
   0xc   :  { %s2748_s28 = smov 56   ;;  %s2749_s29 = smov [#allocation7]  }
   0xd   :  { %31 = dma.hbm_to_vmem [thread:$0]  %s24_s22, 1792, %s26_s23, [#allocation3], %s2747_s27, %s2747_s27, %s2748_s28  }
   0xe   :  { %s52_s30 = sshll.u32 %s2749_s29, 4  ;;  %s75_s11 = sshll.u32 %s2889_s5, 4  ;;  %s53_s30 = int_to_ptr.vmem [resolvable:$true] %s52_s30  ;;  %s76_s11 = int_to_ptr.hbm [resolvable:$true] %s75_s11 }
   0xf   :  { %55 = dma.hbm_to_vmem [thread:$0]  %s51_s26, 32, %s53_s30, [#allocation6]  }
  0x10   :  { %s90_s14 = sshll.u32 %s2891_s7, 4  ;;  %s2750_s15 = smov [#allocation10]   ;;  %s91_s14 = int_to_ptr.hbm [resolvable:$true] %s90_s14 }
  0x11   :  { %s77_s16 = sshll.u32 %s2750_s15, 4  ;;  %s2751_s2 = smov [#allocation11]   ;;  %s78_s16 = int_to_ptr.vmem [resolvable:$true] %s77_s16 }
  0x12   :  { %83 = dma.hbm_to_vmem [thread:$0]  %s76_s11, 4096, %s78_s16, [#allocation9], %s2743_s17, %s2743_s17, %s2744_s18  }
  0x13   :  { %s92_s19 = sshll.u32 %s2751_s2, 4  ;;  %s2752_s20 = smov 64   ;;  %s93_s19 = int_to_ptr.vmem [resolvable:$true] %s92_s19 }
  0x14   :  { %s2753_s5 = smov 4  }
  0x15   :  { %98 = dma.hbm_to_vmem [thread:$0]  %s91_s14, 2048, %s93_s19, [#allocation12], %s2752_s20, %s2752_s20, %s2753_s5  }
  0x16   :  { %2732 = dma.done.wait [#allocation3], 1792  }
  0x17   :  { %2733 = vsyncadd [#allocation3], 4294965504 }
  0x18   :  { %2734 = dma.done.wait [#allocation6], 12576  }
  0x19   :  { %2735 = vsyncadd [#allocation6], 4294954720 }
  0x1a   :  { %2736 = dma.done.wait [#allocation9], 8192  }
  0x1b   :  { %2737 = vsyncadd [#allocation9], 4294959104 }
  0x1c   :  { %2738 = dma.done.wait [#allocation12], 2048  }
  0x1d   :  { %2739 = vsyncadd [#allocation12], 4294965248  ;;  %v1711_v0 = vld [vmem:[#allocation5 + $0x70] sm:$0xf]  ;;  %v2382_v1 = vld [vmem:[#allocation5 + $0x74] sm:$0xf0] }
  0x1e   :  { %v1839_v2 = vld [vmem:[#allocation5 + $0x170] sm:$0xf]  ;;  %v1712_v3 = vor.u32 %v2382_v1, %v1711_v0  ;;  %v2414_v4 = vld [vmem:[#allocation5 + $0x174] sm:$0xf0]  ;;  %v1703_v11 = vld [vmem:[#allocation5 + $0x60] sm:$0xf] }
  0x1f   :  { %v1903_v5 = vld [vmem:[#allocation5 + $0x1f0] sm:$0xf]  ;;  %v2430_v6 = vld [vmem:[#allocation5 + $0x1f4] sm:$0xf0]  ;;  %v1840_v7 = vor.u32 %v2414_v4, %v1839_v2  ;;  %v2380_v13 = vld [vmem:[#allocation5 + $0x64] sm:$0xf0] }
  0x20   :  { %v1904_v8 = vor.u32 %v2430_v6, %v1903_v5  ;;  %v1775_v9 = vld [vmem:[#allocation5 + $0xf0] sm:$0xf]  ;;  %v2398_v10 = vld [vmem:[#allocation5 + $0xf4] sm:$0xf0]  ;;  %745 = vmatpush.bf16.msra.mxu0 %v1712_v3  ;;  %v1831_v14 = vld [vmem:[#allocation5 + $0x160] sm:$0xf]  ;;  %v1704_v16 = vor.u32 %v2380_v13, %v1703_v11 }
  0x21   :  { %v1776_v12 = vor.u32 %v2398_v10, %v1775_v9  ;;  %v2412_v15 = vld [vmem:[#allocation5 + $0x164] sm:$0xf0]  ;;  %773 = vmatpush.bf16.msra.mxu2 %v1840_v7  ;;  %v1895_v18 = vld [vmem:[#allocation5 + $0x1e0] sm:$0xf]  ;;  %v1695_v23 = vld [vmem:[#allocation5 + $0x50] sm:$0xf] }
  0x22   :  { %787 = vmatpush.bf16.msra.mxu3 %v1904_v8  ;;  %v1832_v17 = vor.u32 %v2412_v15, %v1831_v14  ;;  %v2428_v19 = vld [vmem:[#allocation5 + $0x1e4] sm:$0xf0]  ;;  %v1767_v20 = vld [vmem:[#allocation5 + $0xe0] sm:$0xf]  ;;  %v2378_v24 = vld [vmem:[#allocation5 + $0x54] sm:$0xf0] }
  0x23   :  { %759 = vmatpush.bf16.msra.mxu1 %v1776_v12  ;;  %v1896_v21 = vor.u32 %v2428_v19, %v1895_v18  ;;  %v2396_v22 = vld [vmem:[#allocation5 + $0xe4] sm:$0xf0]  ;;  %v1823_v26 = vld [vmem:[#allocation5 + $0x150] sm:$0xf]  ;;  %v2410_v27 = vld [vmem:[#allocation5 + $0x154] sm:$0xf0]  ;;  %v1696_v29 = vor.u32 %v2378_v24, %v1695_v23 }
  0x24   :  { %v1768_v25 = vor.u32 %v2396_v22, %v1767_v20  ;;  %v1887_v28 = vld [vmem:[#allocation5 + $0x1d0] sm:$0xf]  ;;  %746 = vmatpush.bf16.msra.mxu0 %v1704_v16  ;;  %v2426_v30 = vld [vmem:[#allocation5 + $0x1d4] sm:$0xf0]  ;;  %v1824_v33 = vor.u32 %v2410_v27, %v1823_v26  ;;  %v1687_v35 = vld [vmem:[#allocation5 + $0x40] sm:$0xf] }
  0x25   :  { %v1759_v31 = vld [vmem:[#allocation5 + $0xd0] sm:$0xf]  ;;  %v2394_v32 = vld [vmem:[#allocation5 + $0xd4] sm:$0xf0]  ;;  %774 = vmatpush.bf16.msra.mxu2 %v1832_v17  ;;  %v1888_v34 = vor.u32 %v2426_v30, %v1887_v28  ;;  %v2376_v36 = vld [vmem:[#allocation5 + $0x44] sm:$0xf0] }
  0x26   :  { %788 = vmatpush.bf16.msra.mxu3 %v1896_v21  ;;  %v1815_v37 = vld [vmem:[#allocation5 + $0x140] sm:$0xf]  ;;  %v1760_v38 = vor.u32 %v2394_v32, %v1759_v31  ;;  %v2408_v39 = vld [vmem:[#allocation5 + $0x144] sm:$0xf0]  ;;  %v1688_v44 = vor.u32 %v2376_v36, %v1687_v35  ;;  %v1679_v47 = vld [vmem:[#allocation5 + $0x30] sm:$0xf] }
  0x27   :  { %760 = vmatpush.bf16.msra.mxu1 %v1768_v25  ;;  %v1879_v40 = vld [vmem:[#allocation5 + $0x1c0] sm:$0xf]  ;;  %v2424_v41 = vld [vmem:[#allocation5 + $0x1c4] sm:$0xf0]  ;;  %v1816_v45 = vor.u32 %v2408_v39, %v1815_v37  ;;  %v2374_v48 = vld [vmem:[#allocation5 + $0x34] sm:$0xf0] }
  0x28   :  { %v1751_v42 = vld [vmem:[#allocation5 + $0xc0] sm:$0xf]  ;;  %v2392_v43 = vld [vmem:[#allocation5 + $0xc4] sm:$0xf0]  ;;  %747 = vmatpush.bf16.msra.mxu0 %v1696_v29  ;;  %v1880_v46 = vor.u32 %v2424_v41, %v1879_v40  ;;  %v1807_v49 = vld [vmem:[#allocation5 + $0x130] sm:$0xf]  ;;  %v1680_v56 = vor.u32 %v2374_v48, %v1679_v47 }
  0x29   :  { %775 = vmatpush.bf16.msra.mxu2 %v1824_v33  ;;  %v1752_v50 = vor.u32 %v2392_v43, %v1751_v42  ;;  %v2406_v51 = vld [vmem:[#allocation5 + $0x134] sm:$0xf0]  ;;  %v1871_v52 = vld [vmem:[#allocation5 + $0x1b0] sm:$0xf]  ;;  %v1671_v59 = vld [vmem:[#allocation5 + $0x20] sm:$0xf] }
  0x2a   :  { %789 = vmatpush.bf16.msra.mxu3 %v1888_v34  ;;  %v2422_v53 = vld [vmem:[#allocation5 + $0x1b4] sm:$0xf0]  ;;  %v1743_v54 = vld [vmem:[#allocation5 + $0xb0] sm:$0xf]  ;;  %v1808_v57 = vor.u32 %v2406_v51, %v1807_v49  ;;  %v2372_v60 = vld [vmem:[#allocation5 + $0x24] sm:$0xf0] }
  0x2b   :  { %761 = vmatpush.bf16.msra.mxu1 %v1760_v38  ;;  %v2390_v55 = vld [vmem:[#allocation5 + $0xb4] sm:$0xf0]  ;;  %v1872_v58 = vor.u32 %v2422_v53, %v1871_v52  ;;  %v1799_v61 = vld [vmem:[#allocation5 + $0x120] sm:$0xf]  ;;  %v2404_v63 = vld [vmem:[#allocation5 + $0x124] sm:$0xf0]  ;;  %v1672_v4 = vor.u32 %v2372_v60, %v1671_v59 }
  0x2c   :  { %748 = vmatpush.bf16.msra.mxu0 %v1688_v44  ;;  %v1744_v62 = vor.u32 %v2390_v55, %v1743_v54  ;;  %v1863_v0 = vld [vmem:[#allocation5 + $0x1a0] sm:$0xf]  ;;  %v2420_v1 = vld [vmem:[#allocation5 + $0x1a4] sm:$0xf0]  ;;  %v1663_v5 = vld [vmem:[#allocation5 + $0x10] sm:$0xf]  ;;  %v1800_v6 = vor.u32 %v2404_v63, %v1799_v61 }
  0x2d   :  { %776 = vmatpush.bf16.msra.mxu2 %v1816_v45  ;;  %v1735_v2 = vld [vmem:[#allocation5 + $0xa0] sm:$0xf]  ;;  %v2388_v3 = vld [vmem:[#allocation5 + $0xa4] sm:$0xf0]  ;;  %v1864_v7 = vor.u32 %v2420_v1, %v1863_v0  ;;  %v2370_v8 = vld [vmem:[#allocation5 + $0x14] sm:$0xf0] }
  0x2e   :  { %790 = vmatpush.bf16.msra.mxu3 %v1880_v46  ;;  %v1791_v9 = vld [vmem:[#allocation5 + $0x110] sm:$0xf]  ;;  %v2402_v10 = vld [vmem:[#allocation5 + $0x114] sm:$0xf0]  ;;  %v1736_v11 = vor.u32 %v2388_v3, %v1735_v2  ;;  %v1655_v16 = vld [vmem:[#allocation5] sm:$0xf]  ;;  %v1664_v18 = vor.u32 %v2370_v8, %v1663_v5 }
  0x2f   :  { %762 = vmatpush.bf16.msra.mxu1 %v1752_v50  ;;  %v1855_v12 = vld [vmem:[#allocation5 + $0x190] sm:$0xf]  ;;  %v2418_v13 = vld [vmem:[#allocation5 + $0x194] sm:$0xf0]  ;;  %v2368_v17 = vld [vmem:[#allocation5 + $0x4] sm:$0xf0]  ;;  %v1792_v23 = vor.u32 %v2402_v10, %v1791_v9 }
  0x30   :  { %749 = vmatpush.bf16.msra.mxu0 %v1680_v56  ;;  %v1727_v14 = vld [vmem:[#allocation5 + $0x90] sm:$0xf]  ;;  %v2386_v15 = vld [vmem:[#allocation5 + $0x94] sm:$0xf0]  ;;  %v1783_v19 = vld [vmem:[#allocation5 + $0x100] sm:$0xf]  ;;  %v1856_v24 = vor.u32 %v2418_v13, %v1855_v12  ;;  %v1656_v35 = vor.u32 %v2368_v17, %v1655_v16 }
  0x31   :  { %777 = vmatpush.bf16.msra.mxu2 %v1808_v57  ;;  %v2400_v20 = vld [vmem:[#allocation5 + $0x104] sm:$0xf0]  ;;  %v1847_v21 = vld [vmem:[#allocation5 + $0x180] sm:$0xf]  ;;  %v1967_v25 = vld [vmem:[#allocation5 + $0x270] sm:$0xf]  ;;  %v1728_v28 = vor.u32 %v2386_v15, %v1727_v14 }
  0x32   :  { %791 = vmatpush.bf16.msra.mxu3 %v1872_v58  ;;  %v2416_v22 = vld [vmem:[#allocation5 + $0x184] sm:$0xf0]  ;;  %v2446_v26 = vld [vmem:[#allocation5 + $0x274] sm:$0xf0]  ;;  %v2381_v27 = vld [vmem:[#allocation5 + $0x74] sm:$0xf]  ;;  %v1784_v39 = vor.u32 %v2400_v20, %v1783_v19 }
  0x33   :  { %763 = vmatpush.bf16.msra.mxu1 %v1744_v62  ;;  %v1713_v29 = vld [vmem:[#allocation5 + $0x78] sm:$0xf0]  ;;  %v1719_v30 = vld [vmem:[#allocation5 + $0x80] sm:$0xf]  ;;  %v2384_v31 = vld [vmem:[#allocation5 + $0x84] sm:$0xf0]  ;;  %v1848_v40 = vor.u32 %v2416_v22, %v1847_v21  ;;  %v1968_v44 = vor.u32 %v2446_v26, %v1967_v25 }
  0x34   :  { %750 = vmatpush.bf16.msra.mxu0 %v1672_v4  ;;  %v128_v32 = vld [vmem:[#allocation2 + $0x10] sm:$0xff]  ;;  %v135_v33 = vld [vmem:[#allocation2 + $0x48] sm:$0xff]  ;;  %v2031_v34 = vld [vmem:[#allocation5 + $0x2f0] sm:$0xf]  ;;  %v1716_v45 = vor.u32 %v2381_v27, %v1713_v29  ;;  %v1720_v49 = vor.u32 %v2384_v31, %v1719_v30  ;;  %vm741_vm0 = vcmask 130048   ;;  %s2754_s1 = smov [#allocation13]  }
  0x35   :  { %778 = vmatpush.bf16.msra.mxu2 %v1800_v6  ;;  %v2462_v36 = vld [vmem:[#allocation5 + $0x2f4] sm:$0xf0]  ;;  %v2039_v37 = vld [vmem:[#allocation5 + $0x300] sm:$0xf]  ;;  %v2464_v38 = vld [vmem:[#allocation5 + $0x304] sm:$0xf0]  ;;  %v2835_v54 = vpack.c.bf16 %v135_v33, %v128_v32 }
  0x36   :  { %792 = vmatpush.bf16.msra.mxu3 %v1864_v7  ;;  %v2397_v41 = vld [vmem:[#allocation5 + $0xf4] sm:$0xf]  ;;  %v1777_v42 = vld [vmem:[#allocation5 + $0xf8] sm:$0xf0]  ;;  %v133_v46 = vld [vmem:[#allocation2 + $0x38] sm:$0xff]  ;;  %v2040_v50 = vor.u32 %v2464_v38, %v2039_v37  ;;  %v2032_v55 = vor.u32 %v2462_v36, %v2031_v34  ;;  %s1635_s22 = sshll.u32 %s2754_s1, 4  ;;  %s1636_s22 = int_to_ptr.vmem [resolvable:$true] %s1635_s22 }
  0x37   :  { %764 = vmatpush.bf16.msra.mxu1 %v1736_v11  ;;  %v126_v43 = vld [vmem:[#allocation2] sm:$0xff]  ;;  %v129_v47 = vld [vmem:[#allocation2 + $0x18] sm:$0xff]  ;;  %v136_v48 = vld [vmem:[#allocation2 + $0x50] sm:$0xff]  ;;  %v1780_v59 = vor.u32 %v2397_v41, %v1777_v42  ;;  %s1637_s24 = sshll.u32 %s2893_s9, 4  ;;  %s1638_s24 = int_to_ptr.hbm [resolvable:$true] %s1637_s24 }
  0x38   :  { %751 = vmatpush.bf16.msra.mxu0 %v1664_v18  ;;  %v1959_v51 = vld [vmem:[#allocation5 + $0x260] sm:$0xf]  ;;  %v2444_v52 = vld [vmem:[#allocation5 + $0x264] sm:$0xf0]  ;;  %v2379_v53 = vld [vmem:[#allocation5 + $0x64] sm:$0xf]  ;;  %v2837_v60 = vpack.c.bf16 %v133_v46, %v126_v43  ;;  %v2839_v63 = vpack.c.bf16 %v136_v48, %v129_v47 }
  0x39   :  { %779 = vmatpush.bf16.msra.mxu2 %v1792_v23  ;;  %v1705_v56 = vld [vmem:[#allocation5 + $0x68] sm:$0xf0]  ;;  %v127_v57 = vld [vmem:[#allocation2 + $0x8] sm:$0xff]  ;;  %v134_v58 = vld [vmem:[#allocation2 + $0x40] sm:$0xff]  ;;  %v1960_v0 = vor.u32 %v2444_v52, %v1959_v51 }
  0x3a   :  { %793 = vmatpush.bf16.msra.mxu3 %v1856_v24  ;;  %v2023_v61 = vld [vmem:[#allocation5 + $0x2e0] sm:$0xf]  ;;  %v2460_v62 = vld [vmem:[#allocation5 + $0x2e4] sm:$0xf0]  ;;  %v2395_v1 = vld [vmem:[#allocation5 + $0xe4] sm:$0xf]  ;;  %v1708_v3 = vor.u32 %v2379_v53, %v1705_v56  ;;  %v2841_v4 = vpack.c.bf16 %v134_v58, %v127_v57 }
  0x3b   :  { %765 = vmatpush.bf16.msra.mxu1 %v1728_v28  ;;  %v1769_v2 = vld [vmem:[#allocation5 + $0xe8] sm:$0xf0]  ;;  %v1951_v5 = vld [vmem:[#allocation5 + $0x250] sm:$0xf]  ;;  %v2442_v6 = vld [vmem:[#allocation5 + $0x254] sm:$0xf0]  ;;  %v2024_v7 = vor.u32 %v2460_v62, %v2023_v61 }
  0x3c   :  { %752 = vmatpush.bf16.msra.mxu0 %v1656_v35  ;;  %v2377_v8 = vld [vmem:[#allocation5 + $0x54] sm:$0xf]  ;;  %v1697_v9 = vld [vmem:[#allocation5 + $0x58] sm:$0xf0]  ;;  %v1772_v10 = vor.u32 %v2395_v1, %v1769_v2  ;;  %v2015_v11 = vld [vmem:[#allocation5 + $0x2d0] sm:$0xf]  ;;  %v1952_v13 = vor.u32 %v2442_v6, %v1951_v5 }
  0x3d   :  { %780 = vmatpush.bf16.msra.mxu2 %v1784_v39  ;;  %v2458_v12 = vld [vmem:[#allocation5 + $0x2d4] sm:$0xf0]  ;;  %v2393_v14 = vld [vmem:[#allocation5 + $0xd4] sm:$0xf]  ;;  %v1761_v15 = vld [vmem:[#allocation5 + $0xd8] sm:$0xf0]  ;;  %v1700_v16 = vor.u32 %v2377_v8, %v1697_v9 }
  0x3e   :  { %794 = vmatpush.bf16.msra.mxu3 %v1848_v40  ;;  %v1943_v17 = vld [vmem:[#allocation5 + $0x240] sm:$0xf]  ;;  %v2440_v18 = vld [vmem:[#allocation5 + $0x244] sm:$0xf0]  ;;  %v2016_v19 = vor.u32 %v2458_v12, %v2015_v11  ;;  %v2375_v20 = vld [vmem:[#allocation5 + $0x44] sm:$0xf]  ;;  %v1764_v22 = vor.u32 %v2393_v14, %v1761_v15 }
  0x3f   :  { %766 = vmatpush.bf16.msra.mxu1 %v1720_v49  ;;  %753 = vmatmul.bf16.vlgmr.msra.gmra.mxu0 %v2837_v60  ;;  %v1689_v21 = vld [vmem:[#allocation5 + $0x48] sm:$0xf0]  ;;  %v2007_v23 = vld [vmem:[#allocation5 + $0x2c0] sm:$0xf]  ;;  %v2456_v24 = vld [vmem:[#allocation5 + $0x2c4] sm:$0xf0]  ;;  %v1944_v25 = vor.u32 %v2440_v18, %v1943_v17 }
  0x40   :  { %801 = vmatpush.bf16.msrb.mxu0 %v1968_v44  ;;  %781 = vmatmul.bf16.vlgmr.msra.gmra.mxu2 %v2835_v54  ;;  %v2391_v26 = vld [vmem:[#allocation5 + $0xc4] sm:$0xf]  ;;  %v1753_v27 = vld [vmem:[#allocation5 + $0xc8] sm:$0xf0]  ;;  %v1692_v28 = vor.u32 %v2375_v20, %v1689_v21  ;;  %v1935_v29 = vld [vmem:[#allocation5 + $0x230] sm:$0xf]  ;;  %v2008_v31 = vor.u32 %v2456_v24, %v2007_v23 }
  0x41   :  { %836 = vmatpush.bf16.msrb.mxu2 %v2040_v50  ;;  %795 = vmatmul.bf16.vlgmr.msra.gmra.mxu3 %v2839_v63  ;;  %v2438_v30 = vld [vmem:[#allocation5 + $0x234] sm:$0xf0]  ;;  %v2373_v32 = vld [vmem:[#allocation5 + $0x34] sm:$0xf]  ;;  %v1681_v33 = vld [vmem:[#allocation5 + $0x38] sm:$0xf0]  ;;  %v1756_v35 = vor.u32 %v2391_v26, %v1753_v27 }
  0x42   :  { %843 = vmatpush.bf16.msrb.mxu3 %v1716_v45  ;;  %767 = vmatmul.bf16.vlgmr.msra.gmra.mxu1 %v2841_v4  ;;  %v1999_v34 = vld [vmem:[#allocation5 + $0x2b0] sm:$0xf]  ;;  %v2454_v36 = vld [vmem:[#allocation5 + $0x2b4] sm:$0xf0]  ;;  %v132_v37 = vld [vmem:[#allocation2 + $0x30] sm:$0xff]  ;;  %v1936_v39 = vor.u32 %v2438_v30, %v1935_v29  ;;  %v1684_v42 = vor.u32 %v2373_v32, %v1681_v33 }
  0x43   :  { %815 = vmatpush.bf16.msrb.mxu1 %v2032_v55  ;;  %v139_v38 = vld [vmem:[#allocation2 + $0x68] sm:$0xff]  ;;  %v2389_v40 = vld [vmem:[#allocation5 + $0xb4] sm:$0xf]  ;;  %v1927_v43 = vld [vmem:[#allocation5 + $0x220] sm:$0xf]  ;;  %v2000_v45 = vor.u32 %v2454_v36, %v1999_v34 }
  0x44   :  { %802 = vmatpush.bf16.msrb.mxu0 %v1960_v0  ;;  %v1745_v41 = vld [vmem:[#allocation5 + $0xb8] sm:$0xf0]  ;;  %v2436_v44 = vld [vmem:[#allocation5 + $0x224] sm:$0xf0]  ;;  %v2371_v46 = vld [vmem:[#allocation5 + $0x24] sm:$0xf]  ;;  %v2847_v48 = vpack.c.bf16 %v139_v38, %v132_v37 }
  0x45   :  { %857 = vmatpush.bf16.msra.mxu2 %v1780_v59  ;;  %v1673_v47 = vld [vmem:[#allocation5 + $0x28] sm:$0xf0]  ;;  %v1748_v49 = vor.u32 %v2389_v40, %v1745_v41  ;;  %v1991_v50 = vld [vmem:[#allocation5 + $0x2a0] sm:$0xf]  ;;  %v2452_v51 = vld [vmem:[#allocation5 + $0x2a4] sm:$0xf0]  ;;  %v1928_v52 = vor.u32 %v2436_v44, %v1927_v43 }
  0x46   :  { %844 = vmatpush.bf16.msrb.mxu3 %v1708_v3  ;;  %v2387_v53 = vld [vmem:[#allocation5 + $0xa4] sm:$0xf]  ;;  %v1737_v55 = vld [vmem:[#allocation5 + $0xa8] sm:$0xf0]  ;;  %v1676_v56 = vor.u32 %v2371_v46, %v1673_v47  ;;  %v1919_v57 = vld [vmem:[#allocation5 + $0x210] sm:$0xf]  ;;  %v1992_v61 = vor.u32 %v2452_v51, %v1991_v50 }
  0x47   :  { %816 = vmatpush.bf16.msrb.mxu1 %v2024_v7  ;;  %v2434_v58 = vld [vmem:[#allocation5 + $0x214] sm:$0xf0]  ;;  %v2369_v59 = vld [vmem:[#allocation5 + $0x14] sm:$0xf]  ;;  %v1665_v62 = vld [vmem:[#allocation5 + $0x18] sm:$0xf0]  ;;  %v1740_v2 = vor.u32 %v2387_v53, %v1737_v55 }
  0x48   :  { %803 = vmatpush.bf16.msrb.mxu0 %v1952_v13  ;;  %v1983_v0 = vld [vmem:[#allocation5 + $0x290] sm:$0xf]  ;;  %v2450_v1 = vld [vmem:[#allocation5 + $0x294] sm:$0xf0]  ;;  %v2385_v3 = vld [vmem:[#allocation5 + $0x94] sm:$0xf]  ;;  %v1920_v7 = vor.u32 %v2434_v58, %v1919_v57  ;;  %v1668_v11 = vor.u32 %v2369_v59, %v1665_v62 }
  0x49   :  { %858 = vmatpush.bf16.msra.mxu2 %v1772_v10  ;;  %v1729_v5 = vld [vmem:[#allocation5 + $0x98] sm:$0xf0]  ;;  %v1911_v6 = vld [vmem:[#allocation5 + $0x200] sm:$0xf]  ;;  %v2432_v8 = vld [vmem:[#allocation5 + $0x204] sm:$0xf0]  ;;  %v1984_v15 = vor.u32 %v2450_v1, %v1983_v0 }
  0x4a   :  { %845 = vmatpush.bf16.msrb.mxu3 %v1700_v16  ;;  %v2367_v9 = vld [vmem:[#allocation5 + $0x4] sm:$0xf]  ;;  %v1657_v10 = vld [vmem:[#allocation5 + $0x8] sm:$0xf0]  ;;  %v2413_v12 = vld [vmem:[#allocation5 + $0x174] sm:$0xf]  ;;  %v1912_v23 = vor.u32 %v2432_v8, %v1911_v6 }
  0x4b   :  { %817 = vmatpush.bf16.msrb.mxu1 %v2016_v19  ;;  %v1841_v13 = vld [vmem:[#allocation5 + $0x178] sm:$0xf0]  ;;  %v2445_v14 = vld [vmem:[#allocation5 + $0x274] sm:$0xf]  ;;  %v1975_v17 = vld [vmem:[#allocation5 + $0x280] sm:$0xf]  ;;  %v1732_v19 = vor.u32 %v2385_v3, %v1729_v5  ;;  %v1660_v27 = vor.u32 %v2367_v9, %v1657_v10 }
  0x4c   :  { %804 = vmatpush.bf16.msrb.mxu0 %v1944_v25  ;;  %v1969_v16 = vld [vmem:[#allocation5 + $0x278] sm:$0xf0]  ;;  %v2448_v18 = vld [vmem:[#allocation5 + $0x284] sm:$0xf0]  ;;  %v130_v20 = vld [vmem:[#allocation2 + $0x20] sm:$0xff] }
  0x4d   :  { %859 = vmatpush.bf16.msra.mxu2 %v1764_v22  ;;  %v137_v21 = vld [vmem:[#allocation2 + $0x58] sm:$0xff]  ;;  %v2383_v22 = vld [vmem:[#allocation5 + $0x84] sm:$0xf]  ;;  %v2429_v25 = vld [vmem:[#allocation5 + $0x1f4] sm:$0xf]  ;;  %v1972_v32 = vor.u32 %v2445_v14, %v1969_v16  ;;  %v1976_v33 = vor.u32 %v2448_v18, %v1975_v17 }
  0x4e   :  { %846 = vmatpush.bf16.msrb.mxu3 %v1692_v28  ;;  %v1721_v24 = vld [vmem:[#allocation5 + $0x88] sm:$0xf0]  ;;  %v1905_v26 = vld [vmem:[#allocation5 + $0x1f8] sm:$0xf0]  ;;  %v1844_v28 = vor.u32 %v2413_v12, %v1841_v13  ;;  %v2461_v29 = vld [vmem:[#allocation5 + $0x2f4] sm:$0xf]  ;;  %v2851_v37 = vpack.c.bf16 %v137_v21, %v130_v20 }
  0x4f   :  { %818 = vmatpush.bf16.msrb.mxu1 %v2008_v31  ;;  %v2033_v30 = vld [vmem:[#allocation5 + $0x2f8] sm:$0xf0]  ;;  %v138_v34 = vld [vmem:[#allocation2 + $0x60] sm:$0xff]  ;;  %v1833_v36 = vld [vmem:[#allocation5 + $0x168] sm:$0xf0]  ;;  %v1724_v38 = vor.u32 %v2383_v22, %v1721_v24  ;;  %v1908_v41 = vor.u32 %v2429_v25, %v1905_v26 }
  0x50   :  { %805 = vmatpush.bf16.msrb.mxu0 %v1936_v39  ;;  %2045 = vmatmul.msk.bf16.vlgmr.msrb.gmra.mxu2 %vm741_vm0, %v2847_v48  ;;  %v131_v31 = vld [vmem:[#allocation2 + $0x28] sm:$0xff]  ;;  %v2443_v39 = vld [vmem:[#allocation5 + $0x264] sm:$0xf]  ;;  %v1961_v40 = vld [vmem:[#allocation5 + $0x268] sm:$0xf0] }
  0x51   :  { %860 = vmatpush.bf16.msra.mxu2 %v1756_v35  ;;  %v2411_v35 = vld [vmem:[#allocation5 + $0x164] sm:$0xf]  ;;  %v2853_v44 = vpack.c.bf16 %v138_v34, %v131_v31  ;;  %v1897_v46 = vld [vmem:[#allocation5 + $0x1e8] sm:$0xf0]  ;;  %v1964_v50 = vor.u32 %v2443_v39, %v1961_v40  ;;  %v2409_v51 = vld [vmem:[#allocation5 + $0x154] sm:$0xf] }
  0x52   :  { %847 = vmatpush.bf16.msrb.mxu3 %v1684_v42  ;;  %v2036_v42 = vor.u32 %v2461_v29, %v2033_v30  ;;  %v2427_v43 = vld [vmem:[#allocation5 + $0x1e4] sm:$0xf]  ;;  %v2441_v53 = vld [vmem:[#allocation5 + $0x254] sm:$0xf]  ;;  %v1953_v55 = vld [vmem:[#allocation5 + $0x258] sm:$0xf0] }
  0x53   :  { %819 = vmatpush.bf16.msrb.mxu1 %v2000_v45  ;;  %v1836_v45 = vor.u32 %v2411_v35, %v1833_v36  ;;  %v2459_v47 = vld [vmem:[#allocation5 + $0x2e4] sm:$0xf]  ;;  %v2425_v58 = vld [vmem:[#allocation5 + $0x1d4] sm:$0xf]  ;;  %v2017_v0 = vld [vmem:[#allocation5 + $0x2d8] sm:$0xf0]  ;;  %v1956_v1 = vor.u32 %v2441_v53, %v1953_v55 }
  0x54   :  { %806 = vmatpush.bf16.msrb.mxu0 %v1928_v52  ;;  %v1825_v52 = vld [vmem:[#allocation5 + $0x158] sm:$0xf0]  ;;  %v2457_v62 = vld [vmem:[#allocation5 + $0x2d4] sm:$0xf]  ;;  %v1817_v3 = vld [vmem:[#allocation5 + $0x148] sm:$0xf0] }
  0x55   :  { %861 = vmatpush.bf16.msra.mxu2 %v1748_v49  ;;  %v2025_v49 = vld [vmem:[#allocation5 + $0x2e8] sm:$0xf0]  ;;  %v1828_v59 = vor.u32 %v2409_v51, %v1825_v52  ;;  %v2439_v5 = vld [vmem:[#allocation5 + $0x244] sm:$0xf]  ;;  %v2020_v8 = vor.u32 %v2457_v62, %v2017_v0  ;;  %v1809_v16 = vld [vmem:[#allocation5 + $0x138] sm:$0xf0] }
  0x56   :  { %848 = vmatpush.bf16.msrb.mxu3 %v1676_v56  ;;  %v1900_v56 = vor.u32 %v2427_v43, %v1897_v46  ;;  %v2028_v57 = vor.u32 %v2459_v47, %v2025_v49  ;;  %v1945_v6 = vld [vmem:[#allocation5 + $0x248] sm:$0xf0]  ;;  %v2423_v9 = vld [vmem:[#allocation5 + $0x1c4] sm:$0xf]  ;;  %v2437_v17 = vld [vmem:[#allocation5 + $0x234] sm:$0xf] }
  0x57   :  { %820 = vmatpush.bf16.msrb.mxu1 %v1992_v61  ;;  %v1889_v61 = vld [vmem:[#allocation5 + $0x1d8] sm:$0xf0]  ;;  %v1881_v10 = vld [vmem:[#allocation5 + $0x1c8] sm:$0xf0]  ;;  %v2455_v12 = vld [vmem:[#allocation5 + $0x2c4] sm:$0xf]  ;;  %v1948_v14 = vor.u32 %v2439_v5, %v1945_v6 }
  0x58   :  { %807 = vmatpush.bf16.msrb.mxu0 %v1920_v7  ;;  %v1892_v7 = vor.u32 %v2425_v58, %v1889_v61  ;;  %v2009_v13 = vld [vmem:[#allocation5 + $0x2c8] sm:$0xf0]  ;;  %v1884_v18 = vor.u32 %v2423_v9, %v1881_v10  ;;  %v1873_v21 = vld [vmem:[#allocation5 + $0x1b8] sm:$0xf0]  ;;  %v2453_v22 = vld [vmem:[#allocation5 + $0x2b4] sm:$0xf] }
  0x59   :  { %862 = vmatpush.bf16.msra.mxu2 %v1740_v2  ;;  %v2407_v2 = vld [vmem:[#allocation5 + $0x144] sm:$0xf]  ;;  %v1801_v26 = vld [vmem:[#allocation5 + $0x128] sm:$0xf0]  ;;  %v1793_v39 = vld [vmem:[#allocation5 + $0x118] sm:$0xf0] }
  0x5a   :  { %849 = vmatpush.bf16.msrb.mxu3 %v1668_v11  ;;  %v1820_v11 = vor.u32 %v2407_v2, %v1817_v3  ;;  %v2403_v25 = vld [vmem:[#allocation5 + $0x124] sm:$0xf]  ;;  %v1993_v35 = vld [vmem:[#allocation5 + $0x2a8] sm:$0xf0]  ;;  %v2433_v40 = vld [vmem:[#allocation5 + $0x214] sm:$0xf] }
  0x5b   :  { %821 = vmatpush.bf16.msrb.mxu1 %v1984_v15  ;;  %v2405_v15 = vld [vmem:[#allocation5 + $0x134] sm:$0xf]  ;;  %v2419_v31 = vld [vmem:[#allocation5 + $0x1a4] sm:$0xf]  ;;  %v1857_v47 = vld [vmem:[#allocation5 + $0x198] sm:$0xf0] }
  0x5c   :  { %808 = vmatpush.bf16.msrb.mxu0 %v1912_v23  ;;  %v1812_v20 = vor.u32 %v2405_v15, %v1809_v16  ;;  %v2001_v23 = vld [vmem:[#allocation5 + $0x2b8] sm:$0xf0]  ;;  %v2451_v34 = vld [vmem:[#allocation5 + $0x2a4] sm:$0xf]  ;;  %v2449_v49 = vld [vmem:[#allocation5 + $0x294] sm:$0xf] }
  0x5d   :  { %863 = vmatpush.bf16.msra.mxu2 %v1732_v19  ;;  %v2421_v19 = vld [vmem:[#allocation5 + $0x1b4] sm:$0xf]  ;;  %v2004_v30 = vor.u32 %v2453_v22, %v2001_v23  ;;  %v1996_v43 = vor.u32 %v2451_v34, %v1993_v35  ;;  %v2399_v52 = vld [vmem:[#allocation5 + $0x104] sm:$0xf]  ;;  %v1785_v53 = vld [vmem:[#allocation5 + $0x108] sm:$0xf0] }
  0x5e   :  { %850 = vmatpush.bf16.msrb.mxu3 %v1660_v27  ;;  %v2435_v27 = vld [vmem:[#allocation5 + $0x224] sm:$0xf]  ;;  %v1876_v29 = vor.u32 %v2421_v19, %v1873_v21  ;;  %v2041_v58 = vld [vmem:[#allocation5 + $0x308] sm:$0xf0]  ;;  %v1788_v62 = vor.u32 %v2399_v52, %v1785_v53  ;;  %v2097_v15 = vld [vmem:[#allocation8 + $0x60] sm:$0xf] }
  0x5f   :  { %822 = vmatpush.bf16.msrb.mxu1 %v1976_v33  ;;  %809 = vmatmul.bf16.vlgmr.msrb.gmra.mxu0 %v2851_v37  ;;  %v1865_v33 = vld [vmem:[#allocation5 + $0x1a8] sm:$0xf0]  ;;  %v2431_v55 = vld [vmem:[#allocation5 + $0x204] sm:$0xf]  ;;  %v2478_v16 = vld [vmem:[#allocation8 + $0x64] sm:$0xf0] }
  0x60   :  { %871 = vmatpush.bf16.msra.mxu0 %v1844_v28  ;;  %v1929_v28 = vld [vmem:[#allocation5 + $0x228] sm:$0xf0]  ;;  %v2415_v0 = vld [vmem:[#allocation5 + $0x184] sm:$0xf]  ;;  %v2474_v21 = vld [vmem:[#allocation8 + $0x44] sm:$0xf0] }
  0x61   :  { %864 = vmatpush.bf16.msra.mxu2 %v1724_v38  ;;  %851 = vmatmul.bf16.vlgmr.msrb.gmra.mxu3 %v2837_v60  ;;  %v2012_v60 = vor.u32 %v2455_v12, %v2009_v13  ;;  %v1932_v36 = vor.u32 %v2435_v27, %v1929_v28  ;;  %v2401_v38 = vld [vmem:[#allocation5 + $0x114] sm:$0xf]  ;;  %v2447_v3 = vld [vmem:[#allocation5 + $0x284] sm:$0xf]  ;;  %v1977_v5 = vld [vmem:[#allocation5 + $0x288] sm:$0xf0] }
  0x62   :  { %899 = vmatpush.bf16.msra.mxu3 %v1972_v32  ;;  %823 = vmatmul.bf16.vlgmr.msrb.gmra.mxu1 %v2853_v44  ;;  %v1804_v32 = vor.u32 %v2403_v25, %v1801_v26  ;;  %v1796_v46 = vor.u32 %v2401_v38, %v1793_v39  ;;  %v2105_v9 = vld [vmem:[#allocation8 + $0x70] sm:$0xf]  ;;  %v2480_v10 = vld [vmem:[#allocation8 + $0x74] sm:$0xf0]  ;;  %v2107_v13 = vld [vmem:[#allocation8 + $0x78] sm:$0xf0] }
  0x63   :  { %885 = vmatpush.bf16.msra.mxu1 %v1908_v41  ;;  %v1921_v41 = vld [vmem:[#allocation5 + $0x218] sm:$0xf0]  ;;  %v2106_v12 = vor.u32 %v2480_v10, %v2105_v9  ;;  %v2473_v22 = vld [vmem:[#allocation8 + $0x44] sm:$0xf]  ;;  %v2073_v26 = vld [vmem:[#allocation8 + $0x30] sm:$0xf] }
  0x64   :  { %872 = vmatpush.bf16.msra.mxu0 %v1836_v45  ;;  %865 = vmatmul.bf16.vlgmr.msra.gmra.mxu2 %v2841_v4  ;;  %v1937_v4 = vld [vmem:[#allocation5 + $0x238] sm:$0xf0]  ;;  %v2417_v45 = vld [vmem:[#allocation5 + $0x194] sm:$0xf]  ;;  %v1924_v51 = vor.u32 %v2433_v40, %v1921_v41  ;;  %v2472_v27 = vld [vmem:[#allocation8 + $0x34] sm:$0xf0] }
  0x65   :  { %913 = vmatpush.bf16.msrb.mxu2 %v2036_v42  ;;  %v1940_v24 = vor.u32 %v2437_v17, %v1937_v4  ;;  %v1868_v42 = vor.u32 %v2419_v31, %v1865_v33  ;;  %v2477_v17 = vld [vmem:[#allocation8 + $0x64] sm:$0xf]  ;;  %v2471_v28 = vld [vmem:[#allocation8 + $0x34] sm:$0xf]  ;;  %v2470_v33 = vld [vmem:[#allocation8 + $0x24] sm:$0xf0] }
  0x66   :  { %900 = vmatpush.bf16.msra.mxu3 %v1964_v50  ;;  %v1985_v50 = vld [vmem:[#allocation5 + $0x298] sm:$0xf0]  ;;  %v2469_v34 = vld [vmem:[#allocation8 + $0x24] sm:$0xf]  ;;  %v2057_v39 = vld [vmem:[#allocation8 + $0x10] sm:$0xf] }
  0x67   :  { %886 = vmatpush.bf16.msra.mxu1 %v1900_v56  ;;  %v1913_v56 = vld [vmem:[#allocation5 + $0x208] sm:$0xf0]  ;;  %v1988_v61 = vor.u32 %v2449_v49, %v1985_v50  ;;  %v2467_v41 = vld [vmem:[#allocation8 + $0x14] sm:$0xf]  ;;  %v2049_v50 = vld [vmem:[#allocation8] sm:$0xf] }
  0x68   :  { %873 = vmatpush.bf16.msra.mxu0 %v1828_v59  ;;  %v1860_v59 = vor.u32 %v2417_v45, %v1857_v47  ;;  %v1916_v2 = vor.u32 %v2431_v55, %v1913_v56  ;;  %v2468_v40 = vld [vmem:[#allocation8 + $0x14] sm:$0xf0]  ;;  %v2465_v52 = vld [vmem:[#allocation8 + $0x4] sm:$0xf]  ;;  %v2051_v55 = vld [vmem:[#allocation8 + $0x8] sm:$0xf0] }
  0x69   :  { %914 = vmatpush.bf16.msrb.mxu2 %v2028_v57  ;;  %v2463_v57 = vld [vmem:[#allocation5 + $0x304] sm:$0xf]  ;;  %v2171_v9 = vld [vmem:[#allocation8 + $0xf8] sm:$0xf0] }
  0x6a   :  { %901 = vmatpush.bf16.msra.mxu3 %v1956_v1  ;;  %v1849_v1 = vld [vmem:[#allocation5 + $0x188] sm:$0xf0]  ;;  %v2044_v6 = vor.u32 %v2463_v57, %v2041_v58  ;;  %v2054_v57 = vor.u32 %v2465_v52, %v2051_v55  ;;  %v2129_v52 = vld [vmem:[#allocation8 + $0xa0] sm:$0xf] }
  0x6b   :  { %887 = vmatpush.bf16.msra.mxu1 %v1892_v7  ;;  %v1852_v7 = vor.u32 %v2415_v0, %v1849_v1 }
  0x6c   :  { %874 = vmatpush.bf16.msra.mxu0 %v1820_v11  ;;  %v2479_v11 = vld [vmem:[#allocation8 + $0x74] sm:$0xf] }
  0x6d   :  { %915 = vmatpush.bf16.msrb.mxu2 %v2020_v8  ;;  %v1980_v8 = vor.u32 %v2447_v3, %v1977_v5  ;;  %v2169_v5 = vld [vmem:[#allocation8 + $0xf0] sm:$0xf] }
  0x6e   :  { %902 = vmatpush.bf16.msra.mxu3 %v1948_v14  ;;  %v2110_v14 = vor.u32 %v2479_v11, %v2107_v13  ;;  %v2161_v13 = vld [vmem:[#allocation8 + $0xe0] sm:$0xf] }
  0x6f   :  { %888 = vmatpush.bf16.msra.mxu1 %v1884_v18  ;;  %v2476_v18 = vld [vmem:[#allocation8 + $0x54] sm:$0xf0] }
  0x70   :  { %875 = vmatpush.bf16.msra.mxu0 %v1812_v20  ;;  %v2081_v20 = vld [vmem:[#allocation8 + $0x40] sm:$0xf] }
  0x71   :  { %916 = vmatpush.bf16.msrb.mxu2 %v2012_v60  ;;  %v2091_v60 = vld [vmem:[#allocation8 + $0x58] sm:$0xf0]  ;;  %v2082_v23 = vor.u32 %v2474_v21, %v2081_v20  ;;  %v2491_v20 = vld [vmem:[#allocation8 + $0xd4] sm:$0xf] }
  0x72   :  { %903 = vmatpush.bf16.msra.mxu3 %v1940_v24  ;;  %v2083_v24 = vld [vmem:[#allocation8 + $0x48] sm:$0xf0] }
  0x73   :  { %889 = vmatpush.bf16.msra.mxu1 %v1876_v29  ;;  %v2086_v25 = vor.u32 %v2473_v22, %v2083_v24  ;;  %v2074_v29 = vor.u32 %v2472_v27, %v2073_v26  ;;  %v2145_v27 = vld [vmem:[#allocation8 + $0xc0] sm:$0xf] }
  0x74   :  { %876 = vmatpush.bf16.msra.mxu0 %v1804_v32  ;;  %v2065_v32 = vld [vmem:[#allocation8 + $0x20] sm:$0xf] }
  0x75   :  { %917 = vmatpush.bf16.msrb.mxu2 %v2004_v30  ;;  %v2075_v30 = vld [vmem:[#allocation8 + $0x38] sm:$0xf0]  ;;  %v2066_v35 = vor.u32 %v2470_v33, %v2065_v32  ;;  %v2147_v32 = vld [vmem:[#allocation8 + $0xc8] sm:$0xf0] }
  0x76   :  { %904 = vmatpush.bf16.msra.mxu3 %v1932_v36  ;;  %v2078_v31 = vor.u32 %v2471_v28, %v2075_v30  ;;  %v2067_v36 = vld [vmem:[#allocation8 + $0x28] sm:$0xf0]  ;;  %v2490_v28 = vld [vmem:[#allocation8 + $0xc4] sm:$0xf0] }
  0x77   :  { %890 = vmatpush.bf16.msra.mxu1 %v1868_v42  ;;  %v2070_v38 = vor.u32 %v2469_v34, %v2067_v36  ;;  %v2058_v42 = vor.u32 %v2468_v40, %v2057_v39  ;;  %v2146_v30 = vor.u32 %v2490_v28, %v2145_v27  ;;  %v2137_v40 = vld [vmem:[#allocation8 + $0xb0] sm:$0xf] }
  0x78   :  { %877 = vmatpush.bf16.msra.mxu0 %v1796_v46  ;;  %v2865_v46 = vld [vmem:[#allocation7] sm:$0x3] }
  0x79   :  { %918 = vmatpush.bf16.msrb.mxu2 %v1996_v43  ;;  %v2059_v43 = vld [vmem:[#allocation8 + $0x18] sm:$0xf0]  ;;  %v247_v58 = vperm.slane %v2865_v46, 0 }
  0x7a   :  { %905 = vmatpush.bf16.msra.mxu3 %v1924_v51  ;;  %v2062_v45 = vor.u32 %v2467_v41, %v2059_v43  ;;  %v2466_v51 = vld [vmem:[#allocation8 + $0x4] sm:$0xf0]  ;;  %v2488_v41 = vld [vmem:[#allocation8 + $0xb4] sm:$0xf0] }
  0x7b   :  { %891 = vmatpush.bf16.msra.mxu1 %v1860_v59  ;;  %v2050_v53 = vor.u32 %v2466_v51, %v2049_v50  ;;  %v2138_v43 = vor.u32 %v2488_v41, %v2137_v40  ;;  %v2528_v40 = vld [vmem:[#allocation10 + $0xf4] sm:$0xf0]  ;;  %v2511_v41 = vld [vmem:[#allocation10 + $0x74] sm:$0xf] }
  0x7c   :  { %878 = vmatpush.bf16.msra.mxu0 %v1788_v62 }
  0x7d   :  { %919 = vmatpush.bf16.msrb.mxu2 %v1988_v61 }
  0x7e   :  { %906 = vmatpush.bf16.msra.mxu3 %v1916_v2 }
  0x7f   :  { %892 = vmatpush.bf16.msra.mxu1 %v1852_v7  ;;  %879 = vmatmul.bf16.vlgmr.msra.gmra.mxu0 %v2835_v54  ;;  %v2098_v54 = vor.u32 %v2478_v16, %v2097_v15  ;;  %v2495_v7 = vld [vmem:[#allocation8 + $0xf4] sm:$0xf]  ;;  %v2493_v15 = vld [vmem:[#allocation8 + $0xe4] sm:$0xf] }
  0x80   :  { %934 = vmatpush.bf16.msrb.mxu0 %v2044_v6  ;;  %v2496_v6 = vld [vmem:[#allocation8 + $0xf4] sm:$0xf0]  ;;  %v2174_v11 = vor.u32 %v2495_v7, %v2171_v9  ;;  %v2113_v7 = vld [vmem:[#allocation8 + $0x80] sm:$0xf]  ;;  %v2481_v9 = vld [vmem:[#allocation8 + $0x84] sm:$0xf] }
  0x81   :  { %907 = vmatmul.bf16.vlgmr.msra.gmra.mxu3 %v2851_v37  ;;  %920 = vmatpush.bf16.msrb.mxu2 %v1980_v8  ;;  %v2099_v37 = vld [vmem:[#allocation8 + $0x68] sm:$0xf0]  ;;  %v2170_v8 = vor.u32 %v2496_v6, %v2169_v5 }
  0x82   :  { %893 = vmatmul.bf16.vlgmr.msra.gmra.mxu1 %v2839_v63  ;;  %v2102_v4 = vor.u32 %v2477_v17, %v2099_v37  ;;  %v2089_v63 = vld [vmem:[#allocation8 + $0x50] sm:$0xf]  ;;  %v2163_v37 = vld [vmem:[#allocation8 + $0xe8] sm:$0xf0] }
  0x83   :  { %1145 = vmatpush.bf16.msrb.mxu1 %v2106_v12  ;;  %1159 = vmatpush.bf16.msrb.mxu3 %v2170_v8  ;;  %v2482_v8 = vld [vmem:[#allocation8 + $0x84] sm:$0xf0] }
  0x84   :  { %921 = vmatmul.bf16.vlgmr.msrb.gmra.mxu2 %v2853_v44  ;;  %1173 = vmatpush.bf16.msra.mxu0 %v2110_v14  ;;  %v2475_v44 = vld [vmem:[#allocation8 + $0x54] sm:$0xf]  ;;  %v2494_v14 = vld [vmem:[#allocation8 + $0xe4] sm:$0xf0] }
  0x85   :  { %v2094_v19 = vor.u32 %v2475_v44, %v2091_v60  ;;  %1187 = vmatpush.bf16.msra.mxu2 %v2174_v11  ;;  %v2115_v11 = vld [vmem:[#allocation8 + $0x88] sm:$0xf0] }
  0x87   :  { %1146 = vmatpush.bf16.msrb.mxu1 %v2098_v54  ;;  %v2162_v54 = vor.u32 %v2494_v14, %v2161_v13  ;;  %v248_v13 = vperm.slane %v2865_v46, 1 }
  0x88   :  { %1174 = vmatpush.bf16.msra.mxu0 %v2102_v4 }
  0x89   :  { %1160 = vmatpush.bf16.msrb.mxu3 %v2162_v54 }
  0x8c   :  { %1175 = vmatpush.bf16.msra.mxu0 %v2094_v19  ;;  %v2492_v19 = vld [vmem:[#allocation8 + $0xd4] sm:$0xf0] }
  0x8f   :  { %2046 = vmatmul.msk.bf16.vlgmr.msrb.gmra.mxu0 %vm741_vm0, %v2847_v48  ;;  %v2090_v48 = vor.u32 %v2476_v18, %v2089_v63  ;;  %v2166_v63 = vor.u32 %v2493_v15, %v2163_v37 }
  0x90   :  { %1176 = vmatpush.bf16.msra.mxu0 %v2086_v25 }
  0x91   :  { %1147 = vmatpush.bf16.msrb.mxu1 %v2090_v48  ;;  %1188 = vmatpush.bf16.msra.mxu2 %v2166_v63  ;;  %v2153_v48 = vld [vmem:[#allocation8 + $0xd0] sm:$0xf] }
  0x92   :  { %v2154_v22 = vor.u32 %v2492_v19, %v2153_v48 }
  0x94   :  { %1177 = vmatpush.bf16.msra.mxu0 %v2078_v31  ;;  %1161 = vmatpush.bf16.msrb.mxu3 %v2154_v22  ;;  %v2489_v31 = vld [vmem:[#allocation8 + $0xc4] sm:$0xf] }
  0x95   :  { %1148 = vmatpush.bf16.msrb.mxu1 %v2082_v23  ;;  %v2155_v23 = vld [vmem:[#allocation8 + $0xd8] sm:$0xf0]  ;;  %v2150_v34 = vor.u32 %v2489_v31, %v2147_v32 }
  0x96   :  { %v2158_v24 = vor.u32 %v2491_v20, %v2155_v23 }
  0x98   :  { %1178 = vmatpush.bf16.msra.mxu0 %v2070_v38  ;;  %1189 = vmatpush.bf16.msra.mxu2 %v2158_v24 }
  0x99   :  { %1149 = vmatpush.bf16.msrb.mxu1 %v2074_v29  ;;  %1162 = vmatpush.bf16.msrb.mxu3 %v2146_v30 }
  0x9c   :  { %1179 = vmatpush.bf16.msra.mxu0 %v2062_v45  ;;  %1190 = vmatpush.bf16.msra.mxu2 %v2150_v34  ;;  %v2139_v45 = vld [vmem:[#allocation8 + $0xb8] sm:$0xf0] }
  0x9d   :  { %1150 = vmatpush.bf16.msrb.mxu1 %v2066_v35  ;;  %1163 = vmatpush.bf16.msrb.mxu3 %v2138_v43 }
  0xa0   :  { %1180 = vmatpush.bf16.msra.mxu0 %v2054_v57  ;;  %v2131_v57 = vld [vmem:[#allocation8 + $0xa8] sm:$0xf0] }
  0xa1   :  { %1151 = vmatpush.bf16.msrb.mxu1 %v2058_v42  ;;  %v2487_v42 = vld [vmem:[#allocation8 + $0xb4] sm:$0xf] }
  0xa5   :  { %1152 = vmatpush.bf16.msrb.mxu1 %v2050_v53  ;;  %v2486_v53 = vld [vmem:[#allocation8 + $0xa4] sm:$0xf0] }
  0xa6   :  { %v2130_v55 = vor.u32 %v2486_v53, %v2129_v52  ;;  %v2510_v52 = vld [vmem:[#allocation10 + $0x64] sm:$0xf0]  ;;  %v2289_v53 = vld [vmem:[#allocation10 + $0xe0] sm:$0xf] }
  0xa8   :  { %1164 = vmatpush.bf16.msrb.mxu3 %v2130_v55  ;;  %v2526_v55 = vld [vmem:[#allocation10 + $0xe4] sm:$0xf0] }
  0xbc   :  { %v754_v47 = vpop.f32.mrf.mxu0 }
  0xbd   :  { %v755_v59 = vadd.f32 %v754_v47, %v247_v58 }
  0xbf   :  { %v768_v56 = vpop.f32.mrf.mxu1 }
  0xc0   :  { %v769_v0 = vadd.f32 %v768_v56, %v755_v59  ;;  %v2485_v56 = vld [vmem:[#allocation8 + $0xa4] sm:$0xf] }
  0xc1   :  { %v2134_v59 = vor.u32 %v2485_v56, %v2131_v57  ;;  %v2290_v57 = vor.u32 %v2526_v55, %v2289_v53  ;;  %v2187_v53 = vld [vmem:[#allocation10 + $0x18] sm:$0xf0] }
  0xc3   :  { %v782_v49 = vpop.f32.mrf.mxu2 }
  0xc4   :  { %v756_v61 = vpop.f32.mrf.mxu0  ;;  %v796_v1 = vpop.f32.mrf.mxu3  ;;  %v783_v10 = vadd.f32 %v782_v49, %v769_v0  ;;  %v2142_v49 = vor.u32 %v2487_v42, %v2139_v45  ;;  %v2484_v0 = vld [vmem:[#allocation8 + $0x94] sm:$0xf0]  ;;  %v2235_v42 = vld [vmem:[#allocation10 + $0x78] sm:$0xf0] }
  0xc5   :  { %v757_v3 = vadd.f32 %v756_v61, %v247_v58  ;;  %v2238_v45 = vor.u32 %v2511_v41, %v2235_v42  ;;  %v2517_v41 = vld [vmem:[#allocation10 + $0xa4] sm:$0xf]  ;;  %v2259_v42 = vld [vmem:[#allocation10 + $0xa8] sm:$0xf0] }
  0xc6   :  { %v797_v4 = vadd.f32 %v796_v1, %v783_v10  ;;  %1191 = vmatpush.bf16.msra.mxu2 %v2142_v49  ;;  %v2483_v1 = vld [vmem:[#allocation8 + $0x94] sm:$0xf]  ;;  %v2114_v10 = vor.u32 %v2482_v8, %v2113_v7  ;;  %v2299_v49 = vld [vmem:[#allocation10 + $0xf8] sm:$0xf0] }
  0xc7   :  { %v770_v2 = vpop.f32.mrf.mxu1  ;;  %1433 = vmatpush.bf16.msrb.mxu0 %v2238_v45  ;;  %v2507_v7 = vld [vmem:[#allocation10 + $0x54] sm:$0xf]  ;;  %v2185_v45 = vld [vmem:[#allocation10 + $0x10] sm:$0xf] }
  0xc8   :  { %v771_v12 = vadd.f32 %v770_v2, %v757_v3  ;;  %v2123_v3 = vld [vmem:[#allocation8 + $0x98] sm:$0xf0] }
  0xc9   :  { %v2126_v6 = vor.u32 %v2483_v1, %v2123_v3  ;;  %v2217_v1 = vld [vmem:[#allocation10 + $0x50] sm:$0xf] }
  0xca   :  { %1192 = vmatpush.bf16.msra.mxu2 %v2134_v59  ;;  %v2227_v59 = vld [vmem:[#allocation10 + $0x68] sm:$0xf0] }
  0xcb   :  { %v784_v62 = vpop.f32.mrf.mxu2 }
  0xcc   :  { %v785_v44 = vadd.f32 %v784_v62, %v771_v12  ;;  %v798_v21 = vpop.f32.mrf.mxu3  ;;  %v2121_v62 = vld [vmem:[#allocation8 + $0x90] sm:$0xf]  ;;  %v2118_v12 = vor.u32 %v2481_v9, %v2115_v11  ;;  %v2219_v9 = vld [vmem:[#allocation10 + $0x58] sm:$0xf0] }
  0xcd   :  { %v2122_v2 = vor.u32 %v2484_v0, %v2121_v62  ;;  %v2291_v0 = vld [vmem:[#allocation10 + $0xe8] sm:$0xf0]  ;;  %v2283_v11 = vld [vmem:[#allocation10 + $0xd8] sm:$0xf0] }
  0xce   :  { %v799_v25 = vadd.f32 %v798_v21, %v785_v44  ;;  %1193 = vmatpush.bf16.msra.mxu2 %v2126_v6  ;;  %v2524_v6 = vld [vmem:[#allocation10 + $0xd4] sm:$0xf0] }
  0xcf   :  { %1165 = vmatpush.bf16.msrb.mxu3 %v2122_v2  ;;  %v2508_v2 = vld [vmem:[#allocation10 + $0x54] sm:$0xf0] }
  0xd0   :  { %v2218_v8 = vor.u32 %v2508_v2, %v2217_v1  ;;  %v2514_v2 = vld [vmem:[#allocation10 + $0x84] sm:$0xf0] }
  0xd2   :  { %1194 = vmatpush.bf16.msra.mxu2 %v2118_v12 }
  0xd3   :  { %v838_v17 = vpop.f32.mrf.mxu2  ;;  %1166 = vmatpush.bf16.msrb.mxu3 %v2114_v10  ;;  %v2523_v10 = vld [vmem:[#allocation10 + $0xd4] sm:$0xf] }
  0xdb   :  { %v840_v36 = vpop.f32.mrf.mxu2 }
  0xdc   :  { %v810_v16 = vpop.f32.mrf.mxu0 }
  0xdd   :  { %v811_v60 = vadd.f32 %v810_v16, %v797_v4 }
  0xdf   :  { %v824_v18 = vpop.f32.mrf.mxu1 }
  0xe0   :  { %v825_v26 = vadd.f32 %v824_v18, %v811_v60 }
  0xe2   :  { %v839_v38 = vadd.f32 %v838_v17, %v825_v26 }
  0xe4   :  { %v812_v29 = vpop.f32.mrf.mxu0  ;;  %v941_v50 = vmax.f32 %v839_v38, 0.0  ;;  %v852_v61 = vpop.f32.mrf.mxu3  ;;  %v2297_v38 = vld [vmem:[#allocation10 + $0xf0] sm:$0xf] }
  0xe5   :  { %v813_v33 = vadd.f32 %v812_v29, %v799_v25  ;;  %v853_v17 = vadd.f32 %v852_v61, %v248_v13  ;;  %v2298_v43 = vor.u32 %v2528_v40, %v2297_v38  ;;  %v2525_v61 = vld [vmem:[#allocation10 + $0xe4] sm:$0xf]  ;;  %v2195_v38 = vld [vmem:[#allocation10 + $0x28] sm:$0xf0] }
  0xe6   :  { %v2294_v3 = vor.u32 %v2525_v61, %v2291_v0  ;;  %v2177_v61 = vld [vmem:[#allocation10] sm:$0xf] }
  0xe7   :  { %v826_v35 = vpop.f32.mrf.mxu1  ;;  %v866_v5 = vpop.f32.mrf.mxu2  ;;  %1419 = vmatpush.bf16.msra.mxu3 %v2298_v43  ;;  %v2262_v43 = vor.u32 %v2517_v41, %v2259_v42  ;;  %v2241_v0 = vld [vmem:[#allocation10 + $0x80] sm:$0xf]  ;;  %v2530_v41 = vld [vmem:[#allocation11 + $0x8] sm:$0xff] }
  0xe8   :  { %v827_v39 = vadd.f32 %v826_v35, %v813_v33  ;;  %v867_v37 = vadd.f32 %v866_v5, %v853_v17  ;;  %v2233_v35 = vld [vmem:[#allocation10 + $0x70] sm:$0xf]  ;;  %v2286_v17 = vor.u32 %v2523_v10, %v2283_v11  ;;  %v2536_v11 = vld [vmem:[#allocation11 + $0x38] sm:$0xff]  ;;  %v2538_v42 = vld [vmem:[#allocation11 + $0x48] sm:$0xff] }
  0xe9   :  { %v2281_v5 = vld [vmem:[#allocation10 + $0xd0] sm:$0xf] }
  0xea   :  { %v841_v47 = vadd.f32 %v840_v36, %v827_v39  ;;  %v2512_v36 = vld [vmem:[#allocation10 + $0x74] sm:$0xf0]  ;;  %v2282_v12 = vor.u32 %v2524_v6, %v2281_v5  ;;  %v2179_v5 = vld [vmem:[#allocation10 + $0x8] sm:$0xf0]  ;;  %v2242_v6 = vor.u32 %v2514_v2, %v2241_v0 }
  0xeb   :  { %v2234_v39 = vor.u32 %v2512_v36, %v2233_v35  ;;  %1420 = vmatpush.bf16.msra.mxu3 %v2290_v57  ;;  %v2518_v35 = vld [vmem:[#allocation10 + $0xa4] sm:$0xf0]  ;;  %v2501_v36 = vld [vmem:[#allocation10 + $0x24] sm:$0xf]  ;;  %v2515_v57 = vld [vmem:[#allocation10 + $0x94] sm:$0xf] }
  0xec   :  { %v943_v51 = vmax.f32 %v841_v47, 0.0  ;;  %v854_v14 = vpop.f32.mrf.mxu3  ;;  %v2527_v47 = vld [vmem:[#allocation10 + $0xf4] sm:$0xf]  ;;  %v2198_v40 = vor.u32 %v2501_v36, %v2195_v38  ;;  %v2532_v36 = vld [vmem:[#allocation11 + $0x18] sm:$0xff] }
  0xed   :  { %v855_v4 = vadd.f32 %v854_v14, %v248_v13  ;;  %1405 = vmatpush.bf16.msra.mxu1 %v2234_v39  ;;  %v2222_v13 = vor.u32 %v2507_v7, %v2219_v9  ;;  %v2209_v14 = vld [vmem:[#allocation10 + $0x40] sm:$0xf]  ;;  %v2243_v9 = vld [vmem:[#allocation10 + $0x88] sm:$0xf0]  ;;  %v2540_v38 = vld [vmem:[#allocation11 + $0x58] sm:$0xff] }
  0xee   :  { %v945_v58 = vpack.c.bf16 %v943_v51, %v941_v50  ;;  %v2225_v50 = vld [vmem:[#allocation10 + $0x60] sm:$0xf]  ;;  %v2302_v51 = vor.u32 %v2527_v47, %v2299_v49  ;;  %v2500_v47 = vld [vmem:[#allocation10 + $0x14] sm:$0xf0]  ;;  %v2249_v49 = vld [vmem:[#allocation10 + $0x90] sm:$0xf] }
  0xef   :  { %v868_v16 = vpop.f32.mrf.mxu2  ;;  %v2226_v56 = vor.u32 %v2510_v52, %v2225_v50  ;;  %1421 = vmatpush.bf16.msra.mxu3 %v2282_v12  ;;  %v2186_v50 = vor.u32 %v2500_v47, %v2185_v45  ;;  %v2499_v52 = vld [vmem:[#allocation10 + $0x14] sm:$0xf]  ;;  %v2544_v12 = vld [vmem:[#allocation11 + $0x78] sm:$0xff]  ;;  %v2537_v45 = vld [vmem:[#allocation11 + $0x40] sm:$0xff] }
  0xf0   :  { %1153 = vmatmul.bf16.vlgmr.msrb.gmra.mxu1 %v945_v58  ;;  %1181 = vmatmul.bf16.vlgmr.msra.gmra.mxu0 %v945_v58  ;;  %v869_v60 = vadd.f32 %v868_v16, %v855_v4  ;;  %v2509_v58 = vld [vmem:[#allocation10 + $0x64] sm:$0xf]  ;;  %v2273_v16 = vld [vmem:[#allocation10 + $0xc0] sm:$0xf]  ;;  %v2211_v4 = vld [vmem:[#allocation10 + $0x48] sm:$0xf0] }
  0xf1   :  { %1447 = vmatpush.bf16.msrb.mxu2 %v2302_v51  ;;  %v2230_v62 = vor.u32 %v2509_v58, %v2227_v59  ;;  %1406 = vmatpush.bf16.msra.mxu1 %v2226_v56  ;;  %v2516_v51 = vld [vmem:[#allocation10 + $0x94] sm:$0xf0]  ;;  %v2190_v56 = vor.u32 %v2499_v52, %v2187_v53  ;;  %v2251_v58 = vld [vmem:[#allocation10 + $0x98] sm:$0xf0] }
  0xf2   :  { %v2250_v55 = vor.u32 %v2516_v51, %v2249_v49  ;;  %v2254_v59 = vor.u32 %v2515_v57, %v2251_v58 }
  0xf3   :  { %1434 = vmatpush.bf16.msrb.mxu0 %v2230_v62  ;;  %v2498_v62 = vld [vmem:[#allocation10 + $0x4] sm:$0xf0] }
  0xf4   :  { %v2178_v1 = vor.u32 %v2498_v62, %v2177_v61 }
  0xf5   :  { %1448 = vmatpush.bf16.msrb.mxu2 %v2294_v3  ;;  %1407 = vmatpush.bf16.msra.mxu1 %v2218_v8  ;;  %v2497_v3 = vld [vmem:[#allocation10 + $0x4] sm:$0xf] }
  0xf6   :  { %v2182_v7 = vor.u32 %v2497_v3, %v2179_v5  ;;  %v2513_v8 = vld [vmem:[#allocation10 + $0x84] sm:$0xf] }
  0xf7   :  { %1435 = vmatpush.bf16.msrb.mxu0 %v2222_v13  ;;  %v2246_v10 = vor.u32 %v2513_v8, %v2243_v9  ;;  %v2535_v13 = vld [vmem:[#allocation11 + $0x30] sm:$0xff] }
  0xf9   :  { %1449 = vmatpush.bf16.msrb.mxu2 %v2286_v17 }
  0xfc   :  { %v880_v15 = vpop.f32.mrf.mxu0 }
  0xfd   :  { %v881_v48 = vadd.f32 %v880_v15, %v867_v37  ;;  %v2506_v15 = vld [vmem:[#allocation10 + $0x44] sm:$0xf0]  ;;  %v2505_v37 = vld [vmem:[#allocation10 + $0x44] sm:$0xf] }
  0xff   :  { %v894_v54 = vpop.f32.mrf.mxu1 }
 0x100   :  { %v895_v21 = vadd.f32 %v894_v54, %v881_v48  ;;  %v2522_v54 = vld [vmem:[#allocation10 + $0xc4] sm:$0xf0]  ;;  %v2214_v48 = vor.u32 %v2505_v37, %v2211_v4  ;;  %v979_v37 = vld [vmem:[%s2888_s4] sm:$0x3] }
 0x102   :  { %1436 = vmatpush.bf16.msrb.mxu0 %v2214_v48 }
 0x104   :  { %v908_v63 = vpop.f32.mrf.mxu3  ;;  %v882_v18 = vpop.f32.mrf.mxu0 }
 0x105   :  { %v883_v19 = vadd.f32 %v882_v18, %v869_v60  ;;  %v909_v24 = vadd.f32 %v908_v63, %v895_v21  ;;  %v2521_v63 = vld [vmem:[#allocation10 + $0xc4] sm:$0xf]  ;;  %v2275_v18 = vld [vmem:[#allocation10 + $0xc8] sm:$0xf0]  ;;  %v2274_v60 = vor.u32 %v2522_v54, %v2273_v16  ;;  %v2504_v21 = vld [vmem:[#allocation10 + $0x34] sm:$0xf0] }
 0x106   :  { %v2542_v16 = vld [vmem:[#allocation11 + $0x68] sm:$0xff] }
 0x107   :  { %v922_v44 = vpop.f32.mrf.mxu2  ;;  %v896_v20 = vpop.f32.mrf.mxu1  ;;  %1422 = vmatpush.bf16.msra.mxu3 %v2274_v60 }
 0x108   :  { %v897_v46 = vadd.f32 %v896_v20, %v883_v19  ;;  %v923_v27 = vadd.f32 %v922_v44, %v909_v24  ;;  %v2210_v44 = vor.u32 %v2506_v15, %v2209_v14  ;;  %v2278_v19 = vor.u32 %v2521_v63, %v2275_v18  ;;  %v2201_v20 = vld [vmem:[#allocation10 + $0x30] sm:$0xf]  ;;  %v2520_v24 = vld [vmem:[#allocation10 + $0xb4] sm:$0xf0]  ;;  %v2534_v15 = vld [vmem:[#allocation11 + $0x28] sm:$0xff] }
 0x109   :  { %v2543_v14 = vld [vmem:[#allocation11 + $0x70] sm:$0xff]  ;;  %v981_v18 = vperm.slane %v979_v37, 0 }
 0x10a   :  { %1408 = vmatpush.bf16.msra.mxu1 %v2210_v44  ;;  %1450 = vmatpush.bf16.msrb.mxu2 %v2278_v19  ;;  %v982_v44 = vperm.slane %v979_v37, 1 }
 0x10c   :  { %v910_v22 = vpop.f32.mrf.mxu3  ;;  %v936_v23 = vpop.f32.mrf.mxu0 }
 0x10d   :  { %v911_v25 = vadd.f32 %v910_v22, %v897_v46  ;;  %v937_v28 = vadd.f32 %v936_v23, %v923_v27  ;;  %v2265_v22 = vld [vmem:[#allocation10 + $0xb0] sm:$0xf]  ;;  %v2202_v23 = vor.u32 %v2504_v21, %v2201_v20  ;;  %v2503_v46 = vld [vmem:[#allocation10 + $0x34] sm:$0xf] }
 0x10f   :  { %v924_v26 = vpop.f32.mrf.mxu2  ;;  %v942_v32 = vmax.f32 %v937_v28, 0.0  ;;  %v2519_v28 = vld [vmem:[#allocation10 + $0xb4] sm:$0xf]  ;;  %1409 = vmatpush.bf16.msra.mxu1 %v2202_v23 }
 0x110   :  { %v925_v29 = vadd.f32 %v924_v26, %v911_v25  ;;  %v2203_v25 = vld [vmem:[#allocation10 + $0x38] sm:$0xf0]  ;;  %v2266_v26 = vor.u32 %v2520_v24, %v2265_v22 }
 0x111   :  { %v2206_v27 = vor.u32 %v2503_v46, %v2203_v25 }
 0x112   :  { %1423 = vmatpush.bf16.msra.mxu3 %v2266_v26 }
 0x113   :  { %1437 = vmatpush.bf16.msrb.mxu0 %v2206_v27 }
 0x114   :  { %v938_v30 = vpop.f32.mrf.mxu0 }
 0x115   :  { %v939_v31 = vadd.f32 %v938_v30, %v925_v29  ;;  %v2267_v29 = vld [vmem:[#allocation10 + $0xb8] sm:$0xf0] }
 0x116   :  { %v2270_v30 = vor.u32 %v2519_v28, %v2267_v29 }
 0x117   :  { %v944_v33 = vmax.f32 %v939_v31, 0.0  ;;  %v2193_v31 = vld [vmem:[#allocation10 + $0x20] sm:$0xf]  ;;  %1438 = vmatpush.bf16.msrb.mxu0 %v2198_v40  ;;  %v2539_v40 = vld [vmem:[#allocation11 + $0x50] sm:$0xff] }
 0x118   :  { %1451 = vmatpush.bf16.msrb.mxu2 %v2270_v30 }
 0x119   :  { %v946_v34 = vpack.c.bf16 %v944_v33, %v942_v32  ;;  %v2502_v32 = vld [vmem:[#allocation10 + $0x24] sm:$0xf0]  ;;  %v2257_v33 = vld [vmem:[#allocation10 + $0xa0] sm:$0xf] }
 0x11a   :  { %v2258_v39 = vor.u32 %v2518_v35, %v2257_v33  ;;  %v2541_v35 = vld [vmem:[#allocation11 + $0x60] sm:$0xff] }
 0x11b   :  { %1167 = vmatmul.bf16.vlgmr.msrb.gmra.mxu3 %v946_v34  ;;  %1195 = vmatmul.bf16.vlgmr.msra.gmra.mxu2 %v946_v34  ;;  %v2194_v34 = vor.u32 %v2502_v32, %v2193_v31 }
 0x11c   :  { %1424 = vmatpush.bf16.msra.mxu3 %v2258_v39  ;;  %1452 = vmatpush.bf16.msrb.mxu2 %v2262_v43  ;;  %v2531_v39 = vld [vmem:[#allocation11 + $0x10] sm:$0xff]  ;;  %v2529_v43 = vld [vmem:[#allocation11] sm:$0xff] }
 0x11d   :  { %1410 = vmatpush.bf16.msra.mxu1 %v2194_v34  ;;  %1439 = vmatpush.bf16.msrb.mxu0 %v2190_v56  ;;  %v2533_v34 = vld [vmem:[#allocation11 + $0x20] sm:$0xff] }
 0x120   :  { %1425 = vmatpush.bf16.msra.mxu3 %v2250_v55  ;;  %1453 = vmatpush.bf16.msrb.mxu2 %v2254_v59 }
 0x121   :  { %1411 = vmatpush.bf16.msra.mxu1 %v2186_v50  ;;  %1440 = vmatpush.bf16.msrb.mxu0 %v2182_v7  ;;  %v1239_v50 = vld [vmem:[%s2890_s6] sm:$0x3] }
 0x122   :  { %v1241_v52 = vperm.slane %v1239_v50, 0  ;;  %v1242_v55 = vperm.slane %v1239_v50, 1 }
 0x124   :  { %1426 = vmatpush.bf16.msra.mxu3 %v2242_v6  ;;  %1454 = vmatpush.bf16.msrb.mxu2 %v2246_v10 }
 0x125   :  { %1412 = vmatpush.bf16.msra.mxu1 %v2178_v1 }
 0x128   :  { %1613 = vmatpush.bf16.msrb.mxu3 %v2544_v12 }
 0x129   :  { %1599 = vmatpush.bf16.msrb.mxu1 %v2536_v11 }
 0x12c   :  { %1614 = vmatpush.bf16.msrb.mxu3 %v2543_v14 }
 0x12d   :  { %1600 = vmatpush.bf16.msrb.mxu1 %v2535_v13 }
 0x130   :  { %1615 = vmatpush.bf16.msrb.mxu3 %v2542_v16 }
 0x131   :  { %1601 = vmatpush.bf16.msrb.mxu1 %v2534_v15  ;;  %v2563_v15 = vld [vmem:[%s2892_s8] ss:$0 sm:$0xff] }
 0x134   :  { %1616 = vmatpush.bf16.msrb.mxu3 %v2541_v35 }
 0x135   :  { %1602 = vmatpush.bf16.msrb.mxu1 %v2533_v34 }
 0x138   :  { %1617 = vmatpush.bf16.msrb.mxu3 %v2540_v38 }
 0x139   :  { %1603 = vmatpush.bf16.msrb.mxu1 %v2532_v36 }
 0x13c   :  { %1618 = vmatpush.bf16.msrb.mxu3 %v2539_v40 }
 0x13d   :  { %1604 = vmatpush.bf16.msrb.mxu1 %v2531_v39 }
 0x140   :  { %1619 = vmatpush.bf16.msrb.mxu3 %v2538_v42 }
 0x141   :  { %1605 = vmatpush.bf16.msrb.mxu1 %v2530_v41 }
 0x144   :  { %1620 = vmatpush.bf16.msrb.mxu3 %v2537_v45 }
 0x145   :  { %1606 = vmatpush.bf16.msrb.mxu1 %v2529_v43 }
 0x16d   :  { %v1154_v17 = vpop.f32.mrf.mxu1  ;;  %v1182_v54 = vpop.f32.mrf.mxu0 }
 0x16e   :  { %v1155_v19 = vadd.f32 %v1154_v17, %v981_v18  ;;  %v1183_v20 = vadd.f32 %v1182_v54, %v982_v44 }
 0x175   :  { %v1156_v60 = vpop.f32.mrf.mxu1  ;;  %v1184_v48 = vpop.f32.mrf.mxu0 }
 0x176   :  { %v1157_v21 = vadd.f32 %v1156_v60, %v981_v18  ;;  %v1185_v22 = vadd.f32 %v1184_v48, %v982_v44 }
 0x19e   :  { %v1168_v4 = vpop.f32.mrf.mxu3  ;;  %v1196_v63 = vpop.f32.mrf.mxu2 }
 0x19f   :  { %v1169_v23 = vadd.f32 %v1168_v4, %v1155_v19  ;;  %v1197_v24 = vadd.f32 %v1196_v63, %v1183_v20 }
 0x1a1   :  { %v1201_v28 = vmax.f32 %v1169_v23, 0.0  ;;  %v1202_v29 = vmax.f32 %v1197_v24, 0.0 }
 0x1a6   :  { %v1170_v46 = vpop.f32.mrf.mxu3  ;;  %v1198_v25 = vpop.f32.mrf.mxu2 }
 0x1a7   :  { %v1171_v26 = vadd.f32 %v1170_v46, %v1157_v21  ;;  %v1199_v27 = vadd.f32 %v1198_v25, %v1185_v22 }
 0x1a9   :  { %v1203_v30 = vmax.f32 %v1171_v26, 0.0  ;;  %v1204_v31 = vmax.f32 %v1199_v27, 0.0 }
 0x1ab   :  { %v1205_v32 = vpack.c.bf16 %v1203_v30, %v1201_v28  ;;  %v1206_v33 = vpack.c.bf16 %v1204_v31, %v1202_v29 }
 0x1ad   :  { %1413 = vmatmul.bf16.vlgmr.msra.gmra.mxu1 %v1205_v32  ;;  %1427 = vmatmul.bf16.vlgmr.msra.gmra.mxu3 %v1206_v33 }
 0x1ae   :  { %1441 = vmatmul.bf16.vlgmr.msrb.gmra.mxu0 %v1205_v32  ;;  %1455 = vmatmul.bf16.vlgmr.msrb.gmra.mxu2 %v1206_v33 }
 0x22a   :  { %v1414_v47 = vpop.f32.mrf.mxu1 }
 0x22b   :  { %v1442_v49 = vpop.f32.mrf.mxu0  ;;  %v1415_v57 = vadd.f32 %v1414_v47, %v1241_v52 }
 0x22c   :  { %v1443_v59 = vadd.f32 %v1442_v49, %v1242_v55 }
 0x230   :  { %v1428_v51 = vpop.f32.mrf.mxu3 }
 0x231   :  { %v1456_v53 = vpop.f32.mrf.mxu2  ;;  %v1429_v61 = vadd.f32 %v1428_v51, %v1415_v57 }
 0x232   :  { %v1416_v56 = vpop.f32.mrf.mxu1  ;;  %v1457_v0 = vadd.f32 %v1456_v53, %v1443_v59 }
 0x233   :  { %v1444_v58 = vpop.f32.mrf.mxu0  ;;  %v1417_v62 = vadd.f32 %v1416_v56, %v1241_v52  ;;  %v1461_v7 = vmax.f32 %v1429_v61, 0.0 }
 0x234   :  { %v1445_v1 = vadd.f32 %v1444_v58, %v1242_v55  ;;  %v1462_v9 = vmax.f32 %v1457_v0, 0.0 }
 0x238   :  { %v1430_v2 = vpop.f32.mrf.mxu3 }
 0x239   :  { %v1431_v3 = vadd.f32 %v1430_v2, %v1417_v62  ;;  %v1458_v5 = vpop.f32.mrf.mxu2 }
 0x23a   :  { %v1459_v6 = vadd.f32 %v1458_v5, %v1445_v1 }
 0x23b   :  { %v1463_v8 = vmax.f32 %v1431_v3, 0.0 }
 0x23c   :  { %v1464_v10 = vmax.f32 %v1459_v6, 0.0 }
 0x23d   :  { %v1465_v11 = vpack.c.bf16 %v1463_v8, %v1461_v7 }
 0x23e   :  { %v1466_v12 = vpack.c.bf16 %v1464_v10, %v1462_v9 }
 0x23f   :  { %1607 = vmatmul.bf16.vlgmr.msrb.gmra.mxu1 %v1465_v11 }
 0x240   :  { %1621 = vmatmul.bf16.vlgmr.msrb.gmra.mxu3 %v1466_v12 }
 0x2bc   :  { %v1608_v13 = vpop.f32.mrf.mxu1 }
 0x2bd   :  { %v1609_v17 = vadd.f32 %v2563_v15, %v1608_v13 }
 0x2c3   :  { %v1622_v14 = vpop.f32.mrf.mxu3 }
 0x2c4   :  { %v1610_v16 = vpop.f32.mrf.mxu1  ;;  %v1623_v4 = vadd.f32 %v1622_v14, %v1609_v17 }
 0x2c5   :  { %v1611_v54 = vadd.f32 %v2563_v15, %v1610_v16 }
 0x2cb   :  { %v1624_v37 = vpop.f32.mrf.mxu3 }
 0x2cc   :  { %v1625_v63 = vadd.f32 %v1624_v37, %v1611_v54 }
 0x2ce   :  { %v2548_v18 = vpack.c.bf16 %v1625_v63, %v1623_v4 }
 0x2d0   :  { %2549 = vst [vmem:[#allocation13] sm:$0xff] %v2548_v18  }
 0x2d1   :  { %1643 = dma.vmem_to_hbm [thread:$0]  %s1636_s22, 128, %s1638_s24, [#allocation4], %s2752_s20, %s2752_s20, %s2753_s5  }
 0x2d2   :  { %2740 = dma.done.wait [#allocation4], 128  }
 0x2d3   :  { %2741 = vsyncadd [#allocation4], 4294967168 }
 0x2d4   :  { %1648 = vsyncpa [#allocation3], 1 }
 0x2d5   :  { %1649 = vsyncpa [#allocation6], 1 }
 0x2d6   :  { %1650 = vsyncpa [#allocation9], 1 }
 0x2d7   :  { %1651 = vsyncpa [#allocation12], 1 }
 0x2d8   :  { %1652 = vsyncpa [#allocation4], 1 }

// kernel: tpu_custom_call.1
= control target key start
LH: loop header
LB: loop body
LE: loop exit
PB: predicated region body
PF: predicated region fallthrough
CT: control target
= control target key end

     0   :  { %14 = vsyncpa [#allocation3], 0  ;;  %s2884_s0 = inlined_call_operand.hbm [shape: f32[16,784], index: 0, kind: input, shape index: {}]   ;;  %s2885_s1 = inlined_call_operand.hbm [shape: bf16[784,256], index: 1, kind: input, shape index: {}]   ;;  %s2886_s2 = inlined_call_operand.hbm [shape: f32[1,256], index: 2, kind: input, shape index: {}]   ;;  %s2887_s3 = inlined_call_operand.hbm [shape: bf16[256,256], index: 3, kind: input, shape index: {}]   ;;  %s2888_s4 = inlined_call_operand.vmem [shape: f32[1,256], index: 4, kind: input, shape index: {}]   ;;  %s2889_s5 = inlined_call_operand.hbm [shape: bf16[256,256], index: 5, kind: input, shape index: {}]   ;;  %s2890_s6 = inlined_call_operand.vmem [shape: f32[1,256], index: 6, kind: input, shape index: {}]   ;;  %s2891_s7 = inlined_call_operand.hbm [shape: bf16[256,128], index: 7, kind: input, shape index: {}]   ;;  %s2892_s8 = inlined_call_operand.vmem [shape: f32[1,128], index: 8, kind: input, shape index: {}]   ;;  %s2893_s9 = inlined_call_operand.hbm [shape: bf16[16,128], index: 9, kind: output, shape index: {}]  }
   0x1   :  { %15 = vsyncpa [#allocation6], 0 }
   0x2   :  { %16 = vsyncpa [#allocation9], 0 }
   0x3   :  { %17 = vsyncpa [#allocation12], 0  ;;  %s36_s11 = sshll.u32 %s2885_s1, 4  ;;  %s37_s11 = int_to_ptr.hbm [resolvable:$true] %s36_s11 }
   0x4   :  { %18 = vsyncpa [#allocation4], 0  ;;  %s2742_s12 = smov [#allocation5]   ;;  %s60_s16 = sshll.u32 %s2887_s3, 4  ;;  %s61_s16 = int_to_ptr.hbm [resolvable:$true] %s60_s16 }
   0x5   :  { %s38_s13 = sshll.u32 %s2742_s12, 4  ;;  %s2743_s17 = smov 128   ;;  %s39_s13 = int_to_ptr.vmem [resolvable:$true] %s38_s13 }
   0x6   :  { %s2744_s18 = smov 8   ;;  %s2745_s19 = smov [#allocation8]  }
   0x7   :  { %44 = dma.hbm_to_vmem [thread:$0]  %s37_s11, 12544, %s39_s13, [#allocation6], %s2743_s17, %s2743_s17, %s2744_s18  }
   0x8   :  { %s62_s20 = sshll.u32 %s2745_s19, 4  ;;  %s23_s22 = sshll.u32 %s2884_s0, 4  ;;  %s63_s20 = int_to_ptr.vmem [resolvable:$true] %s62_s20  ;;  %s24_s22 = int_to_ptr.hbm [resolvable:$true] %s23_s22 }
   0x9   :  { %68 = dma.hbm_to_vmem [thread:$0]  %s61_s16, 4096, %s63_s20, [#allocation9], %s2743_s17, %s2743_s17, %s2744_s18  }
   0xa   :  { %s2746_s3 = smov [#allocation2]   ;;  %s50_s26 = sshll.u32 %s2886_s2, 4  ;;  %s51_s26 = int_to_ptr.hbm [resolvable:$true] %s50_s26 }
   0xb   :  { %s25_s23 = sshll.u32 %s2746_s3, 4  ;;  %s2747_s27 = smov 896   ;;  %s26_s23 = int_to_ptr.vmem [resolvable:$true] %s25_s23 }
   0xc   :  { %s2748_s28 = smov 56   ;;  %s2749_s29 = smov [#allocation7]  }
   0xd   :  { %31 = dma.hbm_to_vmem [thread:$0]  %s24_s22, 1792, %s26_s23, [#allocation3], %s2747_s27, %s2747_s27, %s2748_s28  }
   0xe   :  { %s52_s30 = sshll.u32 %s2749_s29, 4  ;;  %s75_s11 = sshll.u32 %s2889_s5, 4  ;;  %s53_s30 = int_to_ptr.vmem [resolvable:$true] %s52_s30  ;;  %s76_s11 = int_to_ptr.hbm [resolvable:$true] %s75_s11 }
   0xf   :  { %55 = dma.hbm_to_vmem [thread:$0]  %s51_s26, 32, %s53_s30, [#allocation6]  }
  0x10   :  { %s90_s14 = sshll.u32 %s2891_s7, 4  ;;  %s2750_s15 = smov [#allocation10]   ;;  %s91_s14 = int_to_ptr.hbm [resolvable:$true] %s90_s14 }
  0x11   :  { %s77_s16 = sshll.u32 %s2750_s15, 4  ;;  %s2751_s2 = smov [#allocation11]   ;;  %s78_s16 = int_to_ptr.vmem [resolvable:$true] %s77_s16 }
  0x12   :  { %83 = dma.hbm_to_vmem [thread:$0]  %s76_s11, 4096, %s78_s16, [#allocation9], %s2743_s17, %s2743_s17, %s2744_s18  }
  0x13   :  { %s92_s19 = sshll.u32 %s2751_s2, 4  ;;  %s2752_s20 = smov 64   ;;  %s93_s19 = int_to_ptr.vmem [resolvable:$true] %s92_s19 }
  0x14   :  { %s2753_s5 = smov 4  }
  0x15   :  { %98 = dma.hbm_to_vmem [thread:$0]  %s91_s14, 2048, %s93_s19, [#allocation12], %s2752_s20, %s2752_s20, %s2753_s5  }
  0x16   :  { %2732 = dma.done.wait [#allocation3], 1792  }
  0x17   :  { %2733 = vsyncadd [#allocation3], 4294965504 }
  0x18   :  { %2734 = dma.done.wait [#allocation6], 12576  }
  0x19   :  { %2735 = vsyncadd [#allocation6], 4294954720 }
  0x1a   :  { %2736 = dma.done.wait [#allocation9], 8192  }
  0x1b   :  { %2737 = vsyncadd [#allocation9], 4294959104 }
  0x1c   :  { %2738 = dma.done.wait [#allocation12], 2048  }
  0x1d   :  { %2739 = vsyncadd [#allocation12], 4294965248  ;;  %v1711_v0 = vld [vmem:[#allocation5 + $0x70] sm:$0xf]  ;;  %v2382_v1 = vld [vmem:[#allocation5 + $0x74] sm:$0xf0] }
  0x1e   :  { %v1839_v2 = vld [vmem:[#allocation5 + $0x170] sm:$0xf]  ;;  %v1712_v3 = vor.u32 %v2382_v1, %v1711_v0  ;;  %v2414_v4 = vld [vmem:[#allocation5 + $0x174] sm:$0xf0]  ;;  %v1703_v11 = vld [vmem:[#allocation5 + $0x60] sm:$0xf] }
  0x1f   :  { %v1903_v5 = vld [vmem:[#allocation5 + $0x1f0] sm:$0xf]  ;;  %v2430_v6 = vld [vmem:[#allocation5 + $0x1f4] sm:$0xf0]  ;;  %v1840_v7 = vor.u32 %v2414_v4, %v1839_v2  ;;  %v2380_v13 = vld [vmem:[#allocation5 + $0x64] sm:$0xf0] }
  0x20   :  { %v1904_v8 = vor.u32 %v2430_v6, %v1903_v5  ;;  %v1775_v9 = vld [vmem:[#allocation5 + $0xf0] sm:$0xf]  ;;  %v2398_v10 = vld [vmem:[#allocation5 + $0xf4] sm:$0xf0]  ;;  %745 = vmatpush.bf16.msra.mxu0 %v1712_v3  ;;  %v1831_v14 = vld [vmem:[#allocation5 + $0x160] sm:$0xf]  ;;  %v1704_v16 = vor.u32 %v2380_v13, %v1703_v11 }
  0x21   :  { %v1776_v12 = vor.u32 %v2398_v10, %v1775_v9  ;;  %v2412_v15 = vld [vmem:[#allocation5 + $0x164] sm:$0xf0]  ;;  %773 = vmatpush.bf16.msra.mxu2 %v1840_v7  ;;  %v1895_v18 = vld [vmem:[#allocation5 + $0x1e0] sm:$0xf]  ;;  %v1695_v23 = vld [vmem:[#allocation5 + $0x50] sm:$0xf] }
  0x22   :  { %787 = vmatpush.bf16.msra.mxu3 %v1904_v8  ;;  %v1832_v17 = vor.u32 %v2412_v15, %v1831_v14  ;;  %v2428_v19 = vld [vmem:[#allocation5 + $0x1e4] sm:$0xf0]  ;;  %v1767_v20 = vld [vmem:[#allocation5 + $0xe0] sm:$0xf]  ;;  %v2378_v24 = vld [vmem:[#allocation5 + $0x54] sm:$0xf0] }
  0x23   :  { %759 = vmatpush.bf16.msra.mxu1 %v1776_v12  ;;  %v1896_v21 = vor.u32 %v2428_v19, %v1895_v18  ;;  %v2396_v22 = vld [vmem:[#allocation5 + $0xe4] sm:$0xf0]  ;;  %v1823_v26 = vld [vmem:[#allocation5 + $0x150] sm:$0xf]  ;;  %v2410_v27 = vld [vmem:[#allocation5 + $0x154] sm:$0xf0]  ;;  %v1696_v29 = vor.u32 %v2378_v24, %v1695_v23 }
  0x24   :  { %v1768_v25 = vor.u32 %v2396_v22, %v1767_v20  ;;  %v1887_v28 = vld [vmem:[#allocation5 + $0x1d0] sm:$0xf]  ;;  %746 = vmatpush.bf16.msra.mxu0 %v1704_v16  ;;  %v2426_v30 = vld [vmem:[#allocation5 + $0x1d4] sm:$0xf0]  ;;  %v1824_v33 = vor.u32 %v2410_v27, %v1823_v26  ;;  %v1687_v35 = vld [vmem:[#allocation5 + $0x40] sm:$0xf] }
  0x25   :  { %v1759_v31 = vld [vmem:[#allocation5 + $0xd0] sm:$0xf]  ;;  %v2394_v32 = vld [vmem:[#allocation5 + $0xd4] sm:$0xf0]  ;;  %774 = vmatpush.bf16.msra.mxu2 %v1832_v17  ;;  %v1888_v34 = vor.u32 %v2426_v30, %v1887_v28  ;;  %v2376_v36 = vld [vmem:[#allocation5 + $0x44] sm:$0xf0] }
  0x26   :  { %788 = vmatpush.bf16.msra.mxu3 %v1896_v21  ;;  %v1815_v37 = vld [vmem:[#allocation5 + $0x140] sm:$0xf]  ;;  %v1760_v38 = vor.u32 %v2394_v32, %v1759_v31  ;;  %v2408_v39 = vld [vmem:[#allocation5 + $0x144] sm:$0xf0]  ;;  %v1688_v44 = vor.u32 %v2376_v36, %v1687_v35  ;;  %v1679_v47 = vld [vmem:[#allocation5 + $0x30] sm:$0xf] }
  0x27   :  { %760 = vmatpush.bf16.msra.mxu1 %v1768_v25  ;;  %v1879_v40 = vld [vmem:[#allocation5 + $0x1c0] sm:$0xf]  ;;  %v2424_v41 = vld [vmem:[#allocation5 + $0x1c4] sm:$0xf0]  ;;  %v1816_v45 = vor.u32 %v2408_v39, %v1815_v37  ;;  %v2374_v48 = vld [vmem:[#allocation5 + $0x34] sm:$0xf0] }
  0x28   :  { %v1751_v42 = vld [vmem:[#allocation5 + $0xc0] sm:$0xf]  ;;  %v2392_v43 = vld [vmem:[#allocation5 + $0xc4] sm:$0xf0]  ;;  %747 = vmatpush.bf16.msra.mxu0 %v1696_v29  ;;  %v1880_v46 = vor.u32 %v2424_v41, %v1879_v40  ;;  %v1807_v49 = vld [vmem:[#allocation5 + $0x130] sm:$0xf]  ;;  %v1680_v56 = vor.u32 %v2374_v48, %v1679_v47 }
  0x29   :  { %775 = vmatpush.bf16.msra.mxu2 %v1824_v33  ;;  %v1752_v50 = vor.u32 %v2392_v43, %v1751_v42  ;;  %v2406_v51 = vld [vmem:[#allocation5 + $0x134] sm:$0xf0]  ;;  %v1871_v52 = vld [vmem:[#allocation5 + $0x1b0] sm:$0xf]  ;;  %v1671_v59 = vld [vmem:[#allocation5 + $0x20] sm:$0xf] }
  0x2a   :  { %789 = vmatpush.bf16.msra.mxu3 %v1888_v34  ;;  %v2422_v53 = vld [vmem:[#allocation5 + $0x1b4] sm:$0xf0]  ;;  %v1743_v54 = vld [vmem:[#allocation5 + $0xb0] sm:$0xf]  ;;  %v1808_v57 = vor.u32 %v2406_v51, %v1807_v49  ;;  %v2372_v60 = vld [vmem:[#allocation5 + $0x24] sm:$0xf0] }
  0x2b   :  { %761 = vmatpush.bf16.msra.mxu1 %v1760_v38  ;;  %v2390_v55 = vld [vmem:[#allocation5 + $0xb4] sm:$0xf0]  ;;  %v1872_v58 = vor.u32 %v2422_v53, %v1871_v52  ;;  %v1799_v61 = vld [vmem:[#allocation5 + $0x120] sm:$0xf]  ;;  %v2404_v63 = vld [vmem:[#allocation5 + $0x124] sm:$0xf0]  ;;  %v1672_v4 = vor.u32 %v2372_v60, %v1671_v59 }
  0x2c   :  { %748 = vmatpush.bf16.msra.mxu0 %v1688_v44  ;;  %v1744_v62 = vor.u32 %v2390_v55, %v1743_v54  ;;  %v1863_v0 = vld [vmem:[#allocation5 + $0x1a0] sm:$0xf]  ;;  %v2420_v1 = vld [vmem:[#allocation5 + $0x1a4] sm:$0xf0]  ;;  %v1663_v5 = vld [vmem:[#allocation5 + $0x10] sm:$0xf]  ;;  %v1800_v6 = vor.u32 %v2404_v63, %v1799_v61 }
  0x2d   :  { %776 = vmatpush.bf16.msra.mxu2 %v1816_v45  ;;  %v1735_v2 = vld [vmem:[#allocation5 + $0xa0] sm:$0xf]  ;;  %v2388_v3 = vld [vmem:[#allocation5 + $0xa4] sm:$0xf0]  ;;  %v1864_v7 = vor.u32 %v2420_v1, %v1863_v0  ;;  %v2370_v8 = vld [vmem:[#allocation5 + $0x14] sm:$0xf0] }
  0x2e   :  { %790 = vmatpush.bf16.msra.mxu3 %v1880_v46  ;;  %v1791_v9 = vld [vmem:[#allocation5 + $0x110] sm:$0xf]  ;;  %v2402_v10 = vld [vmem:[#allocation5 + $0x114] sm:$0xf0]  ;;  %v1736_v11 = vor.u32 %v2388_v3, %v1735_v2  ;;  %v1655_v16 = vld [vmem:[#allocation5] sm:$0xf]  ;;  %v1664_v18 = vor.u32 %v2370_v8, %v1663_v5 }
  0x2f   :  { %762 = vmatpush.bf16.msra.mxu1 %v1752_v50  ;;  %v1855_v12 = vld [vmem:[#allocation5 + $0x190] sm:$0xf]  ;;  %v2418_v13 = vld [vmem:[#allocation5 + $0x194] sm:$0xf0]  ;;  %v2368_v17 = vld [vmem:[#allocation5 + $0x4] sm:$0xf0]  ;;  %v1792_v23 = vor.u32 %v2402_v10, %v1791_v9 }
  0x30   :  { %749 = vmatpush.bf16.msra.mxu0 %v1680_v56  ;;  %v1727_v14 = vld [vmem:[#allocation5 + $0x90] sm:$0xf]  ;;  %v2386_v15 = vld [vmem:[#allocation5 + $0x94] sm:$0xf0]  ;;  %v1783_v19 = vld [vmem:[#allocation5 + $0x100] sm:$0xf]  ;;  %v1856_v24 = vor.u32 %v2418_v13, %v1855_v12  ;;  %v1656_v35 = vor.u32 %v2368_v17, %v1655_v16 }
  0x31   :  { %777 = vmatpush.bf16.msra.mxu2 %v1808_v57  ;;  %v2400_v20 = vld [vmem:[#allocation5 + $0x104] sm:$0xf0]  ;;  %v1847_v21 = vld [vmem:[#allocation5 + $0x180] sm:$0xf]  ;;  %v1967_v25 = vld [vmem:[#allocation5 + $0x270] sm:$0xf]  ;;  %v1728_v28 = vor.u32 %v2386_v15, %v1727_v14 }
  0x32   :  { %791 = vmatpush.bf16.msra.mxu3 %v1872_v58  ;;  %v2416_v22 = vld [vmem:[#allocation5 + $0x184] sm:$0xf0]  ;;  %v2446_v26 = vld [vmem:[#allocation5 + $0x274] sm:$0xf0]  ;;  %v2381_v27 = vld [vmem:[#allocation5 + $0x74] sm:$0xf]  ;;  %v1784_v39 = vor.u32 %v2400_v20, %v1783_v19 }
  0x33   :  { %763 = vmatpush.bf16.msra.mxu1 %v1744_v62  ;;  %v1713_v29 = vld [vmem:[#allocation5 + $0x78] sm:$0xf0]  ;;  %v1719_v30 = vld [vmem:[#allocation5 + $0x80] sm:$0xf]  ;;  %v2384_v31 = vld [vmem:[#allocation5 + $0x84] sm:$0xf0]  ;;  %v1848_v40 = vor.u32 %v2416_v22, %v1847_v21  ;;  %v1968_v44 = vor.u32 %v2446_v26, %v1967_v25 }
  0x34   :  { %750 = vmatpush.bf16.msra.mxu0 %v1672_v4  ;;  %v128_v32 = vld [vmem:[#allocation2 + $0x10] sm:$0xff]  ;;  %v135_v33 = vld [vmem:[#allocation2 + $0x48] sm:$0xff]  ;;  %v2031_v34 = vld [vmem:[#allocation5 + $0x2f0] sm:$0xf]  ;;  %v1716_v45 = vor.u32 %v2381_v27, %v1713_v29  ;;  %v1720_v49 = vor.u32 %v2384_v31, %v1719_v30  ;;  %vm741_vm0 = vcmask 130048   ;;  %s2754_s1 = smov [#allocation13]  }
  0x35   :  { %778 = vmatpush.bf16.msra.mxu2 %v1800_v6  ;;  %v2462_v36 = vld [vmem:[#allocation5 + $0x2f4] sm:$0xf0]  ;;  %v2039_v37 = vld [vmem:[#allocation5 + $0x300] sm:$0xf]  ;;  %v2464_v38 = vld [vmem:[#allocation5 + $0x304] sm:$0xf0]  ;;  %v2835_v54 = vpack.c.bf16 %v135_v33, %v128_v32 }
  0x36   :  { %792 = vmatpush.bf16.msra.mxu3 %v1864_v7  ;;  %v2397_v41 = vld [vmem:[#allocation5 + $0xf4] sm:$0xf]  ;;  %v1777_v42 = vld [vmem:[#allocation5 + $0xf8] sm:$0xf0]  ;;  %v133_v46 = vld [vmem:[#allocation2 + $0x38] sm:$0xff]  ;;  %v2040_v50 = vor.u32 %v2464_v38, %v2039_v37  ;;  %v2032_v55 = vor.u32 %v2462_v36, %v2031_v34  ;;  %s1635_s22 = sshll.u32 %s2754_s1, 4  ;;  %s1636_s22 = int_to_ptr.vmem [resolvable:$true] %s1635_s22 }
  0x37   :  { %764 = vmatpush.bf16.msra.mxu1 %v1736_v11  ;;  %v126_v43 = vld [vmem:[#allocation2] sm:$0xff]  ;;  %v129_v47 = vld [vmem:[#allocation2 + $0x18] sm:$0xff]  ;;  %v136_v48 = vld [vmem:[#allocation2 + $0x50] sm:$0xff]  ;;  %v1780_v59 = vor.u32 %v2397_v41, %v1777_v42  ;;  %s1637_s24 = sshll.u32 %s2893_s9, 4  ;;  %s1638_s24 = int_to_ptr.hbm [resolvable:$true] %s1637_s24 }
  0x38   :  { %751 = vmatpush.bf16.msra.mxu0 %v1664_v18  ;;  %v1959_v51 = vld [vmem:[#allocation5 + $0x260] sm:$0xf]  ;;  %v2444_v52 = vld [vmem:[#allocation5 + $0x264] sm:$0xf0]  ;;  %v2379_v53 = vld [vmem:[#allocation5 + $0x64] sm:$0xf]  ;;  %v2837_v60 = vpack.c.bf16 %v133_v46, %v126_v43  ;;  %v2839_v63 = vpack.c.bf16 %v136_v48, %v129_v47 }
  0x39   :  { %779 = vmatpush.bf16.msra.mxu2 %v1792_v23  ;;  %v1705_v56 = vld [vmem:[#allocation5 + $0x68] sm:$0xf0]  ;;  %v127_v57 = vld [vmem:[#allocation2 + $0x8] sm:$0xff]  ;;  %v134_v58 = vld [vmem:[#allocation2 + $0x40] sm:$0xff]  ;;  %v1960_v0 = vor.u32 %v2444_v52, %v1959_v51 }
  0x3a   :  { %793 = vmatpush.bf16.msra.mxu3 %v1856_v24  ;;  %v2023_v61 = vld [vmem:[#allocation5 + $0x2e0] sm:$0xf]  ;;  %v2460_v62 = vld [vmem:[#allocation5 + $0x2e4] sm:$0xf0]  ;;  %v2395_v1 = vld [vmem:[#allocation5 + $0xe4] sm:$0xf]  ;;  %v1708_v3 = vor.u32 %v2379_v53, %v1705_v56  ;;  %v2841_v4 = vpack.c.bf16 %v134_v58, %v127_v57 }
  0x3b   :  { %765 = vmatpush.bf16.msra.mxu1 %v1728_v28  ;;  %v1769_v2 = vld [vmem:[#allocation5 + $0xe8] sm:$0xf0]  ;;  %v1951_v5 = vld [vmem:[#allocation5 + $0x250] sm:$0xf]  ;;  %v2442_v6 = vld [vmem:[#allocation5 + $0x254] sm:$0xf0]  ;;  %v2024_v7 = vor.u32 %v2460_v62, %v2023_v61 }
  0x3c   :  { %752 = vmatpush.bf16.msra.mxu0 %v1656_v35  ;;  %v2377_v8 = vld [vmem:[#allocation5 + $0x54] sm:$0xf]  ;;  %v1697_v9 = vld [vmem:[#allocation5 + $0x58] sm:$0xf0]  ;;  %v1772_v10 = vor.u32 %v2395_v1, %v1769_v2  ;;  %v2015_v11 = vld [vmem:[#allocation5 + $0x2d0] sm:$0xf]  ;;  %v1952_v13 = vor.u32 %v2442_v6, %v1951_v5 }
  0x3d   :  { %780 = vmatpush.bf16.msra.mxu2 %v1784_v39  ;;  %v2458_v12 = vld [vmem:[#allocation5 + $0x2d4] sm:$0xf0]  ;;  %v2393_v14 = vld [vmem:[#allocation5 + $0xd4] sm:$0xf]  ;;  %v1761_v15 = vld [vmem:[#allocation5 + $0xd8] sm:$0xf0]  ;;  %v1700_v16 = vor.u32 %v2377_v8, %v1697_v9 }
  0x3e   :  { %794 = vmatpush.bf16.msra.mxu3 %v1848_v40  ;;  %v1943_v17 = vld [vmem:[#allocation5 + $0x240] sm:$0xf]  ;;  %v2440_v18 = vld [vmem:[#allocation5 + $0x244] sm:$0xf0]  ;;  %v2016_v19 = vor.u32 %v2458_v12, %v2015_v11  ;;  %v2375_v20 = vld [vmem:[#allocation5 + $0x44] sm:$0xf]  ;;  %v1764_v22 = vor.u32 %v2393_v14, %v1761_v15 }
  0x3f   :  { %766 = vmatpush.bf16.msra.mxu1 %v1720_v49  ;;  %753 = vmatmul.bf16.vlgmr.msra.gmra.mxu0 %v2837_v60  ;;  %v1689_v21 = vld [vmem:[#allocation5 + $0x48] sm:$0xf0]  ;;  %v2007_v23 = vld [vmem:[#allocation5 + $0x2c0] sm:$0xf]  ;;  %v2456_v24 = vld [vmem:[#allocation5 + $0x2c4] sm:$0xf0]  ;;  %v1944_v25 = vor.u32 %v2440_v18, %v1943_v17 }
  0x40   :  { %801 = vmatpush.bf16.msrb.mxu0 %v1968_v44  ;;  %781 = vmatmul.bf16.vlgmr.msra.gmra.mxu2 %v2835_v54  ;;  %v2391_v26 = vld [vmem:[#allocation5 + $0xc4] sm:$0xf]  ;;  %v1753_v27 = vld [vmem:[#allocation5 + $0xc8] sm:$0xf0]  ;;  %v1692_v28 = vor.u32 %v2375_v20, %v1689_v21  ;;  %v1935_v29 = vld [vmem:[#allocation5 + $0x230] sm:$0xf]  ;;  %v2008_v31 = vor.u32 %v2456_v24, %v2007_v23 }
  0x41   :  { %836 = vmatpush.bf16.msrb.mxu2 %v2040_v50  ;;  %795 = vmatmul.bf16.vlgmr.msra.gmra.mxu3 %v2839_v63  ;;  %v2438_v30 = vld [vmem:[#allocation5 + $0x234] sm:$0xf0]  ;;  %v2373_v32 = vld [vmem:[#allocation5 + $0x34] sm:$0xf]  ;;  %v1681_v33 = vld [vmem:[#allocation5 + $0x38] sm:$0xf0]  ;;  %v1756_v35 = vor.u32 %v2391_v26, %v1753_v27 }
  0x42   :  { %843 = vmatpush.bf16.msrb.mxu3 %v1716_v45  ;;  %767 = vmatmul.bf16.vlgmr.msra.gmra.mxu1 %v2841_v4  ;;  %v1999_v34 = vld [vmem:[#allocation5 + $0x2b0] sm:$0xf]  ;;  %v2454_v36 = vld [vmem:[#allocation5 + $0x2b4] sm:$0xf0]  ;;  %v132_v37 = vld [vmem:[#allocation2 + $0x30] sm:$0xff]  ;;  %v1936_v39 = vor.u32 %v2438_v30, %v1935_v29  ;;  %v1684_v42 = vor.u32 %v2373_v32, %v1681_v33 }
  0x43   :  { %815 = vmatpush.bf16.msrb.mxu1 %v2032_v55  ;;  %v139_v38 = vld [vmem:[#allocation2 + $0x68] sm:$0xff]  ;;  %v2389_v40 = vld [vmem:[#allocation5 + $0xb4] sm:$0xf]  ;;  %v1927_v43 = vld [vmem:[#allocation5 + $0x220] sm:$0xf]  ;;  %v2000_v45 = vor.u32 %v2454_v36, %v1999_v34 }
  0x44   :  { %802 = vmatpush.bf16.msrb.mxu0 %v1960_v0  ;;  %v1745_v41 = vld [vmem:[#allocation5 + $0xb8] sm:$0xf0]  ;;  %v2436_v44 = vld [vmem:[#allocation5 + $0x224] sm:$0xf0]  ;;  %v2371_v46 = vld [vmem:[#allocation5 + $0x24] sm:$0xf]  ;;  %v2847_v48 = vpack.c.bf16 %v139_v38, %v132_v37 }
  0x45   :  { %857 = vmatpush.bf16.msra.mxu2 %v1780_v59  ;;  %v1673_v47 = vld [vmem:[#allocation5 + $0x28] sm:$0xf0]  ;;  %v1748_v49 = vor.u32 %v2389_v40, %v1745_v41  ;;  %v1991_v50 = vld [vmem:[#allocation5 + $0x2a0] sm:$0xf]  ;;  %v2452_v51 = vld [vmem:[#allocation5 + $0x2a4] sm:$0xf0]  ;;  %v1928_v52 = vor.u32 %v2436_v44, %v1927_v43 }
  0x46   :  { %844 = vmatpush.bf16.msrb.mxu3 %v1708_v3  ;;  %v2387_v53 = vld [vmem:[#allocation5 + $0xa4] sm:$0xf]  ;;  %v1737_v55 = vld [vmem:[#allocation5 + $0xa8] sm:$0xf0]  ;;  %v1676_v56 = vor.u32 %v2371_v46, %v1673_v47  ;;  %v1919_v57 = vld [vmem:[#allocation5 + $0x210] sm:$0xf]  ;;  %v1992_v61 = vor.u32 %v2452_v51, %v1991_v50 }
  0x47   :  { %816 = vmatpush.bf16.msrb.mxu1 %v2024_v7  ;;  %v2434_v58 = vld [vmem:[#allocation5 + $0x214] sm:$0xf0]  ;;  %v2369_v59 = vld [vmem:[#allocation5 + $0x14] sm:$0xf]  ;;  %v1665_v62 = vld [vmem:[#allocation5 + $0x18] sm:$0xf0]  ;;  %v1740_v2 = vor.u32 %v2387_v53, %v1737_v55 }
  0x48   :  { %803 = vmatpush.bf16.msrb.mxu0 %v1952_v13  ;;  %v1983_v0 = vld [vmem:[#allocation5 + $0x290] sm:$0xf]  ;;  %v2450_v1 = vld [vmem:[#allocation5 + $0x294] sm:$0xf0]  ;;  %v2385_v3 = vld [vmem:[#allocation5 + $0x94] sm:$0xf]  ;;  %v1920_v7 = vor.u32 %v2434_v58, %v1919_v57  ;;  %v1668_v11 = vor.u32 %v2369_v59, %v1665_v62 }
  0x49   :  { %858 = vmatpush.bf16.msra.mxu2 %v1772_v10  ;;  %v1729_v5 = vld [vmem:[#allocation5 + $0x98] sm:$0xf0]  ;;  %v1911_v6 = vld [vmem:[#allocation5 + $0x200] sm:$0xf]  ;;  %v2432_v8 = vld [vmem:[#allocation5 + $0x204] sm:$0xf0]  ;;  %v1984_v15 = vor.u32 %v2450_v1, %v1983_v0 }
  0x4a   :  { %845 = vmatpush.bf16.msrb.mxu3 %v1700_v16  ;;  %v2367_v9 = vld [vmem:[#allocation5 + $0x4] sm:$0xf]  ;;  %v1657_v10 = vld [vmem:[#allocation5 + $0x8] sm:$0xf0]  ;;  %v2413_v12 = vld [vmem:[#allocation5 + $0x174] sm:$0xf]  ;;  %v1912_v23 = vor.u32 %v2432_v8, %v1911_v6 }
  0x4b   :  { %817 = vmatpush.bf16.msrb.mxu1 %v2016_v19  ;;  %v1841_v13 = vld [vmem:[#allocation5 + $0x178] sm:$0xf0]  ;;  %v2445_v14 = vld [vmem:[#allocation5 + $0x274] sm:$0xf]  ;;  %v1975_v17 = vld [vmem:[#allocation5 + $0x280] sm:$0xf]  ;;  %v1732_v19 = vor.u32 %v2385_v3, %v1729_v5  ;;  %v1660_v27 = vor.u32 %v2367_v9, %v1657_v10 }
  0x4c   :  { %804 = vmatpush.bf16.msrb.mxu0 %v1944_v25  ;;  %v1969_v16 = vld [vmem:[#allocation5 + $0x278] sm:$0xf0]  ;;  %v2448_v18 = vld [vmem:[#allocation5 + $0x284] sm:$0xf0]  ;;  %v130_v20 = vld [vmem:[#allocation2 + $0x20] sm:$0xff] }
  0x4d   :  { %859 = vmatpush.bf16.msra.mxu2 %v1764_v22  ;;  %v137_v21 = vld [vmem:[#allocation2 + $0x58] sm:$0xff]  ;;  %v2383_v22 = vld [vmem:[#allocation5 + $0x84] sm:$0xf]  ;;  %v2429_v25 = vld [vmem:[#allocation5 + $0x1f4] sm:$0xf]  ;;  %v1972_v32 = vor.u32 %v2445_v14, %v1969_v16  ;;  %v1976_v33 = vor.u32 %v2448_v18, %v1975_v17 }
  0x4e   :  { %846 = vmatpush.bf16.msrb.mxu3 %v1692_v28  ;;  %v1721_v24 = vld [vmem:[#allocation5 + $0x88] sm:$0xf0]  ;;  %v1905_v26 = vld [vmem:[#allocation5 + $0x1f8] sm:$0xf0]  ;;  %v1844_v28 = vor.u32 %v2413_v12, %v1841_v13  ;;  %v2461_v29 = vld [vmem:[#allocation5 + $0x2f4] sm:$0xf]  ;;  %v2851_v37 = vpack.c.bf16 %v137_v21, %v130_v20 }
  0x4f   :  { %818 = vmatpush.bf16.msrb.mxu1 %v2008_v31  ;;  %v2033_v30 = vld [vmem:[#allocation5 + $0x2f8] sm:$0xf0]  ;;  %v138_v34 = vld [vmem:[#allocation2 + $0x60] sm:$0xff]  ;;  %v1833_v36 = vld [vmem:[#allocation5 + $0x168] sm:$0xf0]  ;;  %v1724_v38 = vor.u32 %v2383_v22, %v1721_v24  ;;  %v1908_v41 = vor.u32 %v2429_v25, %v1905_v26 }
  0x50   :  { %805 = vmatpush.bf16.msrb.mxu0 %v1936_v39  ;;  %2045 = vmatmul.msk.bf16.vlgmr.msrb.gmra.mxu2 %vm741_vm0, %v2847_v48  ;;  %v131_v31 = vld [vmem:[#allocation2 + $0x28] sm:$0xff]  ;;  %v2443_v39 = vld [vmem:[#allocation5 + $0x264] sm:$0xf]  ;;  %v1961_v40 = vld [vmem:[#allocation5 + $0x268] sm:$0xf0] }
  0x51   :  { %860 = vmatpush.bf16.msra.mxu2 %v1756_v35  ;;  %v2411_v35 = vld [vmem:[#allocation5 + $0x164] sm:$0xf]  ;;  %v2853_v44 = vpack.c.bf16 %v138_v34, %v131_v31  ;;  %v1897_v46 = vld [vmem:[#allocation5 + $0x1e8] sm:$0xf0]  ;;  %v1964_v50 = vor.u32 %v2443_v39, %v1961_v40  ;;  %v2409_v51 = vld [vmem:[#allocation5 + $0x154] sm:$0xf] }
  0x52   :  { %847 = vmatpush.bf16.msrb.mxu3 %v1684_v42  ;;  %v2036_v42 = vor.u32 %v2461_v29, %v2033_v30  ;;  %v2427_v43 = vld [vmem:[#allocation5 + $0x1e4] sm:$0xf]  ;;  %v2441_v53 = vld [vmem:[#allocation5 + $0x254] sm:$0xf]  ;;  %v1953_v55 = vld [vmem:[#allocation5 + $0x258] sm:$0xf0] }
  0x53   :  { %819 = vmatpush.bf16.msrb.mxu1 %v2000_v45  ;;  %v1836_v45 = vor.u32 %v2411_v35, %v1833_v36  ;;  %v2459_v47 = vld [vmem:[#allocation5 + $0x2e4] sm:$0xf]  ;;  %v2425_v58 = vld [vmem:[#allocation5 + $0x1d4] sm:$0xf]  ;;  %v2017_v0 = vld [vmem:[#allocation5 + $0x2d8] sm:$0xf0]  ;;  %v1956_v1 = vor.u32 %v2441_v53, %v1953_v55 }
  0x54   :  { %806 = vmatpush.bf16.msrb.mxu0 %v1928_v52  ;;  %v1825_v52 = vld [vmem:[#allocation5 + $0x158] sm:$0xf0]  ;;  %v2457_v62 = vld [vmem:[#allocation5 + $0x2d4] sm:$0xf]  ;;  %v1817_v3 = vld [vmem:[#allocation5 + $0x148] sm:$0xf0] }
  0x55   :  { %861 = vmatpush.bf16.msra.mxu2 %v1748_v49  ;;  %v2025_v49 = vld [vmem:[#allocation5 + $0x2e8] sm:$0xf0]  ;;  %v1828_v59 = vor.u32 %v2409_v51, %v1825_v52  ;;  %v2439_v5 = vld [vmem:[#allocation5 + $0x244] sm:$0xf]  ;;  %v2020_v8 = vor.u32 %v2457_v62, %v2017_v0  ;;  %v1809_v16 = vld [vmem:[#allocation5 + $0x138] sm:$0xf0] }
  0x56   :  { %848 = vmatpush.bf16.msrb.mxu3 %v1676_v56  ;;  %v1900_v56 = vor.u32 %v2427_v43, %v1897_v46  ;;  %v2028_v57 = vor.u32 %v2459_v47, %v2025_v49  ;;  %v1945_v6 = vld [vmem:[#allocation5 + $0x248] sm:$0xf0]  ;;  %v2423_v9 = vld [vmem:[#allocation5 + $0x1c4] sm:$0xf]  ;;  %v2437_v17 = vld [vmem:[#allocation5 + $0x234] sm:$0xf] }
  0x57   :  { %820 = vmatpush.bf16.msrb.mxu1 %v1992_v61  ;;  %v1889_v61 = vld [vmem:[#allocation5 + $0x1d8] sm:$0xf0]  ;;  %v1881_v10 = vld [vmem:[#allocation5 + $0x1c8] sm:$0xf0]  ;;  %v2455_v12 = vld [vmem:[#allocation5 + $0x2c4] sm:$0xf]  ;;  %v1948_v14 = vor.u32 %v2439_v5, %v1945_v6 }
  0x58   :  { %807 = vmatpush.bf16.msrb.mxu0 %v1920_v7  ;;  %v1892_v7 = vor.u32 %v2425_v58, %v1889_v61  ;;  %v2009_v13 = vld [vmem:[#allocation5 + $0x2c8] sm:$0xf0]  ;;  %v1884_v18 = vor.u32 %v2423_v9, %v1881_v10  ;;  %v1873_v21 = vld [vmem:[#allocation5 + $0x1b8] sm:$0xf0]  ;;  %v2453_v22 = vld [vmem:[#allocation5 + $0x2b4] sm:$0xf] }
  0x59   :  { %862 = vmatpush.bf16.msra.mxu2 %v1740_v2  ;;  %v2407_v2 = vld [vmem:[#allocation5 + $0x144] sm:$0xf]  ;;  %v1801_v26 = vld [vmem:[#allocation5 + $0x128] sm:$0xf0]  ;;  %v1793_v39 = vld [vmem:[#allocation5 + $0x118] sm:$0xf0] }
  0x5a   :  { %849 = vmatpush.bf16.msrb.mxu3 %v1668_v11  ;;  %v1820_v11 = vor.u32 %v2407_v2, %v1817_v3  ;;  %v2403_v25 = vld [vmem:[#allocation5 + $0x124] sm:$0xf]  ;;  %v1993_v35 = vld [vmem:[#allocation5 + $0x2a8] sm:$0xf0]  ;;  %v2433_v40 = vld [vmem:[#allocation5 + $0x214] sm:$0xf] }
  0x5b   :  { %821 = vmatpush.bf16.msrb.mxu1 %v1984_v15  ;;  %v2405_v15 = vld [vmem:[#allocation5 + $0x134] sm:$0xf]  ;;  %v2419_v31 = vld [vmem:[#allocation5 + $0x1a4] sm:$0xf]  ;;  %v1857_v47 = vld [vmem:[#allocation5 + $0x198] sm:$0xf0] }
  0x5c   :  { %808 = vmatpush.bf16.msrb.mxu0 %v1912_v23  ;;  %v1812_v20 = vor.u32 %v2405_v15, %v1809_v16  ;;  %v2001_v23 = vld [vmem:[#allocation5 + $0x2b8] sm:$0xf0]  ;;  %v2451_v34 = vld [vmem:[#allocation5 + $0x2a4] sm:$0xf]  ;;  %v2449_v49 = vld [vmem:[#allocation5 + $0x294] sm:$0xf] }
  0x5d   :  { %863 = vmatpush.bf16.msra.mxu2 %v1732_v19  ;;  %v2421_v19 = vld [vmem:[#allocation5 + $0x1b4] sm:$0xf]  ;;  %v2004_v30 = vor.u32 %v2453_v22, %v2001_v23  ;;  %v1996_v43 = vor.u32 %v2451_v34, %v1993_v35  ;;  %v2399_v52 = vld [vmem:[#allocation5 + $0x104] sm:$0xf]  ;;  %v1785_v53 = vld [vmem:[#allocation5 + $0x108] sm:$0xf0] }
  0x5e   :  { %850 = vmatpush.bf16.msrb.mxu3 %v1660_v27  ;;  %v2435_v27 = vld [vmem:[#allocation5 + $0x224] sm:$0xf]  ;;  %v1876_v29 = vor.u32 %v2421_v19, %v1873_v21  ;;  %v2041_v58 = vld [vmem:[#allocation5 + $0x308] sm:$0xf0]  ;;  %v1788_v62 = vor.u32 %v2399_v52, %v1785_v53  ;;  %v2097_v15 = vld [vmem:[#allocation8 + $0x60] sm:$0xf] }
  0x5f   :  { %822 = vmatpush.bf16.msrb.mxu1 %v1976_v33  ;;  %809 = vmatmul.bf16.vlgmr.msrb.gmra.mxu0 %v2851_v37  ;;  %v1865_v33 = vld [vmem:[#allocation5 + $0x1a8] sm:$0xf0]  ;;  %v2431_v55 = vld [vmem:[#allocation5 + $0x204] sm:$0xf]  ;;  %v2478_v16 = vld [vmem:[#allocation8 + $0x64] sm:$0xf0] }
  0x60   :  { %871 = vmatpush.bf16.msra.mxu0 %v1844_v28  ;;  %v1929_v28 = vld [vmem:[#allocation5 + $0x228] sm:$0xf0]  ;;  %v2415_v0 = vld [vmem:[#allocation5 + $0x184] sm:$0xf]  ;;  %v2474_v21 = vld [vmem:[#allocation8 + $0x44] sm:$0xf0] }
  0x61   :  { %864 = vmatpush.bf16.msra.mxu2 %v1724_v38  ;;  %851 = vmatmul.bf16.vlgmr.msrb.gmra.mxu3 %v2837_v60  ;;  %v2012_v60 = vor.u32 %v2455_v12, %v2009_v13  ;;  %v1932_v36 = vor.u32 %v2435_v27, %v1929_v28  ;;  %v2401_v38 = vld [vmem:[#allocation5 + $0x114] sm:$0xf]  ;;  %v2447_v3 = vld [vmem:[#allocation5 + $0x284] sm:$0xf]  ;;  %v1977_v5 = vld [vmem:[#allocation5 + $0x288] sm:$0xf0] }
  0x62   :  { %899 = vmatpush.bf16.msra.mxu3 %v1972_v32  ;;  %823 = vmatmul.bf16.vlgmr.msrb.gmra.mxu1 %v2853_v44  ;;  %v1804_v32 = vor.u32 %v2403_v25, %v1801_v26  ;;  %v1796_v46 = vor.u32 %v2401_v38, %v1793_v39  ;;  %v2105_v9 = vld [vmem:[#allocation8 + $0x70] sm:$0xf]  ;;  %v2480_v10 = vld [vmem:[#allocation8 + $0x74] sm:$0xf0]  ;;  %v2107_v13 = vld [vmem:[#allocation8 + $0x78] sm:$0xf0] }
  0x63   :  { %885 = vmatpush.bf16.msra.mxu1 %v1908_v41  ;;  %v1921_v41 = vld [vmem:[#allocation5 + $0x218] sm:$0xf0]  ;;  %v2106_v12 = vor.u32 %v2480_v10, %v2105_v9  ;;  %v2473_v22 = vld [vmem:[#allocation8 + $0x44] sm:$0xf]  ;;  %v2073_v26 = vld [vmem:[#allocation8 + $0x30] sm:$0xf] }
  0x64   :  { %872 = vmatpush.bf16.msra.mxu0 %v1836_v45  ;;  %865 = vmatmul.bf16.vlgmr.msra.gmra.mxu2 %v2841_v4  ;;  %v1937_v4 = vld [vmem:[#allocation5 + $0x238] sm:$0xf0]  ;;  %v2417_v45 = vld [vmem:[#allocation5 + $0x194] sm:$0xf]  ;;  %v1924_v51 = vor.u32 %v2433_v40, %v1921_v41  ;;  %v2472_v27 = vld [vmem:[#allocation8 + $0x34] sm:$0xf0] }
  0x65   :  { %913 = vmatpush.bf16.msrb.mxu2 %v2036_v42  ;;  %v1940_v24 = vor.u32 %v2437_v17, %v1937_v4  ;;  %v1868_v42 = vor.u32 %v2419_v31, %v1865_v33  ;;  %v2477_v17 = vld [vmem:[#allocation8 + $0x64] sm:$0xf]  ;;  %v2471_v28 = vld [vmem:[#allocation8 + $0x34] sm:$0xf]  ;;  %v2470_v33 = vld [vmem:[#allocation8 + $0x24] sm:$0xf0] }
  0x66   :  { %900 = vmatpush.bf16.msra.mxu3 %v1964_v50  ;;  %v1985_v50 = vld [vmem:[#allocation5 + $0x298] sm:$0xf0]  ;;  %v2469_v34 = vld [vmem:[#allocation8 + $0x24] sm:$0xf]  ;;  %v2057_v39 = vld [vmem:[#allocation8 + $0x10] sm:$0xf] }
  0x67   :  { %886 = vmatpush.bf16.msra.mxu1 %v1900_v56  ;;  %v1913_v56 = vld [vmem:[#allocation5 + $0x208] sm:$0xf0]  ;;  %v1988_v61 = vor.u32 %v2449_v49, %v1985_v50  ;;  %v2467_v41 = vld [vmem:[#allocation8 + $0x14] sm:$0xf]  ;;  %v2049_v50 = vld [vmem:[#allocation8] sm:$0xf] }
  0x68   :  { %873 = vmatpush.bf16.msra.mxu0 %v1828_v59  ;;  %v1860_v59 = vor.u32 %v2417_v45, %v1857_v47  ;;  %v1916_v2 = vor.u32 %v2431_v55, %v1913_v56  ;;  %v2468_v40 = vld [vmem:[#allocation8 + $0x14] sm:$0xf0]  ;;  %v2465_v52 = vld [vmem:[#allocation8 + $0x4] sm:$0xf]  ;;  %v2051_v55 = vld [vmem:[#allocation8 + $0x8] sm:$0xf0] }
  0x69   :  { %914 = vmatpush.bf16.msrb.mxu2 %v2028_v57  ;;  %v2463_v57 = vld [vmem:[#allocation5 + $0x304] sm:$0xf]  ;;  %v2171_v9 = vld [vmem:[#allocation8 + $0xf8] sm:$0xf0] }
  0x6a   :  { %901 = vmatpush.bf16.msra.mxu3 %v1956_v1  ;;  %v1849_v1 = vld [vmem:[#allocation5 + $0x188] sm:$0xf0]  ;;  %v2044_v6 = vor.u32 %v2463_v57, %v2041_v58  ;;  %v2054_v57 = vor.u32 %v2465_v52, %v2051_v55  ;;  %v2129_v52 = vld [vmem:[#allocation8 + $0xa0] sm:$0xf] }
  0x6b   :  { %887 = vmatpush.bf16.msra.mxu1 %v1892_v7  ;;  %v1852_v7 = vor.u32 %v2415_v0, %v1849_v1 }
  0x6c   :  { %874 = vmatpush.bf16.msra.mxu0 %v1820_v11  ;;  %v2479_v11 = vld [vmem:[#allocation8 + $0x74] sm:$0xf] }
  0x6d   :  { %915 = vmatpush.bf16.msrb.mxu2 %v2020_v8  ;;  %v1980_v8 = vor.u32 %v2447_v3, %v1977_v5  ;;  %v2169_v5 = vld [vmem:[#allocation8 + $0xf0] sm:$0xf] }
  0x6e   :  { %902 = vmatpush.bf16.msra.mxu3 %v1948_v14  ;;  %v2110_v14 = vor.u32 %v2479_v11, %v2107_v13  ;;  %v2161_v13 = vld [vmem:[#allocation8 + $0xe0] sm:$0xf] }
  0x6f   :  { %888 = vmatpush.bf16.msra.mxu1 %v1884_v18  ;;  %v2476_v18 = vld [vmem:[#allocation8 + $0x54] sm:$0xf0] }
  0x70   :  { %875 = vmatpush.bf16.msra.mxu0 %v1812_v20  ;;  %v2081_v20 = vld [vmem:[#allocation8 + $0x40] sm:$0xf] }
  0x71   :  { %916 = vmatpush.bf16.msrb.mxu2 %v2012_v60  ;;  %v2091_v60 = vld [vmem:[#allocation8 + $0x58] sm:$0xf0]  ;;  %v2082_v23 = vor.u32 %v2474_v21, %v2081_v20  ;;  %v2491_v20 = vld [vmem:[#allocation8 + $0xd4] sm:$0xf] }
  0x72   :  { %903 = vmatpush.bf16.msra.mxu3 %v1940_v24  ;;  %v2083_v24 = vld [vmem:[#allocation8 + $0x48] sm:$0xf0] }
  0x73   :  { %889 = vmatpush.bf16.msra.mxu1 %v1876_v29  ;;  %v2086_v25 = vor.u32 %v2473_v22, %v2083_v24  ;;  %v2074_v29 = vor.u32 %v2472_v27, %v2073_v26  ;;  %v2145_v27 = vld [vmem:[#allocation8 + $0xc0] sm:$0xf] }
  0x74   :  { %876 = vmatpush.bf16.msra.mxu0 %v1804_v32  ;;  %v2065_v32 = vld [vmem:[#allocation8 + $0x20] sm:$0xf] }
  0x75   :  { %917 = vmatpush.bf16.msrb.mxu2 %v2004_v30  ;;  %v2075_v30 = vld [vmem:[#allocation8 + $0x38] sm:$0xf0]  ;;  %v2066_v35 = vor.u32 %v2470_v33, %v2065_v32  ;;  %v2147_v32 = vld [vmem:[#allocation8 + $0xc8] sm:$0xf0] }
  0x76   :  { %904 = vmatpush.bf16.msra.mxu3 %v1932_v36  ;;  %v2078_v31 = vor.u32 %v2471_v28, %v2075_v30  ;;  %v2067_v36 = vld [vmem:[#allocation8 + $0x28] sm:$0xf0]  ;;  %v2490_v28 = vld [vmem:[#allocation8 + $0xc4] sm:$0xf0] }
  0x77   :  { %890 = vmatpush.bf16.msra.mxu1 %v1868_v42  ;;  %v2070_v38 = vor.u32 %v2469_v34, %v2067_v36  ;;  %v2058_v42 = vor.u32 %v2468_v40, %v2057_v39  ;;  %v2146_v30 = vor.u32 %v2490_v28, %v2145_v27  ;;  %v2137_v40 = vld [vmem:[#allocation8 + $0xb0] sm:$0xf] }
  0x78   :  { %877 = vmatpush.bf16.msra.mxu0 %v1796_v46  ;;  %v2865_v46 = vld [vmem:[#allocation7] sm:$0x3] }
  0x79   :  { %918 = vmatpush.bf16.msrb.mxu2 %v1996_v43  ;;  %v2059_v43 = vld [vmem:[#allocation8 + $0x18] sm:$0xf0]  ;;  %v247_v58 = vperm.slane %v2865_v46, 0 }
  0x7a   :  { %905 = vmatpush.bf16.msra.mxu3 %v1924_v51  ;;  %v2062_v45 = vor.u32 %v2467_v41, %v2059_v43  ;;  %v2466_v51 = vld [vmem:[#allocation8 + $0x4] sm:$0xf0]  ;;  %v2488_v41 = vld [vmem:[#allocation8 + $0xb4] sm:$0xf0] }
  0x7b   :  { %891 = vmatpush.bf16.msra.mxu1 %v1860_v59  ;;  %v2050_v53 = vor.u32 %v2466_v51, %v2049_v50  ;;  %v2138_v43 = vor.u32 %v2488_v41, %v2137_v40  ;;  %v2528_v40 = vld [vmem:[#allocation10 + $0xf4] sm:$0xf0]  ;;  %v2511_v41 = vld [vmem:[#allocation10 + $0x74] sm:$0xf] }
  0x7c   :  { %878 = vmatpush.bf16.msra.mxu0 %v1788_v62 }
  0x7d   :  { %919 = vmatpush.bf16.msrb.mxu2 %v1988_v61 }
  0x7e   :  { %906 = vmatpush.bf16.msra.mxu3 %v1916_v2 }
  0x7f   :  { %892 = vmatpush.bf16.msra.mxu1 %v1852_v7  ;;  %879 = vmatmul.bf16.vlgmr.msra.gmra.mxu0 %v2835_v54  ;;  %v2098_v54 = vor.u32 %v2478_v16, %v2097_v15  ;;  %v2495_v7 = vld [vmem:[#allocation8 + $0xf4] sm:$0xf]  ;;  %v2493_v15 = vld [vmem:[#allocation8 + $0xe4] sm:$0xf] }
  0x80   :  { %934 = vmatpush.bf16.msrb.mxu0 %v2044_v6  ;;  %v2496_v6 = vld [vmem:[#allocation8 + $0xf4] sm:$0xf0]  ;;  %v2174_v11 = vor.u32 %v2495_v7, %v2171_v9  ;;  %v2113_v7 = vld [vmem:[#allocation8 + $0x80] sm:$0xf]  ;;  %v2481_v9 = vld [vmem:[#allocation8 + $0x84] sm:$0xf] }
  0x81   :  { %907 = vmatmul.bf16.vlgmr.msra.gmra.mxu3 %v2851_v37  ;;  %920 = vmatpush.bf16.msrb.mxu2 %v1980_v8  ;;  %v2099_v37 = vld [vmem:[#allocation8 + $0x68] sm:$0xf0]  ;;  %v2170_v8 = vor.u32 %v2496_v6, %v2169_v5 }
  0x82   :  { %893 = vmatmul.bf16.vlgmr.msra.gmra.mxu1 %v2839_v63  ;;  %v2102_v4 = vor.u32 %v2477_v17, %v2099_v37  ;;  %v2089_v63 = vld [vmem:[#allocation8 + $0x50] sm:$0xf]  ;;  %v2163_v37 = vld [vmem:[#allocation8 + $0xe8] sm:$0xf0] }
  0x83   :  { %1145 = vmatpush.bf16.msrb.mxu1 %v2106_v12  ;;  %1159 = vmatpush.bf16.msrb.mxu3 %v2170_v8  ;;  %v2482_v8 = vld [vmem:[#allocation8 + $0x84] sm:$0xf0] }
  0x84   :  { %921 = vmatmul.bf16.vlgmr.msrb.gmra.mxu2 %v2853_v44  ;;  %1173 = vmatpush.bf16.msra.mxu0 %v2110_v14  ;;  %v2475_v44 = vld [vmem:[#allocation8 + $0x54] sm:$0xf]  ;;  %v2494_v14 = vld [vmem:[#allocation8 + $0xe4] sm:$0xf0] }
  0x85   :  { %v2094_v19 = vor.u32 %v2475_v44, %v2091_v60  ;;  %1187 = vmatpush.bf16.msra.mxu2 %v2174_v11  ;;  %v2115_v11 = vld [vmem:[#allocation8 + $0x88] sm:$0xf0] }
  0x87   :  { %1146 = vmatpush.bf16.msrb.mxu1 %v2098_v54  ;;  %v2162_v54 = vor.u32 %v2494_v14, %v2161_v13  ;;  %v248_v13 = vperm.slane %v2865_v46, 1 }
  0x88   :  { %1174 = vmatpush.bf16.msra.mxu0 %v2102_v4 }
  0x89   :  { %1160 = vmatpush.bf16.msrb.mxu3 %v2162_v54 }
  0x8c   :  { %1175 = vmatpush.bf16.msra.mxu0 %v2094_v19  ;;  %v2492_v19 = vld [vmem:[#allocation8 + $0xd4] sm:$0xf0] }
  0x8f   :  { %2046 = vmatmul.msk.bf16.vlgmr.msrb.gmra.mxu0 %vm741_vm0, %v2847_v48  ;;  %v2090_v48 = vor.u32 %v2476_v18, %v2089_v63  ;;  %v2166_v63 = vor.u32 %v2493_v15, %v2163_v37 }
  0x90   :  { %1176 = vmatpush.bf16.msra.mxu0 %v2086_v25 }
  0x91   :  { %1147 = vmatpush.bf16.msrb.mxu1 %v2090_v48  ;;  %1188 = vmatpush.bf16.msra.mxu2 %v2166_v63  ;;  %v2153_v48 = vld [vmem:[#allocation8 + $0xd0] sm:$0xf] }
  0x92   :  { %v2154_v22 = vor.u32 %v2492_v19, %v2153_v48 }
  0x94   :  { %1177 = vmatpush.bf16.msra.mxu0 %v2078_v31  ;;  %1161 = vmatpush.bf16.msrb.mxu3 %v2154_v22  ;;  %v2489_v31 = vld [vmem:[#allocation8 + $0xc4] sm:$0xf] }
  0x95   :  { %1148 = vmatpush.bf16.msrb.mxu1 %v2082_v23  ;;  %v2155_v23 = vld [vmem:[#allocation8 + $0xd8] sm:$0xf0]  ;;  %v2150_v34 = vor.u32 %v2489_v31, %v2147_v32 }
  0x96   :  { %v2158_v24 = vor.u32 %v2491_v20, %v2155_v23 }
  0x98   :  { %1178 = vmatpush.bf16.msra.mxu0 %v2070_v38  ;;  %1189 = vmatpush.bf16.msra.mxu2 %v2158_v24 }
  0x99   :  { %1149 = vmatpush.bf16.msrb.mxu1 %v2074_v29  ;;  %1162 = vmatpush.bf16.msrb.mxu3 %v2146_v30 }
  0x9c   :  { %1179 = vmatpush.bf16.msra.mxu0 %v2062_v45  ;;  %1190 = vmatpush.bf16.msra.mxu2 %v2150_v34  ;;  %v2139_v45 = vld [vmem:[#allocation8 + $0xb8] sm:$0xf0] }
  0x9d   :  { %1150 = vmatpush.bf16.msrb.mxu1 %v2066_v35  ;;  %1163 = vmatpush.bf16.msrb.mxu3 %v2138_v43 }
  0xa0   :  { %1180 = vmatpush.bf16.msra.mxu0 %v2054_v57  ;;  %v2131_v57 = vld [vmem:[#allocation8 + $0xa8] sm:$0xf0] }
  0xa1   :  { %1151 = vmatpush.bf16.msrb.mxu1 %v2058_v42  ;;  %v2487_v42 = vld [vmem:[#allocation8 + $0xb4] sm:$0xf] }
  0xa5   :  { %1152 = vmatpush.bf16.msrb.mxu1 %v2050_v53  ;;  %v2486_v53 = vld [vmem:[#allocation8 + $0xa4] sm:$0xf0] }
  0xa6   :  { %v2130_v55 = vor.u32 %v2486_v53, %v2129_v52  ;;  %v2510_v52 = vld [vmem:[#allocation10 + $0x64] sm:$0xf0]  ;;  %v2289_v53 = vld [vmem:[#allocation10 + $0xe0] sm:$0xf] }
  0xa8   :  { %1164 = vmatpush.bf16.msrb.mxu3 %v2130_v55  ;;  %v2526_v55 = vld [vmem:[#allocation10 + $0xe4] sm:$0xf0] }
  0xbc   :  { %v754_v47 = vpop.f32.mrf.mxu0 }
  0xbd   :  { %v755_v59 = vadd.f32 %v754_v47, %v247_v58 }
  0xbf   :  { %v768_v56 = vpop.f32.mrf.mxu1 }
  0xc0   :  { %v769_v0 = vadd.f32 %v768_v56, %v755_v59  ;;  %v2485_v56 = vld [vmem:[#allocation8 + $0xa4] sm:$0xf] }
  0xc1   :  { %v2134_v59 = vor.u32 %v2485_v56, %v2131_v57  ;;  %v2290_v57 = vor.u32 %v2526_v55, %v2289_v53  ;;  %v2187_v53 = vld [vmem:[#allocation10 + $0x18] sm:$0xf0] }
  0xc3   :  { %v782_v49 = vpop.f32.mrf.mxu2 }
  0xc4   :  { %v756_v61 = vpop.f32.mrf.mxu0  ;;  %v796_v1 = vpop.f32.mrf.mxu3  ;;  %v783_v10 = vadd.f32 %v782_v49, %v769_v0  ;;  %v2142_v49 = vor.u32 %v2487_v42, %v2139_v45  ;;  %v2484_v0 = vld [vmem:[#allocation8 + $0x94] sm:$0xf0]  ;;  %v2235_v42 = vld [vmem:[#allocation10 + $0x78] sm:$0xf0] }
  0xc5   :  { %v757_v3 = vadd.f32 %v756_v61, %v247_v58  ;;  %v2238_v45 = vor.u32 %v2511_v41, %v2235_v42  ;;  %v2517_v41 = vld [vmem:[#allocation10 + $0xa4] sm:$0xf]  ;;  %v2259_v42 = vld [vmem:[#allocation10 + $0xa8] sm:$0xf0] }
  0xc6   :  { %v797_v4 = vadd.f32 %v796_v1, %v783_v10  ;;  %1191 = vmatpush.bf16.msra.mxu2 %v2142_v49  ;;  %v2483_v1 = vld [vmem:[#allocation8 + $0x94] sm:$0xf]  ;;  %v2114_v10 = vor.u32 %v2482_v8, %v2113_v7  ;;  %v2299_v49 = vld [vmem:[#allocation10 + $0xf8] sm:$0xf0] }
  0xc7   :  { %v770_v2 = vpop.f32.mrf.mxu1  ;;  %1433 = vmatpush.bf16.msrb.mxu0 %v2238_v45  ;;  %v2507_v7 = vld [vmem:[#allocation10 + $0x54] sm:$0xf]  ;;  %v2185_v45 = vld [vmem:[#allocation10 + $0x10] sm:$0xf] }
  0xc8   :  { %v771_v12 = vadd.f32 %v770_v2, %v757_v3  ;;  %v2123_v3 = vld [vmem:[#allocation8 + $0x98] sm:$0xf0] }
  0xc9   :  { %v2126_v6 = vor.u32 %v2483_v1, %v2123_v3  ;;  %v2217_v1 = vld [vmem:[#allocation10 + $0x50] sm:$0xf] }
  0xca   :  { %1192 = vmatpush.bf16.msra.mxu2 %v2134_v59  ;;  %v2227_v59 = vld [vmem:[#allocation10 + $0x68] sm:$0xf0] }
  0xcb   :  { %v784_v62 = vpop.f32.mrf.mxu2 }
  0xcc   :  { %v785_v44 = vadd.f32 %v784_v62, %v771_v12  ;;  %v798_v21 = vpop.f32.mrf.mxu3  ;;  %v2121_v62 = vld [vmem:[#allocation8 + $0x90] sm:$0xf]  ;;  %v2118_v12 = vor.u32 %v2481_v9, %v2115_v11  ;;  %v2219_v9 = vld [vmem:[#allocation10 + $0x58] sm:$0xf0] }
  0xcd   :  { %v2122_v2 = vor.u32 %v2484_v0, %v2121_v62  ;;  %v2291_v0 = vld [vmem:[#allocation10 + $0xe8] sm:$0xf0]  ;;  %v2283_v11 = vld [vmem:[#allocation10 + $0xd8] sm:$0xf0] }
  0xce   :  { %v799_v25 = vadd.f32 %v798_v21, %v785_v44  ;;  %1193 = vmatpush.bf16.msra.mxu2 %v2126_v6  ;;  %v2524_v6 = vld [vmem:[#allocation10 + $0xd4] sm:$0xf0] }
  0xcf   :  { %1165 = vmatpush.bf16.msrb.mxu3 %v2122_v2  ;;  %v2508_v2 = vld [vmem:[#allocation10 + $0x54] sm:$0xf0] }
  0xd0   :  { %v2218_v8 = vor.u32 %v2508_v2, %v2217_v1  ;;  %v2514_v2 = vld [vmem:[#allocation10 + $0x84] sm:$0xf0] }
  0xd2   :  { %1194 = vmatpush.bf16.msra.mxu2 %v2118_v12 }
  0xd3   :  { %v838_v17 = vpop.f32.mrf.mxu2  ;;  %1166 = vmatpush.bf16.msrb.mxu3 %v2114_v10  ;;  %v2523_v10 = vld [vmem:[#allocation10 + $0xd4] sm:$0xf] }
  0xdb   :  { %v840_v36 = vpop.f32.mrf.mxu2 }
  0xdc   :  { %v810_v16 = vpop.f32.mrf.mxu0 }
  0xdd   :  { %v811_v60 = vadd.f32 %v810_v16, %v797_v4 }
  0xdf   :  { %v824_v18 = vpop.f32.mrf.mxu1 }
  0xe0   :  { %v825_v26 = vadd.f32 %v824_v18, %v811_v60 }
  0xe2   :  { %v839_v38 = vadd.f32 %v838_v17, %v825_v26 }
  0xe4   :  { %v812_v29 = vpop.f32.mrf.mxu0  ;;  %v941_v50 = vmax.f32 %v839_v38, 0.0  ;;  %v852_v61 = vpop.f32.mrf.mxu3  ;;  %v2297_v38 = vld [vmem:[#allocation10 + $0xf0] sm:$0xf] }
  0xe5   :  { %v813_v33 = vadd.f32 %v812_v29, %v799_v25  ;;  %v853_v17 = vadd.f32 %v852_v61, %v248_v13  ;;  %v2298_v43 = vor.u32 %v2528_v40, %v2297_v38  ;;  %v2525_v61 = vld [vmem:[#allocation10 + $0xe4] sm:$0xf]  ;;  %v2195_v38 = vld [vmem:[#allocation10 + $0x28] sm:$0xf0] }
  0xe6   :  { %v2294_v3 = vor.u32 %v2525_v61, %v2291_v0  ;;  %v2177_v61 = vld [vmem:[#allocation10] sm:$0xf] }
  0xe7   :  { %v826_v35 = vpop.f32.mrf.mxu1  ;;  %v866_v5 = vpop.f32.mrf.mxu2  ;;  %1419 = vmatpush.bf16.msra.mxu3 %v2298_v43  ;;  %v2262_v43 = vor.u32 %v2517_v41, %v2259_v42  ;;  %v2241_v0 = vld [vmem:[#allocation10 + $0x80] sm:$0xf]  ;;  %v2530_v41 = vld [vmem:[#allocation11 + $0x8] sm:$0xff] }
  0xe8   :  { %v827_v39 = vadd.f32 %v826_v35, %v813_v33  ;;  %v867_v37 = vadd.f32 %v866_v5, %v853_v17  ;;  %v2233_v35 = vld [vmem:[#allocation10 + $0x70] sm:$0xf]  ;;  %v2286_v17 = vor.u32 %v2523_v10, %v2283_v11  ;;  %v2536_v11 = vld [vmem:[#allocation11 + $0x38] sm:$0xff]  ;;  %v2538_v42 = vld [vmem:[#allocation11 + $0x48] sm:$0xff] }
  0xe9   :  { %v2281_v5 = vld [vmem:[#allocation10 + $0xd0] sm:$0xf] }
  0xea   :  { %v841_v47 = vadd.f32 %v840_v36, %v827_v39  ;;  %v2512_v36 = vld [vmem:[#allocation10 + $0x74] sm:$0xf0]  ;;  %v2282_v12 = vor.u32 %v2524_v6, %v2281_v5  ;;  %v2179_v5 = vld [vmem:[#allocation10 + $0x8] sm:$0xf0]  ;;  %v2242_v6 = vor.u32 %v2514_v2, %v2241_v0 }
  0xeb   :  { %v2234_v39 = vor.u32 %v2512_v36, %v2233_v35  ;;  %1420 = vmatpush.bf16.msra.mxu3 %v2290_v57  ;;  %v2518_v35 = vld [vmem:[#allocation10 + $0xa4] sm:$0xf0]  ;;  %v2501_v36 = vld [vmem:[#allocation10 + $0x24] sm:$0xf]  ;;  %v2515_v57 = vld [vmem:[#allocation10 + $0x94] sm:$0xf] }
  0xec   :  { %v943_v51 = vmax.f32 %v841_v47, 0.0  ;;  %v854_v14 = vpop.f32.mrf.mxu3  ;;  %v2527_v47 = vld [vmem:[#allocation10 + $0xf4] sm:$0xf]  ;;  %v2198_v40 = vor.u32 %v2501_v36, %v2195_v38  ;;  %v2532_v36 = vld [vmem:[#allocation11 + $0x18] sm:$0xff] }
  0xed   :  { %v855_v4 = vadd.f32 %v854_v14, %v248_v13  ;;  %1405 = vmatpush.bf16.msra.mxu1 %v2234_v39  ;;  %v2222_v13 = vor.u32 %v2507_v7, %v2219_v9  ;;  %v2209_v14 = vld [vmem:[#allocation10 + $0x40] sm:$0xf]  ;;  %v2243_v9 = vld [vmem:[#allocation10 + $0x88] sm:$0xf0]  ;;  %v2540_v38 = vld [vmem:[#allocation11 + $0x58] sm:$0xff] }
  0xee   :  { %v945_v58 = vpack.c.bf16 %v943_v51, %v941_v50  ;;  %v2225_v50 = vld [vmem:[#allocation10 + $0x60] sm:$0xf]  ;;  %v2302_v51 = vor.u32 %v2527_v47, %v2299_v49  ;;  %v2500_v47 = vld [vmem:[#allocation10 + $0x14] sm:$0xf0]  ;;  %v2249_v49 = vld [vmem:[#allocation10 + $0x90] sm:$0xf] }
  0xef   :  { %v868_v16 = vpop.f32.mrf.mxu2  ;;  %v2226_v56 = vor.u32 %v2510_v52, %v2225_v50  ;;  %1421 = vmatpush.bf16.msra.mxu3 %v2282_v12  ;;  %v2186_v50 = vor.u32 %v2500_v47, %v2185_v45  ;;  %v2499_v52 = vld [vmem:[#allocation10 + $0x14] sm:$0xf]  ;;  %v2544_v12 = vld [vmem:[#allocation11 + $0x78] sm:$0xff]  ;;  %v2537_v45 = vld [vmem:[#allocation11 + $0x40] sm:$0xff] }
  0xf0   :  { %1153 = vmatmul.bf16.vlgmr.msrb.gmra.mxu1 %v945_v58  ;;  %1181 = vmatmul.bf16.vlgmr.msra.gmra.mxu0 %v945_v58  ;;  %v869_v60 = vadd.f32 %v868_v16, %v855_v4  ;;  %v2509_v58 = vld [vmem:[#allocation10 + $0x64] sm:$0xf]  ;;  %v2273_v16 = vld [vmem:[#allocation10 + $0xc0] sm:$0xf]  ;;  %v2211_v4 = vld [vmem:[#allocation10 + $0x48] sm:$0xf0] }
  0xf1   :  { %1447 = vmatpush.bf16.msrb.mxu2 %v2302_v51  ;;  %v2230_v62 = vor.u32 %v2509_v58, %v2227_v59  ;;  %1406 = vmatpush.bf16.msra.mxu1 %v2226_v56  ;;  %v2516_v51 = vld [vmem:[#allocation10 + $0x94] sm:$0xf0]  ;;  %v2190_v56 = vor.u32 %v2499_v52, %v2187_v53  ;;  %v2251_v58 = vld [vmem:[#allocation10 + $0x98] sm:$0xf0] }
  0xf2   :  { %v2250_v55 = vor.u32 %v2516_v51, %v2249_v49  ;;  %v2254_v59 = vor.u32 %v2515_v57, %v2251_v58 }
  0xf3   :  { %1434 = vmatpush.bf16.msrb.mxu0 %v2230_v62  ;;  %v2498_v62 = vld [vmem:[#allocation10 + $0x4] sm:$0xf0] }
  0xf4   :  { %v2178_v1 = vor.u32 %v2498_v62, %v2177_v61 }
  0xf5   :  { %1448 = vmatpush.bf16.msrb.mxu2 %v2294_v3  ;;  %1407 = vmatpush.bf16.msra.mxu1 %v2218_v8  ;;  %v2497_v3 = vld [vmem:[#allocation10 + $0x4] sm:$0xf] }
  0xf6   :  { %v2182_v7 = vor.u32 %v2497_v3, %v2179_v5  ;;  %v2513_v8 = vld [vmem:[#allocation10 + $0x84] sm:$0xf] }
  0xf7   :  { %1435 = vmatpush.bf16.msrb.mxu0 %v2222_v13  ;;  %v2246_v10 = vor.u32 %v2513_v8, %v2243_v9  ;;  %v2535_v13 = vld [vmem:[#allocation11 + $0x30] sm:$0xff] }
  0xf9   :  { %1449 = vmatpush.bf16.msrb.mxu2 %v2286_v17 }
  0xfc   :  { %v880_v15 = vpop.f32.mrf.mxu0 }
  0xfd   :  { %v881_v48 = vadd.f32 %v880_v15, %v867_v37  ;;  %v2506_v15 = vld [vmem:[#allocation10 + $0x44] sm:$0xf0]  ;;  %v2505_v37 = vld [vmem:[#allocation10 + $0x44] sm:$0xf] }
  0xff   :  { %v894_v54 = vpop.f32.mrf.mxu1 }
 0x100   :  { %v895_v21 = vadd.f32 %v894_v54, %v881_v48  ;;  %v2522_v54 = vld [vmem:[#allocation10 + $0xc4] sm:$0xf0]  ;;  %v2214_v48 = vor.u32 %v2505_v37, %v2211_v4  ;;  %v979_v37 = vld [vmem:[%s2888_s4] sm:$0x3] }
 0x102   :  { %1436 = vmatpush.bf16.msrb.mxu0 %v2214_v48 }
 0x104   :  { %v908_v63 = vpop.f32.mrf.mxu3  ;;  %v882_v18 = vpop.f32.mrf.mxu0 }
 0x105   :  { %v883_v19 = vadd.f32 %v882_v18, %v869_v60  ;;  %v909_v24 = vadd.f32 %v908_v63, %v895_v21  ;;  %v2521_v63 = vld [vmem:[#allocation10 + $0xc4] sm:$0xf]  ;;  %v2275_v18 = vld [vmem:[#allocation10 + $0xc8] sm:$0xf0]  ;;  %v2274_v60 = vor.u32 %v2522_v54, %v2273_v16  ;;  %v2504_v21 = vld [vmem:[#allocation10 + $0x34] sm:$0xf0] }
 0x106   :  { %v2542_v16 = vld [vmem:[#allocation11 + $0x68] sm:$0xff] }
 0x107   :  { %v922_v44 = vpop.f32.mrf.mxu2  ;;  %v896_v20 = vpop.f32.mrf.mxu1  ;;  %1422 = vmatpush.bf16.msra.mxu3 %v2274_v60 }
 0x108   :  { %v897_v46 = vadd.f32 %v896_v20, %v883_v19  ;;  %v923_v27 = vadd.f32 %v922_v44, %v909_v24  ;;  %v2210_v44 = vor.u32 %v2506_v15, %v2209_v14  ;;  %v2278_v19 = vor.u32 %v2521_v63, %v2275_v18  ;;  %v2201_v20 = vld [vmem:[#allocation10 + $0x30] sm:$0xf]  ;;  %v2520_v24 = vld [vmem:[#allocation10 + $0xb4] sm:$0xf0]  ;;  %v2534_v15 = vld [vmem:[#allocation11 + $0x28] sm:$0xff] }
 0x109   :  { %v2543_v14 = vld [vmem:[#allocation11 + $0x70] sm:$0xff]  ;;  %v981_v18 = vperm.slane %v979_v37, 0 }
 0x10a   :  { %1408 = vmatpush.bf16.msra.mxu1 %v2210_v44  ;;  %1450 = vmatpush.bf16.msrb.mxu2 %v2278_v19  ;;  %v982_v44 = vperm.slane %v979_v37, 1 }
 0x10c   :  { %v910_v22 = vpop.f32.mrf.mxu3  ;;  %v936_v23 = vpop.f32.mrf.mxu0 }
 0x10d   :  { %v911_v25 = vadd.f32 %v910_v22, %v897_v46  ;;  %v937_v28 = vadd.f32 %v936_v23, %v923_v27  ;;  %v2265_v22 = vld [vmem:[#allocation10 + $0xb0] sm:$0xf]  ;;  %v2202_v23 = vor.u32 %v2504_v21, %v2201_v20  ;;  %v2503_v46 = vld [vmem:[#allocation10 + $0x34] sm:$0xf] }
 0x10f   :  { %v924_v26 = vpop.f32.mrf.mxu2  ;;  %v942_v32 = vmax.f32 %v937_v28, 0.0  ;;  %v2519_v28 = vld [vmem:[#allocation10 + $0xb4] sm:$0xf]  ;;  %1409 = vmatpush.bf16.msra.mxu1 %v2202_v23 }
 0x110   :  { %v925_v29 = vadd.f32 %v924_v26, %v911_v25  ;;  %v2203_v25 = vld [vmem:[#allocation10 + $0x38] sm:$0xf0]  ;;  %v2266_v26 = vor.u32 %v2520_v24, %v2265_v22 }
 0x111   :  { %v2206_v27 = vor.u32 %v2503_v46, %v2203_v25 }
 0x112   :  { %1423 = vmatpush.bf16.msra.mxu3 %v2266_v26 }
 0x113   :  { %1437 = vmatpush.bf16.msrb.mxu0 %v2206_v27 }
 0x114   :  { %v938_v30 = vpop.f32.mrf.mxu0 }
 0x115   :  { %v939_v31 = vadd.f32 %v938_v30, %v925_v29  ;;  %v2267_v29 = vld [vmem:[#allocation10 + $0xb8] sm:$0xf0] }
 0x116   :  { %v2270_v30 = vor.u32 %v2519_v28, %v2267_v29 }
 0x117   :  { %v944_v33 = vmax.f32 %v939_v31, 0.0  ;;  %v2193_v31 = vld [vmem:[#allocation10 + $0x20] sm:$0xf]  ;;  %1438 = vmatpush.bf16.msrb.mxu0 %v2198_v40  ;;  %v2539_v40 = vld [vmem:[#allocation11 + $0x50] sm:$0xff] }
 0x118   :  { %1451 = vmatpush.bf16.msrb.mxu2 %v2270_v30 }
 0x119   :  { %v946_v34 = vpack.c.bf16 %v944_v33, %v942_v32  ;;  %v2502_v32 = vld [vmem:[#allocation10 + $0x24] sm:$0xf0]  ;;  %v2257_v33 = vld [vmem:[#allocation10 + $0xa0] sm:$0xf] }
 0x11a   :  { %v2258_v39 = vor.u32 %v2518_v35, %v2257_v33  ;;  %v2541_v35 = vld [vmem:[#allocation11 + $0x60] sm:$0xff] }
 0x11b   :  { %1167 = vmatmul.bf16.vlgmr.msrb.gmra.mxu3 %v946_v34  ;;  %1195 = vmatmul.bf16.vlgmr.msra.gmra.mxu2 %v946_v34  ;;  %v2194_v34 = vor.u32 %v2502_v32, %v2193_v31 }
 0x11c   :  { %1424 = vmatpush.bf16.msra.mxu3 %v2258_v39  ;;  %1452 = vmatpush.bf16.msrb.mxu2 %v2262_v43  ;;  %v2531_v39 = vld [vmem:[#allocation11 + $0x10] sm:$0xff]  ;;  %v2529_v43 = vld [vmem:[#allocation11] sm:$0xff] }
 0x11d   :  { %1410 = vmatpush.bf16.msra.mxu1 %v2194_v34  ;;  %1439 = vmatpush.bf16.msrb.mxu0 %v2190_v56  ;;  %v2533_v34 = vld [vmem:[#allocation11 + $0x20] sm:$0xff] }
 0x120   :  { %1425 = vmatpush.bf16.msra.mxu3 %v2250_v55  ;;  %1453 = vmatpush.bf16.msrb.mxu2 %v2254_v59 }
 0x121   :  { %1411 = vmatpush.bf16.msra.mxu1 %v2186_v50  ;;  %1440 = vmatpush.bf16.msrb.mxu0 %v2182_v7  ;;  %v1239_v50 = vld [vmem:[%s2890_s6] sm:$0x3] }
 0x122   :  { %v1241_v52 = vperm.slane %v1239_v50, 0  ;;  %v1242_v55 = vperm.slane %v1239_v50, 1 }
 0x124   :  { %1426 = vmatpush.bf16.msra.mxu3 %v2242_v6  ;;  %1454 = vmatpush.bf16.msrb.mxu2 %v2246_v10 }
 0x125   :  { %1412 = vmatpush.bf16.msra.mxu1 %v2178_v1 }
 0x128   :  { %1613 = vmatpush.bf16.msrb.mxu3 %v2544_v12 }
 0x129   :  { %1599 = vmatpush.bf16.msrb.mxu1 %v2536_v11 }
 0x12c   :  { %1614 = vmatpush.bf16.msrb.mxu3 %v2543_v14 }
 0x12d   :  { %1600 = vmatpush.bf16.msrb.mxu1 %v2535_v13 }
 0x130   :  { %1615 = vmatpush.bf16.msrb.mxu3 %v2542_v16 }
 0x131   :  { %1601 = vmatpush.bf16.msrb.mxu1 %v2534_v15  ;;  %v2563_v15 = vld [vmem:[%s2892_s8] ss:$0 sm:$0xff] }
 0x134   :  { %1616 = vmatpush.bf16.msrb.mxu3 %v2541_v35 }
 0x135   :  { %1602 = vmatpush.bf16.msrb.mxu1 %v2533_v34 }
 0x138   :  { %1617 = vmatpush.bf16.msrb.mxu3 %v2540_v38 }
 0x139   :  { %1603 = vmatpush.bf16.msrb.mxu1 %v2532_v36 }
 0x13c   :  { %1618 = vmatpush.bf16.msrb.mxu3 %v2539_v40 }
 0x13d   :  { %1604 = vmatpush.bf16.msrb.mxu1 %v2531_v39 }
 0x140   :  { %1619 = vmatpush.bf16.msrb.mxu3 %v2538_v42 }
 0x141   :  { %1605 = vmatpush.bf16.msrb.mxu1 %v2530_v41 }
 0x144   :  { %1620 = vmatpush.bf16.msrb.mxu3 %v2537_v45 }
 0x145   :  { %1606 = vmatpush.bf16.msrb.mxu1 %v2529_v43 }
 0x16d   :  { %v1154_v17 = vpop.f32.mrf.mxu1  ;;  %v1182_v54 = vpop.f32.mrf.mxu0 }
 0x16e   :  { %v1155_v19 = vadd.f32 %v1154_v17, %v981_v18  ;;  %v1183_v20 = vadd.f32 %v1182_v54, %v982_v44 }
 0x175   :  { %v1156_v60 = vpop.f32.mrf.mxu1  ;;  %v1184_v48 = vpop.f32.mrf.mxu0 }
 0x176   :  { %v1157_v21 = vadd.f32 %v1156_v60, %v981_v18  ;;  %v1185_v22 = vadd.f32 %v1184_v48, %v982_v44 }
 0x19e   :  { %v1168_v4 = vpop.f32.mrf.mxu3  ;;  %v1196_v63 = vpop.f32.mrf.mxu2 }
 0x19f   :  { %v1169_v23 = vadd.f32 %v1168_v4, %v1155_v19  ;;  %v1197_v24 = vadd.f32 %v1196_v63, %v1183_v20 }
 0x1a1   :  { %v1201_v28 = vmax.f32 %v1169_v23, 0.0  ;;  %v1202_v29 = vmax.f32 %v1197_v24, 0.0 }
 0x1a6   :  { %v1170_v46 = vpop.f32.mrf.mxu3  ;;  %v1198_v25 = vpop.f32.mrf.mxu2 }
 0x1a7   :  { %v1171_v26 = vadd.f32 %v1170_v46, %v1157_v21  ;;  %v1199_v27 = vadd.f32 %v1198_v25, %v1185_v22 }
 0x1a9   :  { %v1203_v30 = vmax.f32 %v1171_v26, 0.0  ;;  %v1204_v31 = vmax.f32 %v1199_v27, 0.0 }
 0x1ab   :  { %v1205_v32 = vpack.c.bf16 %v1203_v30, %v1201_v28  ;;  %v1206_v33 = vpack.c.bf16 %v1204_v31, %v1202_v29 }
 0x1ad   :  { %1413 = vmatmul.bf16.vlgmr.msra.gmra.mxu1 %v1205_v32  ;;  %1427 = vmatmul.bf16.vlgmr.msra.gmra.mxu3 %v1206_v33 }
 0x1ae   :  { %1441 = vmatmul.bf16.vlgmr.msrb.gmra.mxu0 %v1205_v32  ;;  %1455 = vmatmul.bf16.vlgmr.msrb.gmra.mxu2 %v1206_v33 }
 0x22a   :  { %v1414_v47 = vpop.f32.mrf.mxu1 }
 0x22b   :  { %v1442_v49 = vpop.f32.mrf.mxu0  ;;  %v1415_v57 = vadd.f32 %v1414_v47, %v1241_v52 }
 0x22c   :  { %v1443_v59 = vadd.f32 %v1442_v49, %v1242_v55 }
 0x230   :  { %v1428_v51 = vpop.f32.mrf.mxu3 }
 0x231   :  { %v1456_v53 = vpop.f32.mrf.mxu2  ;;  %v1429_v61 = vadd.f32 %v1428_v51, %v1415_v57 }
 0x232   :  { %v1416_v56 = vpop.f32.mrf.mxu1  ;;  %v1457_v0 = vadd.f32 %v1456_v53, %v1443_v59 }
 0x233   :  { %v1444_v58 = vpop.f32.mrf.mxu0  ;;  %v1417_v62 = vadd.f32 %v1416_v56, %v1241_v52  ;;  %v1461_v7 = vmax.f32 %v1429_v61, 0.0 }
 0x234   :  { %v1445_v1 = vadd.f32 %v1444_v58, %v1242_v55  ;;  %v1462_v9 = vmax.f32 %v1457_v0, 0.0 }
 0x238   :  { %v1430_v2 = vpop.f32.mrf.mxu3 }
 0x239   :  { %v1431_v3 = vadd.f32 %v1430_v2, %v1417_v62  ;;  %v1458_v5 = vpop.f32.mrf.mxu2 }
 0x23a   :  { %v1459_v6 = vadd.f32 %v1458_v5, %v1445_v1 }
 0x23b   :  { %v1463_v8 = vmax.f32 %v1431_v3, 0.0 }
 0x23c   :  { %v1464_v10 = vmax.f32 %v1459_v6, 0.0 }
 0x23d   :  { %v1465_v11 = vpack.c.bf16 %v1463_v8, %v1461_v7 }
 0x23e   :  { %v1466_v12 = vpack.c.bf16 %v1464_v10, %v1462_v9 }
 0x23f   :  { %1607 = vmatmul.bf16.vlgmr.msrb.gmra.mxu1 %v1465_v11 }
 0x240   :  { %1621 = vmatmul.bf16.vlgmr.msrb.gmra.mxu3 %v1466_v12 }
 0x2bc   :  { %v1608_v13 = vpop.f32.mrf.mxu1 }
 0x2bd   :  { %v1609_v17 = vadd.f32 %v2563_v15, %v1608_v13 }
 0x2c3   :  { %v1622_v14 = vpop.f32.mrf.mxu3 }
 0x2c4   :  { %v1610_v16 = vpop.f32.mrf.mxu1  ;;  %v1623_v4 = vadd.f32 %v1622_v14, %v1609_v17 }
 0x2c5   :  { %v1611_v54 = vadd.f32 %v2563_v15, %v1610_v16 }
 0x2cb   :  { %v1624_v37 = vpop.f32.mrf.mxu3 }
 0x2cc   :  { %v1625_v63 = vadd.f32 %v1624_v37, %v1611_v54 }
 0x2ce   :  { %v2548_v18 = vpack.c.bf16 %v1625_v63, %v1623_v4 }
 0x2d0   :  { %2549 = vst [vmem:[#allocation13] sm:$0xff] %v2548_v18  }
 0x2d1   :  { %1643 = dma.vmem_to_hbm [thread:$0]  %s1636_s22, 128, %s1638_s24, [#allocation4], %s2752_s20, %s2752_s20, %s2753_s5  }
 0x2d2   :  { %2740 = dma.done.wait [#allocation4], 128  }
 0x2d3   :  { %2741 = vsyncadd [#allocation4], 4294967168 }
 0x2d4   :  { %1648 = vsyncpa [#allocation3], 1 }
 0x2d5   :  { %1649 = vsyncpa [#allocation6], 1 }
 0x2d6   :  { %1650 = vsyncpa [#allocation9], 1 }
 0x2d7   :  { %1651 = vsyncpa [#allocation12], 1 }
 0x2d8   :  { %1652 = vsyncpa [#allocation4], 1 }

</bundles_post_ra>
